<compile_context>
chip_gen: v6e
topology: v6e:2x2x1
jax: 0.10.0
libtpu: 0.0.40
codegen_flags: <defaults>
</compile_context>

<pallas_src>
import numpy as np
import jax
import jax.numpy as jnp
from jax import lax
from jax.experimental import pallas as pl
from jax.experimental.pallas import tpu as pltpu

# ---- hyperparameters implied by RAFT_GRU.__init__ (module-level globals) ----
BATCH = 2                        # batch_sz
HIDDEN = 32                      # hidden_dim
LEN_LOOKUP = 1                   # len_of_lookup
DK = 256                         # self.Dk
DV = 4 * LEN_LOOKUP + 4          # self.Dv = 8
CX = 2 * DV + DK                 # channels of x = 272
CIN = CX + HIDDEN                # conv in_channels = 304
IMG_H, IMG_W = 64, 64            # H, W (feature maps are H//8 x W//8)
HH, WW = IMG_H // 8, IMG_W // 8  # 8 x 8
HP, WP = HH + 2, WW + 2          # spatially padded (for 3x3 'same')
HW = HH * WW                     # 64
M = BATCH * HW                   # 128  (rows of every matmul: batch folded in)
KX = 9 * CX                      # 2448 (im2col K for the x-part)
KH = 9 * HIDDEN                  # 288  (im2col K for the h / rt*h part)


def _gru_kernel(x_col_ref, h_col_ref, h_ref,
                w_x_ref, w_hzr_ref, w_hh_ref,
                b_zr_ref, b_h_ref,
                out_ref, rh_pad_ref):
    """Single-invocation fused ConvGRU step (batch folded into rows).

    x_col_ref : (M, 9*CX)      bf16  im2col of x (precomputed in wrapper)
    h_col_ref : (M, 9*HIDDEN)  bf16  im2col of h (precomputed in wrapper)
    h_ref     : (M, HIDDEN)    f32   un-shifted h (for gating / final blend)
    w_x_ref   : (9*CX, 96)     bf16  [Wz_x | Wr_x | Wh_x]
    w_hzr_ref : (9*HIDDEN, 64) bf16  [Wz_h | Wr_h]
    w_hh_ref  : (9*HIDDEN, 32) bf16  Wh_h (applied to rt*h)
    b_zr_ref  : (1, 64)        f32   [bz | br]
    b_h_ref   : (1, 32)        f32   bh
    out_ref   : (M, HIDDEN)    f32
    rh_pad_ref: VMEM scratch (BATCH, HP, WP, HIDDEN) f32 for padded rt*h
    """
    # Fused gate pre-activations: bf16 inputs, f32 accumulation on the MXU.
    #   pre_x[:, 0:32] = Z_x, [:, 32:64] = R_x, [:, 64:96] = H_x
    pre_x = jnp.dot(x_col_ref[...], w_x_ref[...],
                    preferred_element_type=jnp.float32)           # (M, 96)
    pre_h_zr = jnp.dot(h_col_ref[...], w_hzr_ref[...],
                       preferred_element_type=jnp.float32)        # (M, 64)

    # zt, rt = sigmoid(Z(cat(h, x))), sigmoid(R(cat(h, x)))  (fused, N = 64)
    zr = jax.nn.sigmoid(pre_x[:, :2 * HIDDEN] + pre_h_zr + b_zr_ref[...])
    zt = zr[:, :HIDDEN]
    rt = zr[:, HIDDEN:]

    h = h_ref[...]                                                # (M, 32) f32
    rh = rt * h

    # In-kernel im2col of (rt * h): zero-pad spatially in a VMEM scratch and
    # gather the 9 shifted taps into a (M, 9*HIDDEN) matrix (C=32: tiny).
    rh_pad_ref[...] = jnp.zeros((BATCH, HP, WP, HIDDEN), jnp.float32)
    rh_pad_ref[:, 1:1 + HH, 1:1 + WW, :] = rh.reshape(BATCH, HH, WW, HIDDEN)
    rh_pad = rh_pad_ref[...]
    taps = [rh_pad[:, dy:dy + HH, dx:dx + WW, :].reshape(M, HIDDEN)
            for dy in range(3) for dx in range(3)]
    rh_col = jnp.concatenate(taps, axis=-1).astype(jnp.bfloat16)  # (M, 288)

    # ht_update = tanh(H(cat(rt*h, x)))
    h_pre = (pre_x[:, 2 * HIDDEN:] + b_h_ref[...]
             + jnp.dot(rh_col, w_hh_ref[...],
                       preferred_element_type=jnp.float32))
    ht_update = jnp.tanh(h_pre)

    # ht = (ones - zt) * h + zt * ht_update
    out_ref[...] = ((1.0 - zt) * h + zt * ht_update).astype(out_ref.dtype)


def _vmem_full(shape):
    # Whole-array block in VMEM (no grid -> index_map takes no arguments).
    return pl.BlockSpec(shape, lambda *_: (0,) * len(shape))


@jax.jit
def raft_gru_pallas(x_nchw, h_nchw, params):
    """x: (B, CX, HH, WW), h: (B, HIDDEN, HH, WW) -> ht: (B, HIDDEN, HH, WW)."""
    wz, bz = params["Z"]
    wr, br = params["R"]
    wh, bh = params["H"]

    x = jnp.transpose(x_nchw, (0, 2, 3, 1)).astype(jnp.float32)   # NHWC
    h = jnp.transpose(h_nchw, (0, 2, 3, 1)).astype(jnp.float32)

    def im2col(a):                      # (B, HH, WW, C) -> (B*HW, 9*C)
        c = a.shape[-1]
        p = jnp.pad(a, ((0, 0), (1, 1), (1, 1), (0, 0)))
        taps = [p[:, dy:dy + HH, dx:dx + WW, :]
                for dy in range(3) for dx in range(3)]
        return jnp.concatenate(taps, axis=-1).reshape(M, 9 * c)

    # Precompute the big, gate-independent im2cols in XLA (done once each).
    x_col = im2col(x).astype(jnp.bfloat16)                        # (128, 2448)
    h_col = im2col(h).astype(jnp.bfloat16)                        # (128, 288)
    h_center = h.reshape(M, HIDDEN)                               # (128, 32) f32

    def split_cols(w_oihw):
        # (O, CIN, 3, 3) -> tap-major/channel-minor column weights, split into
        # the h-group (first HIDDEN input channels) and the x-group (rest).
        w = jnp.transpose(w_oihw, (2, 3, 1, 0))                   # (3,3,CIN,O)
        w_h = w[:, :, :HIDDEN, :].reshape(KH, HIDDEN)
        w_x = w[:, :, HIDDEN:, :].reshape(KX, HIDDEN)
        return w_h, w_x

    wzh, wzx = split_cols(wz)
    wrh, wrx = split_cols(wr)
    whh, whx = split_cols(wh)

    # Gate fusion along the output axis + bf16 cast (done once in the wrapper).
    w_x_all = jnp.concatenate([wzx, wrx, whx], axis=1).astype(jnp.bfloat16)  # (2448, 96)
    w_h_zr = jnp.concatenate([wzh, wrh], axis=1).astype(jnp.bfloat16)        # (288, 64)
    w_h_h = whh.astype(jnp.bfloat16)                                         # (288, 32)
    b_zr = jnp.concatenate([bz, br]).reshape(1, 2 * HIDDEN).astype(jnp.float32)
    b_h = bh.reshape(1, HIDDEN).astype(jnp.float32)

    out_flat = pl.pallas_call(
        _gru_kernel,
        out_shape=jax.ShapeDtypeStruct((M, HIDDEN), jnp.float32),
        in_specs=[
            _vmem_full((M, KX)),              # x_col
            _vmem_full((M, KH)),              # h_col
            _vmem_full((M, HIDDEN)),          # h_center
            _vmem_full((KX, 3 * HIDDEN)),     # w_x_all
            _vmem_full((KH, 2 * HIDDEN)),     # w_h_zr
            _vmem_full((KH, HIDDEN)),         # w_h_h
            _vmem_full((1, 2 * HIDDEN)),      # b_zr
            _vmem_full((1, HIDDEN)),          # b_h
        ],
        out_specs=_vmem_full((M, HIDDEN)),
        scratch_shapes=[pltpu.VMEM((BATCH, HP, WP, HIDDEN), jnp.float32)],
    )(x_col, h_col, h_center, w_x_all, w_h_zr, w_h_h, b_zr, b_h)

    ht = out_flat.reshape(BATCH, HH, WW, HIDDEN)
    return jnp.transpose(ht, (0, 3, 1, 2))


# ---------------- parameter setup (deterministic, PyTorch-like init) --------
def init_params(key):
    bound = 1.0 / np.sqrt(CIN * 9)  # Conv2d default: U(-1/sqrt(fan_in), ...)
    kz, kr, kh, kbz, kbr, kbh = jax.random.split(key, 6)

    def w(k):  # PyTorch conv weight layout (O, I, kh, kw)
        return jax.random.uniform(k, (HIDDEN, CIN, 3, 3), jnp.float32, -bound, bound)

    def b(k):
        return jax.random.uniform(k, (HIDDEN,), jnp.float32, -bound, bound)

    return {"Z": (w(kz), b(kbz)), "R": (w(kr), b(kbr)), "H": (w(kh), b(kbh))}


# ---------------- pure-JAX reference (mirrors the PyTorch forward) ----------
def ref_forward(x_nchw, h_nchw, params):
    x = jnp.transpose(x_nchw, (0, 2, 3, 1))
    h = jnp.transpose(h_nchw, (0, 2, 3, 1))
    dn = ("NHWC", "HWIO", "NHWC")

    def conv(inp, w_oihw, bias):
        w = jnp.transpose(w_oihw, (2, 3, 1, 0))
        y = lax.conv_general_dilated(inp, w, (1, 1), "SAME",
                                     dimension_numbers=dn,
                                     precision=lax.Precision.HIGHEST)
        return y + bias

    wz, bz = params["Z"]
    wr, br = params["R"]
    wh, bh = params["H"]
    hx = jnp.concatenate([h, x], axis=-1)
    zt = jax.nn.sigmoid(conv(hx, wz, bz))
    rt = jax.nn.sigmoid(conv(hx, wr, br))
    ht_up = jnp.tanh(conv(jnp.concatenate([rt * h, x], axis=-1), wh, bh))
    ht = (1.0 - zt) * h + zt * ht_up
    return jnp.transpose(ht, (0, 3, 1, 2))


if __name__ == "__main__":
    key = jax.random.PRNGKey(0)
    kx, kh, kp = jax.random.split(key, 3)
    x = jax.random.normal(kx, (BATCH, CX, HH, WW), jnp.float32)
    h = jax.random.normal(kh, (BATCH, HIDDEN, HH, WW), jnp.float32)
    params = init_params(kp)

    out = jax.block_until_ready(raft_gru_pallas(x, h, params))
    ref = jax.block_until_ready(ref_forward(x, h, params))

    assert out.shape == (BATCH, HIDDEN, HH, WW)
    # Kernel uses bf16 MXU inputs (f32 accumulation) vs. the f32 HIGHEST
    # reference; tolerance sized for that precision difference.
    np.testing.assert_allclose(np.asarray(out), np.asarray(ref),
                               atol=2e-2, rtol=2e-2)
    print("KERNEL_OK")
</pallas_src>

<mosaic_0001>
module attributes {stable_mosaic.version = 11 : i64} {
  func.func @_gru_kernel(%arg0: memref<128x2448xbf16, #tpu.memory_space<vmem>>, %arg1: memref<128x288xbf16, #tpu.memory_space<vmem>>, %arg2: memref<128x32xf32, #tpu.memory_space<vmem>>, %arg3: memref<2448x96xbf16, #tpu.memory_space<vmem>>, %arg4: memref<288x64xbf16, #tpu.memory_space<vmem>>, %arg5: memref<288x32xbf16, #tpu.memory_space<vmem>>, %arg6: memref<1x64xf32, #tpu.memory_space<vmem>>, %arg7: memref<1x32xf32, #tpu.memory_space<vmem>>, %arg8: memref<128x32xf32, #tpu.memory_space<vmem>>, %arg9: memref<2x10x10x32xf32, #tpu.memory_space<vmem>>) attributes {dimension_semantics = [], scalar_prefetch = 0 : i64, scratch_operands = 1 : i64, tpu.core_type = #tpu.core_type<tc>} {
    %c0 = arith.constant 0 : index
    %c0_0 = arith.constant 0 : index
    %0 = vector.load %arg0[%c0, %c0_0] : memref<128x2448xbf16, #tpu.memory_space<vmem>>, vector<128x2448xbf16>
    %c0_1 = arith.constant 0 : index
    %c0_2 = arith.constant 0 : index
    %1 = vector.load %arg3[%c0_1, %c0_2] : memref<2448x96xbf16, #tpu.memory_space<vmem>>, vector<2448x96xbf16>
    %cst = arith.constant dense<0.000000e+00> : vector<128x96xf32>
    %2 = tpu.matmul %0, %1, %cst {dimension_numbers = #tpu.dot_dimension_numbers<[1], [0], [0], [1], [0, 0, 1, 1], [], []>} : vector<128x2448xbf16>, vector<2448x96xbf16>, vector<128x96xf32> -> vector<128x96xf32>
    %c0_3 = arith.constant 0 : index
    %c0_4 = arith.constant 0 : index
    %3 = vector.load %arg1[%c0_3, %c0_4] : memref<128x288xbf16, #tpu.memory_space<vmem>>, vector<128x288xbf16>
    %c0_5 = arith.constant 0 : index
    %c0_6 = arith.constant 0 : index
    %4 = vector.load %arg4[%c0_5, %c0_6] : memref<288x64xbf16, #tpu.memory_space<vmem>>, vector<288x64xbf16>
    %cst_7 = arith.constant dense<0.000000e+00> : vector<128x64xf32>
    %5 = tpu.matmul %3, %4, %cst_7 {dimension_numbers = #tpu.dot_dimension_numbers<[1], [0], [0], [1], [0, 0, 1, 1], [], []>} : vector<128x288xbf16>, vector<288x64xbf16>, vector<128x64xf32> -> vector<128x64xf32>
    %6 = vector.extract_strided_slice %2 {offsets = [0, 0], sizes = [128, 64], strides = [1, 1]} : vector<128x96xf32> to vector<128x64xf32>
    %7 = arith.addf %6, %5 : vector<128x64xf32>
    %c0_8 = arith.constant 0 : index
    %c0_9 = arith.constant 0 : index
    %8 = vector.load %arg6[%c0_8, %c0_9] : memref<1x64xf32, #tpu.memory_space<vmem>>, vector<1x64xf32>
    %9 = vector.broadcast %8 : vector<1x64xf32> to vector<128x64xf32>
    %10 = arith.addf %7, %9 : vector<128x64xf32>
    %11 = arith.negf %10 : vector<128x64xf32>
    %12 = math.exp %11 : vector<128x64xf32>
    %cst_10 = arith.constant 1.000000e+00 : f32
    %13 = vector.broadcast %cst_10 : f32 to vector<128x64xf32>
    %14 = arith.addf %13, %12 : vector<128x64xf32>
    %15 = arith.divf %13, %14 : vector<128x64xf32>
    %16 = vector.extract_strided_slice %15 {offsets = [0, 0], sizes = [128, 32], strides = [1, 1]} : vector<128x64xf32> to vector<128x32xf32>
    %17 = vector.extract_strided_slice %15 {offsets = [0, 32], sizes = [128, 32], strides = [1, 1]} : vector<128x64xf32> to vector<128x32xf32>
    %c0_11 = arith.constant 0 : index
    %c0_12 = arith.constant 0 : index
    %18 = vector.load %arg2[%c0_11, %c0_12] : memref<128x32xf32, #tpu.memory_space<vmem>>, vector<128x32xf32>
    %19 = arith.mulf %17, %18 : vector<128x32xf32>
    %cst_13 = arith.constant 0.000000e+00 : f32
    %20 = vector.broadcast %cst_13 : f32 to vector<2x10x10x32xf32>
    %c0_14 = arith.constant 0 : index
    %c0_15 = arith.constant 0 : index
    %c0_16 = arith.constant 0 : index
    %c0_17 = arith.constant 0 : index
    %21 = vector.load %arg9[%c0_14, %c0_15, %c0_16, %c0_17] : memref<2x10x10x32xf32, #tpu.memory_space<vmem>>, vector<2x10x10x32xf32>
    tpu.vector_store %arg9[%c0_14, %c0_15, %c0_16, %c0_17], %20 {strides = array<i32>} : memref<2x10x10x32xf32, #tpu.memory_space<vmem>>, vector<2x10x10x32xf32>,
    %22 = vector.shape_cast %19 : vector<128x32xf32> to vector<2x8x8x32xf32>
    %c0_18 = arith.constant 0 : index
    %c1 = arith.constant 1 : index
    %c1_19 = arith.constant 1 : index
    %c0_20 = arith.constant 0 : index
    %23 = vector.load %arg9[%c0_18, %c1, %c1_19, %c0_20] : memref<2x10x10x32xf32, #tpu.memory_space<vmem>>, vector<2x8x8x32xf32>
    tpu.vector_store %arg9[%c0_18, %c1, %c1_19, %c0_20], %22 {strides = array<i32>} : memref<2x10x10x32xf32, #tpu.memory_space<vmem>>, vector<2x8x8x32xf32>,
    %c0_21 = arith.constant 0 : index
    %c0_22 = arith.constant 0 : index
    %c0_23 = arith.constant 0 : index
    %c0_24 = arith.constant 0 : index
    %24 = vector.load %arg9[%c0_21, %c0_22, %c0_23, %c0_24] : memref<2x10x10x32xf32, #tpu.memory_space<vmem>>, vector<2x10x10x32xf32>
    %25 = vector.extract_strided_slice %24 {offsets = [0, 0, 0, 0], sizes = [2, 8, 8, 32], strides = [1, 1, 1, 1]} : vector<2x10x10x32xf32> to vector<2x8x8x32xf32>
    %26 = vector.shape_cast %25 : vector<2x8x8x32xf32> to vector<128x32xf32>
    %27 = vector.extract_strided_slice %24 {offsets = [0, 0, 1, 0], sizes = [2, 8, 8, 32], strides = [1, 1, 1, 1]} : vector<2x10x10x32xf32> to vector<2x8x8x32xf32>
    %28 = vector.shape_cast %27 : vector<2x8x8x32xf32> to vector<128x32xf32>
    %29 = vector.extract_strided_slice %24 {offsets = [0, 0, 2, 0], sizes = [2, 8, 8, 32], strides = [1, 1, 1, 1]} : vector<2x10x10x32xf32> to vector<2x8x8x32xf32>
    %30 = vector.shape_cast %29 : vector<2x8x8x32xf32> to vector<128x32xf32>
    %31 = vector.extract_strided_slice %24 {offsets = [0, 1, 0, 0], sizes = [2, 8, 8, 32], strides = [1, 1, 1, 1]} : vector<2x10x10x32xf32> to vector<2x8x8x32xf32>
    %32 = vector.shape_cast %31 : vector<2x8x8x32xf32> to vector<128x32xf32>
    %33 = vector.extract_strided_slice %24 {offsets = [0, 1, 1, 0], sizes = [2, 8, 8, 32], strides = [1, 1, 1, 1]} : vector<2x10x10x32xf32> to vector<2x8x8x32xf32>
    %34 = vector.shape_cast %33 : vector<2x8x8x32xf32> to vector<128x32xf32>
    %35 = vector.extract_strided_slice %24 {offsets = [0, 1, 2, 0], sizes = [2, 8, 8, 32], strides = [1, 1, 1, 1]} : vector<2x10x10x32xf32> to vector<2x8x8x32xf32>
    %36 = vector.shape_cast %35 : vector<2x8x8x32xf32> to vector<128x32xf32>
    %37 = vector.extract_strided_slice %24 {offsets = [0, 2, 0, 0], sizes = [2, 8, 8, 32], strides = [1, 1, 1, 1]} : vector<2x10x10x32xf32> to vector<2x8x8x32xf32>
    %38 = vector.shape_cast %37 : vector<2x8x8x32xf32> to vector<128x32xf32>
    %39 = vector.extract_strided_slice %24 {offsets = [0, 2, 1, 0], sizes = [2, 8, 8, 32], strides = [1, 1, 1, 1]} : vector<2x10x10x32xf32> to vector<2x8x8x32xf32>
    %40 = vector.shape_cast %39 : vector<2x8x8x32xf32> to vector<128x32xf32>
    %41 = vector.extract_strided_slice %24 {offsets = [0, 2, 2, 0], sizes = [2, 8, 8, 32], strides = [1, 1, 1, 1]} : vector<2x10x10x32xf32> to vector<2x8x8x32xf32>
    %42 = vector.shape_cast %41 : vector<2x8x8x32xf32> to vector<128x32xf32>
    %43 = tpu.concatenate %26, %28, %30, %32, %34, %36, %38, %40, %42 in 1 : vector<128x32xf32>, vector<128x32xf32>, vector<128x32xf32>, vector<128x32xf32>, vector<128x32xf32>, vector<128x32xf32>, vector<128x32xf32>, vector<128x32xf32>, vector<128x32xf32> -> vector<128x288xf32>
    %44 = arith.truncf %43 : vector<128x288xf32> to vector<128x288xbf16>
    %45 = vector.extract_strided_slice %2 {offsets = [0, 64], sizes = [128, 32], strides = [1, 1]} : vector<128x96xf32> to vector<128x32xf32>
    %c0_25 = arith.constant 0 : index
    %c0_26 = arith.constant 0 : index
    %46 = vector.load %arg7[%c0_25, %c0_26] : memref<1x32xf32, #tpu.memory_space<vmem>>, vector<1x32xf32>
    %47 = vector.broadcast %46 : vector<1x32xf32> to vector<128x32xf32>
    %48 = arith.addf %45, %47 : vector<128x32xf32>
    %c0_27 = arith.constant 0 : index
    %c0_28 = arith.constant 0 : index
    %49 = vector.load %arg5[%c0_27, %c0_28] : memref<288x32xbf16, #tpu.memory_space<vmem>>, vector<288x32xbf16>
    %cst_29 = arith.constant dense<0.000000e+00> : vector<128x32xf32>
    %50 = tpu.matmul %44, %49, %cst_29 {dimension_numbers = #tpu.dot_dimension_numbers<[1], [0], [0], [1], [0, 0, 1, 1], [], []>} : vector<128x288xbf16>, vector<288x32xbf16>, vector<128x32xf32> -> vector<128x32xf32>
    %51 = arith.addf %48, %50 : vector<128x32xf32>
    %52 = math.tanh %51 : vector<128x32xf32>
    %cst_30 = arith.constant 1.000000e+00 : f32
    %53 = vector.broadcast %cst_30 : f32 to vector<128x32xf32>
    %54 = arith.subf %53, %16 : vector<128x32xf32>
    %55 = arith.mulf %54, %18 : vector<128x32xf32>
    %56 = arith.mulf %16, %52 : vector<128x32xf32>
    %57 = arith.addf %55, %56 : vector<128x32xf32>
    %c0_31 = arith.constant 0 : index
    %c0_32 = arith.constant 0 : index
    %58 = vector.load %arg8[%c0_31, %c0_32] : memref<128x32xf32, #tpu.memory_space<vmem>>, vector<128x32xf32>
    tpu.vector_store %arg8[%c0_31, %c0_32], %57 {strides = array<i32>} : memref<128x32xf32, #tpu.memory_space<vmem>>, vector<128x32xf32>,
    return
  }
}

</mosaic_0001>

<bundles_post_ra>
// kernel: raft_gru_pallas.1
= control target key start
LH: loop header
LB: loop body
LE: loop exit
PB: predicated region body
PF: predicated region fallthrough
CT: control target
= control target key end

     0   :  { %vm2207_vm0 = vcmask 130048   ;;  %s9655_s0 = inlined_call_operand.vmem [shape: bf16[128,2448], index: 0, kind: input, shape index: {}]   ;;  %s9656_s1 = inlined_call_operand.vmem [shape: bf16[128,288], index: 1, kind: input, shape index: {}]   ;;  %s9657_s2 = inlined_call_operand.vmem [shape: f32[128,32], index: 2, kind: input, shape index: {}]   ;;  %s9658_s3 = inlined_call_operand.vmem [shape: bf16[2448,96], index: 3, kind: input, shape index: {}]   ;;  %s9659_s4 = inlined_call_operand.vmem [shape: bf16[288,64], index: 4, kind: input, shape index: {}]   ;;  %s9660_s5 = inlined_call_operand.vmem [shape: bf16[288,32], index: 5, kind: input, shape index: {}]   ;;  %s9661_s6 = inlined_call_operand.vmem [shape: f32[1,64], index: 6, kind: input, shape index: {}]   ;;  %s9662_s7 = inlined_call_operand.vmem [shape: f32[1,32], index: 7, kind: input, shape index: {}]   ;;  %s9663_s8 = inlined_call_operand.hbm [shape: f32[128,32], index: 8, kind: output, shape index: {}]  }
   0x1   :  { %v6784_v0 = vld [vmem:[%s9658_s3 + $0x78] sm:$0xff]   ;;  %v6788_v4 = vld [vmem:[%s9658_s3 + $0x70] sm:$0xff]   ;;  %v6792_v8 = vld [vmem:[%s9658_s3 + $0x68] sm:$0xff]  }
   0x2   :  { %v6785_v1 = vld [vmem:[%s9658_s3 + $0xf8] sm:$0xff]   ;;  %5772 = vmatprep.subr.bf16.mxu0 %v6784_v0  ;;  %v6789_v5 = vld [vmem:[%s9658_s3 + $0xf0] sm:$0xff]   ;;  %v6793_v9 = vld [vmem:[%s9658_s3 + $0xe8] sm:$0xff]  }
   0x3   :  { %v6786_v2 = vld [vmem:[%s9658_s3 + $0x38] sm:$0xff]   ;;  %5836 = vmatprep.subr.bf16.mxu1 %v6785_v1  ;;  %v6790_v6 = vld [vmem:[%s9658_s3 + $0x30] sm:$0xff]   ;;  %v6794_v10 = vld [vmem:[%s9658_s3 + $0x28] sm:$0xff]  }
   0x4   :  { %v6787_v3 = vld [vmem:[%s9658_s3 + $0xb8] sm:$0xff]   ;;  %5773 = vmatpush3.bf16.msra.mxu0 %v6786_v2  ;;  %v6791_v7 = vld [vmem:[%s9658_s3 + $0xb0] sm:$0xff]   ;;  %v6795_v11 = vld [vmem:[%s9658_s3 + $0xa8] sm:$0xff]  }
   0x5   :  { %5837 = vmatpush3.bf16.msra.mxu1 %v6787_v3  ;;  %5774 = vmatprep.subr.bf16.mxu0 %v6788_v4  ;;  %v6796_v12 = vld [vmem:[%s9658_s3 + $0x60] sm:$0xff]   ;;  %v6800_v16 = vld [vmem:[%s9658_s3 + $0x58] sm:$0xff]   ;;  %v6804_v20 = vld [vmem:[%s9658_s3 + $0x50] sm:$0xff]  }
   0x6   :  { %5838 = vmatprep.subr.bf16.mxu1 %v6789_v5  ;;  %v6797_v13 = vld [vmem:[%s9658_s3 + $0xe0] sm:$0xff]   ;;  %v6801_v17 = vld [vmem:[%s9658_s3 + $0xd8] sm:$0xff]   ;;  %v6805_v21 = vld [vmem:[%s9658_s3 + $0xd0] sm:$0xff]  }
   0x7   :  { %v6798_v14 = vld [vmem:[%s9658_s3 + $0x20] sm:$0xff]   ;;  %v6802_v18 = vld [vmem:[%s9658_s3 + $0x18] sm:$0xff]   ;;  %v6806_v22 = vld [vmem:[%s9658_s3 + $0x10] sm:$0xff]  }
   0x8   :  { %5775 = vmatpush3.bf16.msra.mxu0 %v6790_v6  ;;  %v6799_v15 = vld [vmem:[%s9658_s3 + $0xa0] sm:$0xff]   ;;  %v6803_v19 = vld [vmem:[%s9658_s3 + $0x98] sm:$0xff]   ;;  %v6807_v23 = vld [vmem:[%s9658_s3 + $0x90] sm:$0xff]  }
   0x9   :  { %5839 = vmatpush3.bf16.msra.mxu1 %v6791_v7  ;;  %5776 = vmatprep.subr.bf16.mxu0 %v6792_v8  ;;  %v6808_v24 = vld [vmem:[%s9658_s3 + $0x48] sm:$0xff]   ;;  %v6812_v28 = vld [vmem:[%s9658_s3 + $0x40] sm:$0xff]   ;;  %v6822_v36 = vld [vmem:[%s9658_s3 + $0x178] sm:$0xff]  }
   0xa   :  { %5840 = vmatprep.subr.bf16.mxu1 %v6793_v9  ;;  %v6809_v25 = vld [vmem:[%s9658_s3 + $0xc8] sm:$0xff]   ;;  %v6813_v29 = vld [vmem:[%s9658_s3 + $0xc0] sm:$0xff]   ;;  %v6823_v37 = vld [vmem:[%s9658_s3 + $0x138] sm:$0xff]  }
   0xb   :  { %v6810_v26 = vld [vmem:[%s9658_s3 + $0x8] sm:$0xff]   ;;  %v6814_v30 = vld [vmem:[%s9658_s3] sm:$0xff]   ;;  %v6824_v38 = vld [vmem:[%s9658_s3 + $0x1f8] sm:$0xff]  }
   0xc   :  { %5777 = vmatpush3.bf16.msra.mxu0 %v6794_v10  ;;  %v6811_v27 = vld [vmem:[%s9658_s3 + $0x88] sm:$0xff]   ;;  %v6815_v31 = vld [vmem:[%s9658_s3 + $0x80] sm:$0xff]   ;;  %v6825_v39 = vld [vmem:[%s9658_s3 + $0x1b8] sm:$0xff]  }
   0xd   :  { %5841 = vmatpush3.bf16.msra.mxu1 %v6795_v11  ;;  %5778 = vmatprep.subr.bf16.mxu0 %v6796_v12  ;;  %v6816_v32 = vld [vmem:[%s9655_s0] ss:$80 sps:$4 sm:$0xff]   ;;  %v6818_v33 = vld [vmem:[%s9655_s0 + $0x4] ss:$80 sps:$4 sm:$0xff]   ;;  %v6819_v34 = vld [vmem:[%s9655_s0 + $0x8] ss:$80 sps:$4 sm:$0xff]  }
   0xe   :  { %5842 = vmatprep.subr.bf16.mxu1 %v6797_v13  ;;  %v6821_v35 = vld [vmem:[%s9655_s0 + $0xc] ss:$80 sps:$4 sm:$0xff]   ;;  %2264 = vmatprep.mubr.bf16.mxu0 %v6818_v33  ;;  %v6826_v40 = vld [vmem:[%s9655_s0 + $0xa4] ss:$80 sps:$4 sm:$0xff]   ;;  %v6830_v42 = vld [vmem:[%s9655_s0 + $0xa0] ss:$80 sps:$4 sm:$0xff]  }
   0xf   :  { %2361 = vmatprep.mubr.bf16.mxu1 %v6821_v35  ;;  %v6828_v41 = vld [vmem:[%s9655_s0 + $0xac] ss:$80 sps:$4 sm:$0xff]   ;;  %v6831_v43 = vld [vmem:[%s9655_s0 + $0xa8] ss:$80 sps:$4 sm:$0xff]   ;;  %v6832_v44 = vld [vmem:[%s9658_s3 + $0x170] sm:$0xff]  }
  0x10   :  { %5779 = vmatpush3.bf16.msra.mxu0 %v6798_v14  ;;  %v6833_v45 = vld [vmem:[%s9658_s3 + $0x130] sm:$0xff]   ;;  %v6838_v49 = vld [vmem:[%s9655_s0 + $0x14c] ss:$80 sps:$4 sm:$0xff]   ;;  %v6841_v51 = vld [vmem:[%s9655_s0 + $0x148] ss:$80 sps:$4 sm:$0xff]  }
  0x11   :  { %5843 = vmatpush3.bf16.msra.mxu1 %v6799_v15  ;;  %5780 = vmatprep.subr.bf16.mxu0 %v6800_v16  ;;  %v6834_v46 = vld [vmem:[%s9658_s3 + $0x1f0] sm:$0xff]   ;;  %v6842_v52 = vld [vmem:[%s9658_s3 + $0x168] sm:$0xff]   ;;  %v6852_v60 = vld [vmem:[%s9658_s3 + $0x160] sm:$0xff]  }
  0x12   :  { %5844 = vmatprep.subr.bf16.mxu1 %v6801_v17  ;;  %v6835_v47 = vld [vmem:[%s9658_s3 + $0x1b0] sm:$0xff]   ;;  %v6843_v53 = vld [vmem:[%s9658_s3 + $0x128] sm:$0xff]   ;;  %v6853_v61 = vld [vmem:[%s9658_s3 + $0x120] sm:$0xff]  }
  0x13   :  { %v6836_v48 = vld [vmem:[%s9655_s0 + $0x144] ss:$80 sps:$4 sm:$0xff]   ;;  %v6840_v50 = vld [vmem:[%s9655_s0 + $0x140] ss:$80 sps:$4 sm:$0xff]   ;;  %v6844_v54 = vld [vmem:[%s9658_s3 + $0x1e8] sm:$0xff]  }
  0x14   :  { %5781 = vmatpush3.bf16.msra.mxu0 %v6802_v18  ;;  %v6845_v55 = vld [vmem:[%s9658_s3 + $0x1a8] sm:$0xff]   ;;  %v6846_v56 = vld [vmem:[%s9655_s0 + $0x1e4] ss:$80 sps:$4 sm:$0xff]   ;;  %v6850_v58 = vld [vmem:[%s9655_s0 + $0x1e0] ss:$80 sps:$4 sm:$0xff]  }
  0x15   :  { %5845 = vmatpush3.bf16.msra.mxu1 %v6803_v19  ;;  %5782 = vmatprep.subr.bf16.mxu0 %v6804_v20  ;;  %v6848_v57 = vld [vmem:[%s9655_s0 + $0x1ec] ss:$80 sps:$4 sm:$0xff]   ;;  %v6851_v59 = vld [vmem:[%s9655_s0 + $0x1e8] ss:$80 sps:$4 sm:$0xff]   ;;  %v6854_v62 = vld [vmem:[%s9658_s3 + $0x1e0] sm:$0xff]  }
  0x16   :  { %5846 = vmatprep.subr.bf16.mxu1 %v6805_v21  ;;  %v6855_v63 = vld [vmem:[%s9658_s3 + $0x1a0] sm:$0xff]   ;;  %v6858_v1 = vld [vmem:[%s9655_s0 + $0x28c] ss:$80 sps:$4 sm:$0xff]   ;;  %v6861_v4 = vld [vmem:[%s9655_s0 + $0x288] ss:$80 sps:$4 sm:$0xff]  }
  0x17   :  { %v6856_v0 = vld [vmem:[%s9655_s0 + $0x284] ss:$80 sps:$4 sm:$0xff]   ;;  %v6860_v2 = vld [vmem:[%s9655_s0 + $0x280] ss:$80 sps:$4 sm:$0xff]   ;;  %v6862_v3 = vld [vmem:[%s9658_s3 + $0x158] sm:$0xff]  }
  0x18   :  { %5783 = vmatpush3.bf16.msra.mxu0 %v6806_v22  ;;  %v6863_v5 = vld [vmem:[%s9658_s3 + $0x118] sm:$0xff]   ;;  %v6866_v8 = vld [vmem:[%s9655_s0 + $0x324] ss:$80 sps:$4 sm:$0xff]   ;;  %v6870_v12 = vld [vmem:[%s9655_s0 + $0x320] ss:$80 sps:$4 sm:$0xff]  }
  0x19   :  { %5847 = vmatpush3.bf16.msra.mxu1 %v6807_v23  ;;  %5784 = vmatprep.subr.bf16.mxu0 %v6808_v24  ;;  %v6864_v6 = vld [vmem:[%s9658_s3 + $0x1d8] sm:$0xff]   ;;  %v6872_v10 = vld [vmem:[%s9658_s3 + $0x150] sm:$0xff]   ;;  %v6882_v18 = vld [vmem:[%s9658_s3 + $0x148] sm:$0xff]  }
  0x1a   :  { %5848 = vmatprep.subr.bf16.mxu1 %v6809_v25  ;;  %v6865_v7 = vld [vmem:[%s9658_s3 + $0x198] sm:$0xff]   ;;  %v6873_v11 = vld [vmem:[%s9658_s3 + $0x110] sm:$0xff]   ;;  %v6883_v19 = vld [vmem:[%s9658_s3 + $0x108] sm:$0xff]  }
  0x1b   :  { %v6868_v9 = vld [vmem:[%s9655_s0 + $0x32c] ss:$80 sps:$4 sm:$0xff]   ;;  %v6874_v13 = vld [vmem:[%s9658_s3 + $0x1d0] sm:$0xff]   ;;  %v6871_v15 = vld [vmem:[%s9655_s0 + $0x328] ss:$80 sps:$4 sm:$0xff]  }
  0x1c   :  { %5785 = vmatpush3.bf16.msra.mxu0 %v6810_v26  ;;  %v6875_v14 = vld [vmem:[%s9658_s3 + $0x190] sm:$0xff]   ;;  %v6878_v17 = vld [vmem:[%s9655_s0 + $0x3cc] ss:$80 sps:$4 sm:$0xff]   ;;  %v6881_v23 = vld [vmem:[%s9655_s0 + $0x3c8] ss:$80 sps:$4 sm:$0xff]  }
  0x1d   :  { %5849 = vmatpush3.bf16.msra.mxu1 %v6811_v27  ;;  %5786 = vmatprep.subr.bf16.mxu0 %v6812_v28  ;;  %v6876_v16 = vld [vmem:[%s9655_s0 + $0x3c4] ss:$80 sps:$4 sm:$0xff]   ;;  %v6884_v20 = vld [vmem:[%s9658_s3 + $0x1c8] sm:$0xff]   ;;  %v6880_v22 = vld [vmem:[%s9655_s0 + $0x3c0] ss:$80 sps:$4 sm:$0xff]  }
  0x1e   :  { %5850 = vmatprep.subr.bf16.mxu1 %v6813_v29  ;;  %v6885_v21 = vld [vmem:[%s9658_s3 + $0x188] sm:$0xff]   ;;  %v6886_v24 = vld [vmem:[%s9655_s0 + $0x464] ss:$80 sps:$4 sm:$0xff]   ;;  %v6902_v33 = vld [vmem:[%s9658_s3 + $0x278] sm:$0xff]  }
  0x1f   :  { %v6888_v25 = vld [vmem:[%s9655_s0 + $0x46c] ss:$80 sps:$4 sm:$0xff]   ;;  %v6892_v26 = vld [vmem:[%s9658_s3 + $0x140] sm:$0xff]  }
  0x20   :  { %5787 = vmatpush3.bf16.msra.mxu0 %v6814_v30  ;;  %v6893_v27 = vld [vmem:[%s9658_s3 + $0x100] sm:$0xff]   ;;  %v6904_v35 = vld [vmem:[%s9658_s3 + $0x2f8] sm:$0xff]  }
  0x21   :  { %5851 = vmatpush3.bf16.msra.mxu1 %v6815_v31  ;;  %5900 = vmatprep.subr.bf16.mxu0 %v6822_v36  ;;  %v6894_v28 = vld [vmem:[%s9658_s3 + $0x1c0] sm:$0xff]   ;;  %v6891_v31 = vld [vmem:[%s9655_s0 + $0x468] ss:$80 sps:$4 sm:$0xff]  }
  0x22   :  { %5964 = vmatprep.subr.bf16.mxu1 %v6824_v38  ;;  %v6895_v29 = vld [vmem:[%s9658_s3 + $0x180] sm:$0xff]   ;;  %v6903_v38 = vld [vmem:[%s9658_s3 + $0x238] sm:$0xff]  }
  0x23   :  { %2265 = vmatmul.mubr.bf16.vlgmr.msra.gmra.mxu0 %v6816_v32  ;;  %v6890_v30 = vld [vmem:[%s9655_s0 + $0x460] ss:$80 sps:$4 sm:$0xff]   ;;  %v6898_v32 = vld [vmem:[%s9655_s0 + $0x14] ss:$80 sps:$4 sm:$0xff]  }
  0x24   :  { %2362 = vmatmul.mubr.bf16.vlgmr.msra.gmra.mxu1 %v6819_v34  ;;  %5901 = vmatpush3.bf16.msra.mxu0 %v6823_v37  ;;  %v6901_v34 = vld [vmem:[%s9655_s0 + $0x1c] ss:$80 sps:$4 sm:$0xff]   ;;  %v6896_v36 = vld [vmem:[%s9655_s0 + $0x10] ss:$80 sps:$4 sm:$0xff]   ;;  %v6899_v37 = vld [vmem:[%s9655_s0 + $0x18] ss:$80 sps:$4 sm:$0xff]  }
  0x25   :  { %5965 = vmatpush3.bf16.msra.mxu1 %v6825_v39  ;;  %2272 = vmatprep.mubr.bf16.mxu0 %v6826_v40  ;;  %v6905_v39 = vld [vmem:[%s9658_s3 + $0x2b8] sm:$0xff]   ;;  %v6906_v40 = vld [vmem:[%s9655_s0 + $0xb4] ss:$80 sps:$4 sm:$0xff]  }
  0x26   :  { %2369 = vmatprep.mubr.bf16.mxu1 %v6828_v41  ;;  %5902 = vmatprep.subr.bf16.mxu0 %v6832_v44  ;;  %v6908_v41 = vld [vmem:[%s9655_s0 + $0xbc] ss:$80 sps:$4 sm:$0xff]   ;;  %v6914_v44 = vld [vmem:[%s9658_s3 + $0x2f0] sm:$0xff]  }
  0x27   :  { %5966 = vmatprep.subr.bf16.mxu1 %v6834_v46  ;;  %v6910_v46 = vld [vmem:[%s9655_s0 + $0xb0] ss:$80 sps:$4 sm:$0xff]  }
  0x28   :  { %5903 = vmatpush3.bf16.msra.mxu0 %v6833_v45  ;;  %v6915_v45 = vld [vmem:[%s9658_s3 + $0x2b0] sm:$0xff]  }
  0x29   :  { %5967 = vmatpush3.bf16.msra.mxu1 %v6835_v47  ;;  %5904 = vmatprep.subr.bf16.mxu0 %v6842_v52  ;;  %v6922_v47 = vld [vmem:[%s9658_s3 + $0x268] sm:$0xff]  }
  0x2a   :  { %5968 = vmatprep.subr.bf16.mxu1 %v6844_v54  ;;  %v6923_v52 = vld [vmem:[%s9658_s3 + $0x228] sm:$0xff]   ;;  %v6932_v54 = vld [vmem:[%s9658_s3 + $0x260] sm:$0xff]  }
  0x2b   :  { %2273 = vmatmul.mubr.bf16.gmra.mxu0 %v6830_v42  ;;  %v6912_v42 = vld [vmem:[%s9658_s3 + $0x270] sm:$0xff]  }
  0x2c   :  { %2370 = vmatmul.mubr.bf16.gmra.mxu1 %v6831_v43  ;;  %2280 = vmatprep.mubr.bf16.mxu0 %v6836_v48  ;;  %v6913_v43 = vld [vmem:[%s9658_s3 + $0x230] sm:$0xff]   ;;  %v6911_v48 = vld [vmem:[%s9655_s0 + $0xb8] ss:$80 sps:$4 sm:$0xff]  }
  0x2d   :  { %2377 = vmatprep.mubr.bf16.mxu1 %v6838_v49  ;;  %5905 = vmatpush3.bf16.msra.mxu0 %v6843_v53  ;;  %v6916_v49 = vld [vmem:[%s9655_s0 + $0x154] ss:$80 sps:$4 sm:$0xff]   ;;  %v6925_v53 = vld [vmem:[%s9658_s3 + $0x2a8] sm:$0xff]  }
  0x2e   :  { %5969 = vmatpush3.bf16.msra.mxu1 %v6845_v55  ;;  %5906 = vmatprep.subr.bf16.mxu0 %v6852_v60  ;;  %v6933_v55 = vld [vmem:[%s9658_s3 + $0x220] sm:$0xff]  }
  0x2f   :  { %5970 = vmatprep.subr.bf16.mxu1 %v6854_v62  ;;  %v6926_v60 = vld [vmem:[%s9655_s0 + $0x1f4] ss:$80 sps:$4 sm:$0xff]   ;;  %v6942_v62 = vld [vmem:[%s9658_s3 + $0x258] sm:$0xff]  }
  0x31   :  { %5907 = vmatpush3.bf16.msra.mxu0 %v6853_v61  ;;  %v6928_v61 = vld [vmem:[%s9655_s0 + $0x1fc] ss:$80 sps:$4 sm:$0xff]  }
  0x32   :  { %5971 = vmatpush3.bf16.msra.mxu1 %v6855_v63  ;;  %5908 = vmatprep.subr.bf16.mxu0 %v6862_v3  ;;  %v6943_v63 = vld [vmem:[%s9658_s3 + $0x218] sm:$0xff]  }
  0x33   :  { %2281 = vmatmul.mubr.bf16.gmra.mxu0 %v6840_v50  ;;  %5972 = vmatprep.subr.bf16.mxu1 %v6864_v6  ;;  %v6924_v50 = vld [vmem:[%s9658_s3 + $0x2e8] sm:$0xff]   ;;  %v6952_v6 = vld [vmem:[%s9658_s3 + $0x250] sm:$0xff]  }
  0x34   :  { %2378 = vmatmul.mubr.bf16.gmra.mxu1 %v6841_v51  ;;  %2288 = vmatprep.mubr.bf16.mxu0 %v6846_v56  ;;  %v6918_v51 = vld [vmem:[%s9655_s0 + $0x15c] ss:$80 sps:$4 sm:$0xff]   ;;  %v6920_v56 = vld [vmem:[%s9655_s0 + $0x150] ss:$80 sps:$4 sm:$0xff]   ;;  %v6931_v3 = vld [vmem:[%s9655_s0 + $0x1f8] ss:$80 sps:$4 sm:$0xff]  }
  0x35   :  { %2385 = vmatprep.mubr.bf16.mxu1 %v6848_v57  ;;  %5909 = vmatpush3.bf16.msra.mxu0 %v6863_v5  ;;  %v6934_v57 = vld [vmem:[%s9658_s3 + $0x2e0] sm:$0xff]   ;;  %v6938_v5 = vld [vmem:[%s9655_s0 + $0x29c] ss:$80 sps:$4 sm:$0xff]  }
  0x36   :  { %5973 = vmatpush3.bf16.msra.mxu1 %v6865_v7  ;;  %5910 = vmatprep.subr.bf16.mxu0 %v6872_v10  ;;  %v6953_v7 = vld [vmem:[%s9658_s3 + $0x210] sm:$0xff]  }
  0x37   :  { %5974 = vmatprep.subr.bf16.mxu1 %v6874_v13  ;;  %v6940_v10 = vld [vmem:[%s9655_s0 + $0x290] ss:$80 sps:$4 sm:$0xff]   ;;  %v6948_v13 = vld [vmem:[%s9655_s0 + $0x33c] ss:$80 sps:$4 sm:$0xff]  }
  0x39   :  { %5911 = vmatpush3.bf16.msra.mxu0 %v6873_v11  ;;  %v6941_v11 = vld [vmem:[%s9655_s0 + $0x298] ss:$80 sps:$4 sm:$0xff]  }
  0x3a   :  { %5975 = vmatpush3.bf16.msra.mxu1 %v6875_v14  ;;  %5912 = vmatprep.subr.bf16.mxu0 %v6882_v18  ;;  %v6962_v14 = vld [vmem:[%s9658_s3 + $0x248] sm:$0xff]   ;;  %v6950_v18 = vld [vmem:[%s9655_s0 + $0x330] ss:$80 sps:$4 sm:$0xff]  }
  0x3b   :  { %2289 = vmatmul.mubr.bf16.gmra.mxu0 %v6850_v58  ;;  %5976 = vmatprep.subr.bf16.mxu1 %v6884_v20  ;;  %v6935_v58 = vld [vmem:[%s9658_s3 + $0x2a0] sm:$0xff]  }
  0x3c   :  { %2386 = vmatmul.mubr.bf16.gmra.mxu1 %v6851_v59  ;;  %2296 = vmatprep.mubr.bf16.mxu0 %v6856_v0  ;;  %v6921_v59 = vld [vmem:[%s9655_s0 + $0x158] ss:$80 sps:$4 sm:$0xff]   ;;  %v6956_v20 = vld [vmem:[%s9655_s0 + $0x3d4] ss:$80 sps:$4 sm:$0xff]  }
  0x3d   :  { %2393 = vmatprep.mubr.bf16.mxu1 %v6858_v1  ;;  %5913 = vmatpush3.bf16.msra.mxu0 %v6883_v19  ;;  %v6944_v0 = vld [vmem:[%s9658_s3 + $0x2d8] sm:$0xff]  }
  0x3e   :  { %5977 = vmatpush3.bf16.msra.mxu1 %v6885_v21  ;;  %5914 = vmatprep.subr.bf16.mxu0 %v6892_v26  ;;  %v6945_v1 = vld [vmem:[%s9658_s3 + $0x298] sm:$0xff]   ;;  %v6972_v21 = vld [vmem:[%s9658_s3 + $0x240] sm:$0xff]  }
  0x3f   :  { %5978 = vmatprep.subr.bf16.mxu1 %v6894_v28  ;;  %v6951_v19 = vld [vmem:[%s9655_s0 + $0x338] ss:$80 sps:$4 sm:$0xff]   ;;  %v6960_v26 = vld [vmem:[%s9655_s0 + $0x3d0] ss:$80 sps:$4 sm:$0xff]  }
  0x40   :  { %v6961_v28 = vld [vmem:[%s9655_s0 + $0x3d8] ss:$80 sps:$4 sm:$0xff]  }
  0x41   :  { %5915 = vmatpush3.bf16.msra.mxu0 %v6893_v27  ;;  %v6982_v27 = vld [vmem:[%s9658_s3 + $0x378] sm:$0xff]  }
  0x42   :  { %5979 = vmatpush3.bf16.msra.mxu1 %v6895_v29  ;;  %6028 = vmatprep.subr.bf16.mxu0 %v6902_v33  ;;  %v6984_v29 = vld [vmem:[%s9658_s3 + $0x3f8] sm:$0xff]  }
  0x43   :  { %2297 = vmatmul.mubr.bf16.gmra.mxu0 %v6860_v2  ;;  %6092 = vmatprep.subr.bf16.mxu1 %v6904_v35  ;;  %v6930_v2 = vld [vmem:[%s9655_s0 + $0x1f0] ss:$80 sps:$4 sm:$0xff]   ;;  %v6971_v33 = vld [vmem:[%s9655_s0 + $0x478] ss:$80 sps:$4 sm:$0xff]   ;;  %v6981_v35 = vld [vmem:[%s9655_s0 + $0x2c] ss:$80 sps:$4 sm:$0xff]  }
  0x44   :  { %2394 = vmatmul.mubr.bf16.gmra.mxu1 %v6861_v4  ;;  %2304 = vmatprep.mubr.bf16.mxu0 %v6866_v8  ;;  %v6936_v4 = vld [vmem:[%s9655_s0 + $0x294] ss:$80 sps:$4 sm:$0xff]  }
  0x45   :  { %2401 = vmatprep.mubr.bf16.mxu1 %v6868_v9  ;;  %v6954_v8 = vld [vmem:[%s9658_s3 + $0x2d0] sm:$0xff]  }
  0x46   :  { %v6955_v9 = vld [vmem:[%s9658_s3 + $0x290] sm:$0xff]  }
  0x4b   :  { %2305 = vmatmul.mubr.bf16.gmra.mxu0 %v6870_v12  ;;  %v6946_v12 = vld [vmem:[%s9655_s0 + $0x334] ss:$80 sps:$4 sm:$0xff]  }
  0x4c   :  { %2402 = vmatmul.mubr.bf16.gmra.mxu1 %v6871_v15  ;;  %2312 = vmatprep.mubr.bf16.mxu0 %v6876_v16  ;;  %v6963_v15 = vld [vmem:[%s9658_s3 + $0x208] sm:$0xff]  }
  0x4d   :  { %2409 = vmatprep.mubr.bf16.mxu1 %v6878_v17  ;;  %v6964_v16 = vld [vmem:[%s9658_s3 + $0x2c8] sm:$0xff]  }
  0x4e   :  { %v6965_v17 = vld [vmem:[%s9658_s3 + $0x288] sm:$0xff]  }
  0x53   :  { %2313 = vmatmul.mubr.bf16.gmra.mxu0 %v6880_v22  ;;  %v6958_v22 = vld [vmem:[%s9655_s0 + $0x3dc] ss:$80 sps:$4 sm:$0xff]  }
  0x54   :  { %2410 = vmatmul.mubr.bf16.gmra.mxu1 %v6881_v23  ;;  %2320 = vmatprep.mubr.bf16.mxu0 %v6886_v24  ;;  %v6973_v23 = vld [vmem:[%s9658_s3 + $0x200] sm:$0xff]  }
  0x55   :  { %2417 = vmatprep.mubr.bf16.mxu1 %v6888_v25  ;;  %v6974_v24 = vld [vmem:[%s9658_s3 + $0x2c0] sm:$0xff]  }
  0x56   :  { %v6975_v25 = vld [vmem:[%s9658_s3 + $0x280] sm:$0xff]  }
  0x5b   :  { %2321 = vmatmul.mubr.bf16.gmra.mxu0 %v6890_v30  ;;  %v6966_v30 = vld [vmem:[%s9655_s0 + $0x474] ss:$80 sps:$4 sm:$0xff]  }
  0x5c   :  { %2418 = vmatmul.mubr.bf16.gmra.mxu1 %v6891_v31  ;;  %2458 = vmatprep.mubr.bf16.mxu0 %v6898_v32  ;;  %v6968_v31 = vld [vmem:[%s9655_s0 + $0x47c] ss:$80 sps:$4 sm:$0xff]   ;;  %v6970_v32 = vld [vmem:[%s9655_s0 + $0x470] ss:$80 sps:$4 sm:$0xff]  }
  0x5d   :  { %2555 = vmatprep.mubr.bf16.mxu1 %v6901_v34  ;;  %v6978_v34 = vld [vmem:[%s9655_s0 + $0x24] ss:$80 sps:$4 sm:$0xff]  }
  0x63   :  { %2459 = vmatmul.mubr.bf16.vlgmr.msra.gmra.mxu0 %v6896_v36  ;;  %v6976_v36 = vld [vmem:[%s9655_s0 + $0x20] ss:$80 sps:$4 sm:$0xff]  }
  0x64   :  { %2556 = vmatmul.mubr.bf16.vlgmr.msra.gmra.mxu1 %v6899_v37  ;;  %6029 = vmatpush3.bf16.msra.mxu0 %v6903_v38  ;;  %v6979_v37 = vld [vmem:[%s9655_s0 + $0x28] ss:$80 sps:$4 sm:$0xff]  }
  0x65   :  { %6093 = vmatpush3.bf16.msra.mxu1 %v6905_v39  ;;  %2466 = vmatprep.mubr.bf16.mxu0 %v6906_v40  ;;  %v6983_v38 = vld [vmem:[%s9658_s3 + $0x338] sm:$0xff]   ;;  %v6986_v40 = vld [vmem:[%s9655_s0 + $0xc4] ss:$80 sps:$4 sm:$0xff]  }
  0x66   :  { %2563 = vmatprep.mubr.bf16.mxu1 %v6908_v41  ;;  %6030 = vmatprep.subr.bf16.mxu0 %v6912_v42  ;;  %v6985_v39 = vld [vmem:[%s9658_s3 + $0x3b8] sm:$0xff]   ;;  %v6992_v42 = vld [vmem:[%s9658_s3 + $0x370] sm:$0xff]  }
  0x67   :  { %6094 = vmatprep.subr.bf16.mxu1 %v6914_v44  ;;  %v6988_v41 = vld [vmem:[%s9655_s0 + $0xcc] ss:$80 sps:$4 sm:$0xff]   ;;  %v6994_v44 = vld [vmem:[%s9658_s3 + $0x3f0] sm:$0xff]  }
  0x68   :  { %6031 = vmatpush3.bf16.msra.mxu0 %v6913_v43  ;;  %v6993_v43 = vld [vmem:[%s9658_s3 + $0x330] sm:$0xff]  }
  0x69   :  { %6095 = vmatpush3.bf16.msra.mxu1 %v6915_v45  ;;  %6032 = vmatprep.subr.bf16.mxu0 %v6922_v47  ;;  %v6995_v45 = vld [vmem:[%s9658_s3 + $0x3b0] sm:$0xff]   ;;  %v7002_v47 = vld [vmem:[%s9658_s3 + $0x368] sm:$0xff]  }
  0x6a   :  { %6096 = vmatprep.subr.bf16.mxu1 %v6924_v50  ;;  %v7004_v50 = vld [vmem:[%s9658_s3 + $0x3e8] sm:$0xff]  }
  0x6b   :  { %2467 = vmatmul.mubr.bf16.gmra.mxu0 %v6910_v46  ;;  %v6990_v46 = vld [vmem:[%s9655_s0 + $0xc0] ss:$80 sps:$4 sm:$0xff]  }
  0x6c   :  { %2564 = vmatmul.mubr.bf16.gmra.mxu1 %v6911_v48  ;;  %2474 = vmatprep.mubr.bf16.mxu0 %v6916_v49  ;;  %v6991_v48 = vld [vmem:[%s9655_s0 + $0xc8] ss:$80 sps:$4 sm:$0xff]   ;;  %v6996_v49 = vld [vmem:[%s9655_s0 + $0x164] ss:$80 sps:$4 sm:$0xff]  }
  0x6d   :  { %2571 = vmatprep.mubr.bf16.mxu1 %v6918_v51  ;;  %6033 = vmatpush3.bf16.msra.mxu0 %v6923_v52  ;;  %v6998_v51 = vld [vmem:[%s9655_s0 + $0x16c] ss:$80 sps:$4 sm:$0xff]  }
  0x6e   :  { %6097 = vmatpush3.bf16.msra.mxu1 %v6925_v53  ;;  %6034 = vmatprep.subr.bf16.mxu0 %v6932_v54  ;;  %v7003_v52 = vld [vmem:[%s9658_s3 + $0x328] sm:$0xff]   ;;  %v7012_v54 = vld [vmem:[%s9658_s3 + $0x360] sm:$0xff]  }
  0x6f   :  { %6098 = vmatprep.subr.bf16.mxu1 %v6934_v57  ;;  %v7005_v53 = vld [vmem:[%s9658_s3 + $0x3a8] sm:$0xff]   ;;  %v7013_v57 = vld [vmem:[%s9658_s3 + $0x320] sm:$0xff]  }
  0x71   :  { %6035 = vmatpush3.bf16.msra.mxu0 %v6933_v55  ;;  %v7014_v55 = vld [vmem:[%s9658_s3 + $0x3e0] sm:$0xff]  }
  0x72   :  { %6099 = vmatpush3.bf16.msra.mxu1 %v6935_v58  ;;  %6036 = vmatprep.subr.bf16.mxu0 %v6942_v62  ;;  %v7015_v58 = vld [vmem:[%s9658_s3 + $0x3a0] sm:$0xff]   ;;  %v7008_v62 = vld [vmem:[%s9655_s0 + $0x20c] ss:$80 sps:$4 sm:$0xff]  }
  0x73   :  { %2475 = vmatmul.mubr.bf16.gmra.mxu0 %v6920_v56  ;;  %6100 = vmatprep.subr.bf16.mxu1 %v6944_v0  ;;  %v7000_v56 = vld [vmem:[%s9655_s0 + $0x160] ss:$80 sps:$4 sm:$0xff]   ;;  %v7023_v0 = vld [vmem:[%s9658_s3 + $0x318] sm:$0xff]  }
  0x74   :  { %2572 = vmatmul.mubr.bf16.gmra.mxu1 %v6921_v59  ;;  %2482 = vmatprep.mubr.bf16.mxu0 %v6926_v60  ;;  %v7001_v59 = vld [vmem:[%s9655_s0 + $0x168] ss:$80 sps:$4 sm:$0xff]   ;;  %v7006_v60 = vld [vmem:[%s9655_s0 + $0x204] ss:$80 sps:$4 sm:$0xff]  }
  0x75   :  { %2579 = vmatprep.mubr.bf16.mxu1 %v6928_v61  ;;  %6037 = vmatpush3.bf16.msra.mxu0 %v6943_v63  ;;  %v7022_v61 = vld [vmem:[%s9658_s3 + $0x358] sm:$0xff]  }
  0x76   :  { %6101 = vmatpush3.bf16.msra.mxu1 %v6945_v1  ;;  %6038 = vmatprep.subr.bf16.mxu0 %v6952_v6  ;;  %v7024_v63 = vld [vmem:[%s9658_s3 + $0x3d8] sm:$0xff]   ;;  %v7035_v6 = vld [vmem:[%s9658_s3 + $0x390] sm:$0xff]  }
  0x77   :  { %6102 = vmatprep.subr.bf16.mxu1 %v6954_v8  ;;  %v7025_v1 = vld [vmem:[%s9658_s3 + $0x398] sm:$0xff]   ;;  %v7016_v8 = vld [vmem:[%s9655_s0 + $0x2a4] ss:$80 sps:$4 sm:$0xff]  }
  0x79   :  { %6039 = vmatpush3.bf16.msra.mxu0 %v6953_v7  ;;  %v7011_v7 = vld [vmem:[%s9655_s0 + $0x208] ss:$80 sps:$4 sm:$0xff]  }
  0x7a   :  { %6103 = vmatpush3.bf16.msra.mxu1 %v6955_v9  ;;  %6040 = vmatprep.subr.bf16.mxu0 %v6962_v14  ;;  %v7042_v9 = vld [vmem:[%s9658_s3 + $0x348] sm:$0xff]   ;;  %v7052_v14 = vld [vmem:[%s9658_s3 + $0x340] sm:$0xff]  }
  0x7b   :  { %2483 = vmatmul.mubr.bf16.gmra.mxu0 %v6930_v2  ;;  %6104 = vmatprep.subr.bf16.mxu1 %v6964_v16  ;;  %v7032_v2 = vld [vmem:[%s9658_s3 + $0x350] sm:$0xff]  }
  0x7c   :  { %2580 = vmatmul.mubr.bf16.gmra.mxu1 %v6931_v3  ;;  %2490 = vmatprep.mubr.bf16.mxu0 %v6936_v4  ;;  %v7034_v3 = vld [vmem:[%s9658_s3 + $0x3d0] sm:$0xff]  }
  0x7d   :  { %2587 = vmatprep.mubr.bf16.mxu1 %v6938_v5  ;;  %6041 = vmatpush3.bf16.msra.mxu0 %v6963_v15  ;;  %v7033_v4 = vld [vmem:[%s9658_s3 + $0x310] sm:$0xff]   ;;  %v7053_v15 = vld [vmem:[%s9658_s3 + $0x300] sm:$0xff]  }
  0x7e   :  { %6105 = vmatpush3.bf16.msra.mxu1 %v6965_v17  ;;  %6042 = vmatprep.subr.bf16.mxu0 %v6972_v21  ;;  %v7010_v5 = vld [vmem:[%s9655_s0 + $0x200] ss:$80 sps:$4 sm:$0xff]   ;;  %v7028_v21 = vld [vmem:[%s9655_s0 + $0x34c] ss:$80 sps:$4 sm:$0xff]  }
  0x7f   :  { %6106 = vmatprep.subr.bf16.mxu1 %v6974_v24  ;;  %v7020_v16 = vld [vmem:[%s9655_s0 + $0x2a0] ss:$80 sps:$4 sm:$0xff]  }
  0x80   :  { %v7054_v17 = vld [vmem:[%s9658_s3 + $0x3c0] sm:$0xff]  }
  0x81   :  { %6043 = vmatpush3.bf16.msra.mxu0 %v6973_v23  ;;  %v7379_v23 = vmov 0   ;;  %v7030_v24 = vld [vmem:[%s9655_s0 + $0x340] ss:$80 sps:$4 sm:$0xff]  }
  0x82   :  { %6107 = vmatpush3.bf16.msra.mxu1 %v6975_v25  ;;  %6156 = vmatprep.subr.bf16.mxu0 %v6982_v27  ;;  %v7031_v25 = vld [vmem:[%s9655_s0 + $0x348] ss:$80 sps:$4 sm:$0xff]   ;;  %v7038_v27 = vld [vmem:[%s9655_s0 + $0x3ec] ss:$80 sps:$4 sm:$0xff]  }
  0x83   :  { %2491 = vmatmul.mubr.bf16.gmra.mxu0 %v6940_v10  ;;  %6220 = vmatprep.subr.bf16.mxu1 %v6984_v29  ;;  %v7044_v10 = vld [vmem:[%s9658_s3 + $0x3c8] sm:$0xff]  }
  0x84   :  { %2588 = vmatmul.mubr.bf16.gmra.mxu1 %v6941_v11  ;;  %2498 = vmatprep.mubr.bf16.mxu0 %v6946_v12  ;;  %v7018_v11 = vld [vmem:[%s9655_s0 + $0x2ac] ss:$80 sps:$4 sm:$0xff]   ;;  %v7041_v29 = vld [vmem:[%s9655_s0 + $0x3e8] ss:$80 sps:$4 sm:$0xff]  }
  0x85   :  { %2595 = vmatprep.mubr.bf16.mxu1 %v6948_v13  ;;  %v7043_v12 = vld [vmem:[%s9658_s3 + $0x308] sm:$0xff]  }
  0x86   :  { %v7045_v13 = vld [vmem:[%s9658_s3 + $0x388] sm:$0xff]  }
  0x8b   :  { %2499 = vmatmul.mubr.bf16.gmra.mxu0 %v6950_v18  ;;  %v7055_v18 = vld [vmem:[%s9658_s3 + $0x380] sm:$0xff]  }
  0x8c   :  { %2596 = vmatmul.mubr.bf16.gmra.mxu1 %v6951_v19  ;;  %2506 = vmatprep.mubr.bf16.mxu0 %v6956_v20  ;;  %v7021_v19 = vld [vmem:[%s9655_s0 + $0x2a8] ss:$80 sps:$4 sm:$0xff]   ;;  %v7026_v20 = vld [vmem:[%s9655_s0 + $0x344] ss:$80 sps:$4 sm:$0xff]  }
  0x8d   :  { %2603 = vmatprep.mubr.bf16.mxu1 %v6958_v22  ;;  %v7062_v22 = vld [vmem:[%s9658_s3 + $0x478] sm:$0xff]  }
  0x93   :  { %2507 = vmatmul.mubr.bf16.gmra.mxu0 %v6960_v26  ;;  %v7036_v26 = vld [vmem:[%s9655_s0 + $0x3e4] ss:$80 sps:$4 sm:$0xff]  }
  0x94   :  { %2604 = vmatmul.mubr.bf16.gmra.mxu1 %v6961_v28  ;;  %2514 = vmatprep.mubr.bf16.mxu0 %v6966_v30  ;;  %v7040_v28 = vld [vmem:[%s9655_s0 + $0x3e0] ss:$80 sps:$4 sm:$0xff]   ;;  %v7046_v30 = vld [vmem:[%s9655_s0 + $0x484] ss:$80 sps:$4 sm:$0xff]  }
  0x95   :  { %2611 = vmatprep.mubr.bf16.mxu1 %v6968_v31  ;;  %v7048_v31 = vld [vmem:[%s9655_s0 + $0x48c] ss:$80 sps:$4 sm:$0xff]  }
  0x9b   :  { %2515 = vmatmul.mubr.bf16.gmra.mxu0 %v6970_v32  ;;  %v7050_v32 = vld [vmem:[%s9655_s0 + $0x480] ss:$80 sps:$4 sm:$0xff]  }
  0x9c   :  { %2612 = vmatmul.mubr.bf16.gmra.mxu1 %v6971_v33  ;;  %2652 = vmatprep.mubr.bf16.mxu0 %v6978_v34  ;;  %v7051_v33 = vld [vmem:[%s9655_s0 + $0x488] ss:$80 sps:$4 sm:$0xff]   ;;  %v7058_v34 = vld [vmem:[%s9655_s0 + $0x34] ss:$80 sps:$4 sm:$0xff]  }
  0x9d   :  { %2749 = vmatprep.mubr.bf16.mxu1 %v6981_v35  ;;  %v7061_v35 = vld [vmem:[%s9655_s0 + $0x3c] ss:$80 sps:$4 sm:$0xff]  }
  0xa3   :  { %2653 = vmatmul.mubr.bf16.vlgmr.msra.gmra.mxu0 %v6976_v36  ;;  %v7056_v36 = vld [vmem:[%s9655_s0 + $0x30] ss:$80 sps:$4 sm:$0xff]  }
  0xa4   :  { %2750 = vmatmul.mubr.bf16.vlgmr.msra.gmra.mxu1 %v6979_v37  ;;  %6157 = vmatpush3.bf16.msra.mxu0 %v6983_v38  ;;  %v7059_v37 = vld [vmem:[%s9655_s0 + $0x38] ss:$80 sps:$4 sm:$0xff]  }
  0xa5   :  { %6221 = vmatpush3.bf16.msra.mxu1 %v6985_v39  ;;  %2660 = vmatprep.mubr.bf16.mxu0 %v6986_v40  ;;  %v7063_v38 = vld [vmem:[%s9658_s3 + $0x438] sm:$0xff]   ;;  %v7065_v40 = vld [vmem:[%s9655_s0 + $0xd4] ss:$80 sps:$4 sm:$0xff]  }
  0xa6   :  { %2757 = vmatprep.mubr.bf16.mxu1 %v6988_v41  ;;  %6158 = vmatprep.subr.bf16.mxu0 %v6992_v42  ;;  %v7064_v39 = vld [vmem:[%s9658_s3 + $0x4b8] sm:$0xff]   ;;  %v7071_v42 = vld [vmem:[%s9658_s3 + $0x470] sm:$0xff]  }
  0xa7   :  { %6222 = vmatprep.subr.bf16.mxu1 %v6994_v44  ;;  %v7067_v41 = vld [vmem:[%s9655_s0 + $0xdc] ss:$80 sps:$4 sm:$0xff]  }
  0xa8   :  { %6159 = vmatpush3.bf16.msra.mxu0 %v6993_v43 }
  0xa9   :  { %6223 = vmatpush3.bf16.msra.mxu1 %v6995_v45  ;;  %6160 = vmatprep.subr.bf16.mxu0 %v7002_v47  ;;  %v7072_v45 = vld [vmem:[%s9658_s3 + $0x430] sm:$0xff]  }
  0xaa   :  { %6224 = vmatprep.subr.bf16.mxu1 %v7004_v50 }
  0xab   :  { %2661 = vmatmul.mubr.bf16.gmra.mxu0 %v6990_v46  ;;  %v7073_v46 = vld [vmem:[%s9658_s3 + $0x4b0] sm:$0xff]  }
  0xac   :  { %2758 = vmatmul.mubr.bf16.gmra.mxu1 %v6991_v48  ;;  %2668 = vmatprep.mubr.bf16.mxu0 %v6996_v49  ;;  %v7069_v48 = vld [vmem:[%s9655_s0 + $0xd0] ss:$80 sps:$4 sm:$0xff]   ;;  %v7080_v49 = vld [vmem:[%s9658_s3 + $0x468] sm:$0xff]  }
  0xad   :  { %2765 = vmatprep.mubr.bf16.mxu1 %v6998_v51  ;;  %6161 = vmatpush3.bf16.msra.mxu0 %v7003_v52  ;;  %v7070_v52 = vld [vmem:[%s9655_s0 + $0xd8] ss:$80 sps:$4 sm:$0xff]  }
  0xae   :  { %6225 = vmatpush3.bf16.msra.mxu1 %v7005_v53  ;;  %6162 = vmatprep.subr.bf16.mxu0 %v7012_v54 }
  0xaf   :  { %6226 = vmatprep.subr.bf16.mxu1 %v7014_v55  ;;  %v7074_v55 = vld [vmem:[%s9655_s0 + $0x174] ss:$80 sps:$4 sm:$0xff]  }
  0xb1   :  { %6163 = vmatpush3.bf16.msra.mxu0 %v7013_v57  ;;  %v7076_v57 = vld [vmem:[%s9655_s0 + $0x17c] ss:$80 sps:$4 sm:$0xff]  }
  0xb2   :  { %6227 = vmatpush3.bf16.msra.mxu1 %v7015_v58  ;;  %6164 = vmatprep.subr.bf16.mxu0 %v7022_v61  ;;  %v7081_v58 = vld [vmem:[%s9658_s3 + $0x428] sm:$0xff]  }
  0xb3   :  { %2669 = vmatmul.mubr.bf16.gmra.mxu0 %v7000_v56  ;;  %6228 = vmatprep.subr.bf16.mxu1 %v7024_v63  ;;  %v7082_v61 = vld [vmem:[%s9658_s3 + $0x4a8] sm:$0xff]  }
  0xb4   :  { %2766 = vmatmul.mubr.bf16.gmra.mxu1 %v7001_v59  ;;  %2676 = vmatprep.mubr.bf16.mxu0 %v7006_v60 }
  0xb5   :  { %2773 = vmatprep.mubr.bf16.mxu1 %v7008_v62  ;;  %6165 = vmatpush3.bf16.msra.mxu0 %v7023_v0  ;;  %v7089_v0 = vld [vmem:[%s9658_s3 + $0x460] sm:$0xff]  }
  0xb6   :  { %6229 = vmatpush3.bf16.msra.mxu1 %v7025_v1  ;;  %6166 = vmatprep.subr.bf16.mxu0 %v7032_v2 }
  0xb7   :  { %6230 = vmatprep.subr.bf16.mxu1 %v7034_v3 }
  0xb9   :  { %6167 = vmatpush3.bf16.msra.mxu0 %v7033_v4 }
  0xba   :  { %6231 = vmatpush3.bf16.msra.mxu1 %v7035_v6  ;;  %6168 = vmatprep.subr.bf16.mxu0 %v7042_v9  ;;  %v7078_v6 = vld [vmem:[%s9655_s0 + $0x170] ss:$80 sps:$4 sm:$0xff]  }
  0xbb   :  { %2677 = vmatmul.mubr.bf16.gmra.mxu0 %v7010_v5  ;;  %6232 = vmatprep.subr.bf16.mxu1 %v7044_v10  ;;  %v7079_v10 = vld [vmem:[%s9655_s0 + $0x178] ss:$80 sps:$4 sm:$0xff]  }
  0xbc   :  { %2774 = vmatmul.mubr.bf16.gmra.mxu1 %v7011_v7  ;;  %2684 = vmatprep.mubr.bf16.mxu0 %v7016_v8  ;;  %v7090_v7 = vld [vmem:[%s9658_s3 + $0x420] sm:$0xff]  }
  0xbd   :  { %2781 = vmatprep.mubr.bf16.mxu1 %v7018_v11  ;;  %6169 = vmatpush3.bf16.msra.mxu0 %v7043_v12  ;;  %v7091_v11 = vld [vmem:[%s9658_s3 + $0x4a0] sm:$0xff]   ;;  %v7098_v12 = vld [vmem:[%s9658_s3 + $0x458] sm:$0xff]  }
  0xbe   :  { %6233 = vmatpush3.bf16.msra.mxu1 %v7045_v13  ;;  %6170 = vmatprep.subr.bf16.mxu0 %v7052_v14 }
  0xbf   :  { %6234 = vmatprep.subr.bf16.mxu1 %v7054_v17 }
  0xc1   :  { %6171 = vmatpush3.bf16.msra.mxu0 %v7053_v15  ;;  %v7083_v15 = vld [vmem:[%s9655_s0 + $0x214] ss:$80 sps:$4 sm:$0xff]  }
  0xc2   :  { %6235 = vmatpush3.bf16.msra.mxu1 %v7055_v18  ;;  %6284 = vmatprep.subr.bf16.mxu0 %v7062_v22  ;;  %v7099_v18 = vld [vmem:[%s9658_s3 + $0x498] sm:$0xff]  }
  0xc3   :  { %2685 = vmatmul.mubr.bf16.gmra.mxu0 %v7020_v16  ;;  %3105 = vmatprep.subr.bf16.mxu1 %v7379_v23  ;;  %v7085_v16 = vld [vmem:[%s9655_s0 + $0x21c] ss:$80 sps:$4 sm:$0xff]  }
  0xc4   :  { %2782 = vmatmul.mubr.bf16.gmra.mxu1 %v7021_v19  ;;  %2692 = vmatprep.mubr.bf16.mxu0 %v7026_v20 }
  0xc5   :  { %2789 = vmatprep.mubr.bf16.mxu1 %v7028_v21  ;;  %v7100_v21 = vld [vmem:[%s9658_s3 + $0x418] sm:$0xff]  }
  0xcb   :  { %2693 = vmatmul.mubr.bf16.gmra.mxu0 %v7030_v24 }
  0xcc   :  { %2790 = vmatmul.mubr.bf16.gmra.mxu1 %v7031_v25  ;;  %2700 = vmatprep.mubr.bf16.mxu0 %v7036_v26  ;;  %v7108_v25 = vld [vmem:[%s9658_s3 + $0x450] sm:$0xff]  }
  0xcd   :  { %2797 = vmatprep.mubr.bf16.mxu1 %v7038_v27 }
  0xd3   :  { %2701 = vmatmul.mubr.bf16.gmra.mxu0 %v7040_v28 }
  0xd4   :  { %2798 = vmatmul.mubr.bf16.gmra.mxu1 %v7041_v29  ;;  %2708 = vmatprep.mubr.bf16.mxu0 %v7046_v30 }
  0xd5   :  { %2805 = vmatprep.mubr.bf16.mxu1 %v7048_v31  ;;  %v7087_v31 = vld [vmem:[%s9655_s0 + $0x210] ss:$80 sps:$4 sm:$0xff]  }
  0xdb   :  { %2709 = vmatmul.mubr.bf16.gmra.mxu0 %v7050_v32  ;;  %v7107_v32 = vld [vmem:[%s9658_s3 + $0x490] sm:$0xff]  }
  0xdc   :  { %2806 = vmatmul.mubr.bf16.gmra.mxu1 %v7051_v33  ;;  %2846 = vmatprep.mubr.bf16.mxu0 %v7058_v34  ;;  %v7109_v33 = vld [vmem:[%s9658_s3 + $0x410] sm:$0xff]  }
  0xdd   :  { %2943 = vmatprep.mubr.bf16.mxu1 %v7061_v35 }
  0xe3   :  { %v5788_v43 = vpop.f32.mrf.mxu0  ;;  %2847 = vmatmul.mubr.bf16.vlgmr.msra.gmra.mxu0 %v7056_v36  ;;  %v7088_v36 = vld [vmem:[%s9655_s0 + $0x218] ss:$80 sps:$4 sm:$0xff]  }
  0xe4   :  { %v5852_v44 = vpop.f32.mrf.mxu1  ;;  %2944 = vmatmul.mubr.bf16.vlgmr.msra.gmra.mxu1 %v7059_v37  ;;  %6285 = vmatpush3.bf16.msra.mxu0 %v7063_v38  ;;  %v7117_v37 = vld [vmem:[%s9658_s3 + $0x448] sm:$0xff]  }
  0xe5   :  { %v5789_v47 = vpop.f32.mrf.mxu0  ;;  %3106 = vmatpush1.bf16.msra.mxu1 %v7064_v39  ;;  %2854 = vmatprep.mubr.bf16.mxu0 %v7065_v40  ;;  %v7094_v40 = vld [vmem:[%s9655_s0 + $0x2b4] ss:$80 sps:$4 sm:$0xff]  }
  0xe6   :  { %v5790_v50 = vadd.f32 %v5789_v47, %v5788_v43  ;;  %v5853_v51 = vpop.f32.mrf.mxu1  ;;  %2951 = vmatprep.mubr.bf16.mxu1 %v7067_v41  ;;  %6286 = vmatprep.subr.bf16.mxu0 %v7071_v42  ;;  %v7097_v42 = vld [vmem:[%s9655_s0 + $0x2bc] ss:$80 sps:$4 sm:$0xff]  }
  0xe7   :  { %v5854_v53 = vadd.f32 %v5853_v51, %v5852_v44  ;;  %v5791_v54 = vpop.f32.mrf.mxu0  ;;  %3107 = vmatprep.subr.bf16.mxu1 %v7379_v23  ;;  %v7110_v43 = vld [vmem:[%s9658_s3 + $0x488] sm:$0xff]  }
  0xe8   :  { %v5855_v56 = vpop.f32.mrf.mxu1  ;;  %6287 = vmatpush3.bf16.msra.mxu0 %v7072_v45 }
  0xe9   :  { %v8160_v59 = vadd.f32 %v5854_v53, %v5790_v50  ;;  %v5792_v60 = vpop.f32.mrf.mxu0  ;;  %3108 = vmatpush1.bf16.msra.mxu1 %v7073_v46  ;;  %6288 = vmatprep.subr.bf16.mxu0 %v7080_v49  ;;  %v7118_v46 = vld [vmem:[%s9658_s3 + $0x408] sm:$0xff]   ;;  %v7126_v49 = vld [vmem:[%s9658_s3 + $0x440] sm:$0xff]  }
  0xea   :  { %v5793_v62 = vadd.f32 %v5792_v60, %v5791_v54  ;;  %v5856_v63 = vpop.f32.mrf.mxu1  ;;  %3109 = vmatprep.subr.bf16.mxu1 %v7379_v23  ;;  %v7119_v60 = vld [vmem:[%s9658_s3 + $0x480] sm:$0xff]  }
  0xeb   :  { %v5857_v1 = vadd.f32 %v5856_v63, %v5855_v56  ;;  %v5794_v2 = vpop.f32.mrf.mxu0  ;;  %2855 = vmatmul.mubr.bf16.gmra.mxu0 %v7069_v48  ;;  %v7127_v56 = vld [vmem:[%s9658_s3 + $0x400] sm:$0xff]  }
  0xec   :  { %v5858_v3 = vpop.f32.mrf.mxu1  ;;  %2952 = vmatmul.mubr.bf16.gmra.mxu1 %v7070_v52  ;;  %2862 = vmatprep.mubr.bf16.mxu0 %v7074_v55  ;;  %v7092_v55 = vld [vmem:[%s9655_s0 + $0x2b0] ss:$80 sps:$4 sm:$0xff]  }
  0xed   :  { %v8169_v4 = vadd.f32 %v5857_v1, %v5793_v62  ;;  %v5795_v5 = vpop.f32.mrf.mxu0  ;;  %2959 = vmatprep.mubr.bf16.mxu1 %v7076_v57  ;;  %6289 = vmatpush3.bf16.msra.mxu0 %v7081_v58 }
  0xee   :  { %v5796_v8 = vadd.f32 %v5795_v5, %v5794_v2  ;;  %v5859_v9 = vpop.f32.mrf.mxu1  ;;  %3110 = vmatpush1.bf16.msra.mxu1 %v7082_v61  ;;  %6290 = vmatprep.subr.bf16.mxu0 %v7089_v0  ;;  %v7135_v61 = vld [vmem:[%s9659_s4 + $0x78] sm:$0xff]   ;;  %v7103_v2 = vld [vmem:[%s9655_s0 + $0x354] ss:$80 sps:$4 sm:$0xff]  }
  0xef   :  { %v5860_v13 = vadd.f32 %v5859_v9, %v5858_v3  ;;  %v5797_v14 = vpop.f32.mrf.mxu0  ;;  %3111 = vmatprep.subr.bf16.mxu1 %v7379_v23  ;;  %v7095_v0 = vld [vmem:[%s9655_s0 + $0x2b8] ss:$80 sps:$4 sm:$0xff]   ;;  %v7128_v9 = vld [vmem:[%s9658_s3 + $0x4c0] sm:$0xff]  }
  0xf0   :  { %v5861_v17 = vpop.f32.mrf.mxu1 }
  0xf1   :  { %v8196_v19 = vadd.f32 %v5860_v13, %v5796_v8  ;;  %v5798_v20 = vpop.f32.mrf.mxu0  ;;  %6291 = vmatpush3.bf16.msra.mxu0 %v7090_v7 }
  0xf2   :  { %v5799_v22 = vadd.f32 %v5798_v20, %v5797_v14  ;;  %v5862_v24 = vpop.f32.mrf.mxu1  ;;  %3112 = vmatpush1.bf16.msra.mxu1 %v7091_v11  ;;  %6292 = vmatprep.subr.bf16.mxu0 %v7098_v12  ;;  %v8274_v12 = vld [vmem:[%s9659_s4 + $0x88] sm:$0xff]  }
  0xf3   :  { %v5863_v26 = vadd.f32 %v5862_v24, %v5861_v17  ;;  %v5800_v27 = vpop.f32.mrf.mxu0  ;;  %2863 = vmatmul.mubr.bf16.gmra.mxu0 %v7078_v6  ;;  %3113 = vmatprep.subr.bf16.mxu1 %v7379_v23  ;;  %v7106_v6 = vld [vmem:[%s9655_s0 + $0x35c] ss:$80 sps:$4 sm:$0xff]   ;;  %v7113_v24 = vld [vmem:[%s9655_s0 + $0x3f4] ss:$80 sps:$4 sm:$0xff]  }
  0xf4   :  { %v5864_v28 = vpop.f32.mrf.mxu1  ;;  %2960 = vmatmul.mubr.bf16.gmra.mxu1 %v7079_v10  ;;  %2870 = vmatprep.mubr.bf16.mxu0 %v7083_v15 }
  0xf5   :  { %v8205_v29 = vadd.f32 %v5863_v26, %v5799_v22  ;;  %v5801_v30 = vpop.f32.mrf.mxu0  ;;  %2967 = vmatprep.mubr.bf16.mxu1 %v7085_v16  ;;  %6293 = vmatpush3.bf16.msra.mxu0 %v7100_v21  ;;  %v7104_v21 = vld [vmem:[%s9655_s0 + $0x358] ss:$80 sps:$4 sm:$0xff]  }
  0xf6   :  { %v5802_v34 = vadd.f32 %v5801_v30, %v5800_v27  ;;  %v5865_v35 = vpop.f32.mrf.mxu1  ;;  %3114 = vmatpush1.bf16.msra.mxu1 %v7099_v18  ;;  %6294 = vmatprep.subr.bf16.mxu0 %v7108_v25  ;;  %v7116_v27 = vld [vmem:[%s9655_s0 + $0x3fc] ss:$80 sps:$4 sm:$0xff]  }
  0xf7   :  { %v5866_v38 = vadd.f32 %v5865_v35, %v5864_v28  ;;  %v5803_v39 = vpop.f32.mrf.mxu0  ;;  %3115 = vmatprep.subr.bf16.mxu1 %v7379_v23 }
  0xf8   :  { %v5867_v41 = vpop.f32.mrf.mxu1 }
  0xf9   :  { %v8232_v44 = vadd.f32 %v5866_v38, %v5802_v34  ;;  %v5804_v45 = vpop.f32.mrf.mxu0  ;;  %6295 = vmatpush3.bf16.msra.mxu0 %v7109_v33  ;;  %v7111_v38 = vld [vmem:[%s9655_s0 + $0x3f0] ss:$80 sps:$4 sm:$0xff]  }
  0xfa   :  { %v5805_v47 = vadd.f32 %v5804_v45, %v5803_v39  ;;  %v5868_v48 = vpop.f32.mrf.mxu1  ;;  %3116 = vmatpush1.bf16.msra.mxu1 %v7107_v32  ;;  %6296 = vmatprep.subr.bf16.mxu0 %v7117_v37 }
  0xfb   :  { %v5869_v50 = vadd.f32 %v5868_v48, %v5867_v41  ;;  %v5806_v51 = vpop.f32.mrf.mxu0  ;;  %2871 = vmatmul.mubr.bf16.gmra.mxu0 %v7087_v31  ;;  %3117 = vmatprep.subr.bf16.mxu1 %v7379_v23  ;;  %v7114_v41 = vld [vmem:[%s9655_s0 + $0x3f8] ss:$80 sps:$4 sm:$0xff]  }
  0xfc   :  { %v5870_v52 = vpop.f32.mrf.mxu1  ;;  %2968 = vmatmul.mubr.bf16.gmra.mxu1 %v7088_v36  ;;  %2878 = vmatprep.mubr.bf16.mxu0 %v7094_v40 }
  0xfd   :  { %v8241_v53 = vadd.f32 %v5869_v50, %v5805_v47  ;;  %v5807_v54 = vpop.f32.mrf.mxu0  ;;  %2975 = vmatprep.mubr.bf16.mxu1 %v7097_v42  ;;  %6297 = vmatpush3.bf16.msra.mxu0 %v7118_v46  ;;  %v7125_v47 = vld [vmem:[%s9655_s0 + $0x49c] ss:$80 sps:$4 sm:$0xff]  }
  0xfe   :  { %v5808_v57 = vadd.f32 %v5807_v54, %v5806_v51  ;;  %v5871_v58 = vpop.f32.mrf.mxu1  ;;  %3118 = vmatpush1.bf16.msra.mxu1 %v7110_v43  ;;  %6298 = vmatprep.subr.bf16.mxu0 %v7126_v49  ;;  %v7122_v43 = vld [vmem:[%s9655_s0 + $0x494] ss:$80 sps:$4 sm:$0xff]  }
  0xff   :  { %v5872_v62 = vadd.f32 %v5871_v58, %v5870_v52  ;;  %v5809_v63 = vpop.f32.mrf.mxu0  ;;  %3119 = vmatprep.subr.bf16.mxu1 %v7379_v23  ;;  %v7120_v58 = vld [vmem:[%s9655_s0 + $0x490] ss:$80 sps:$4 sm:$0xff]  }
 0x100   :  { %v5873_v1 = vpop.f32.mrf.mxu1 }
 0x101   :  { %v8262_v3 = vadd.f32 %v5872_v62, %v5808_v57  ;;  %v5810_v5 = vpop.f32.mrf.mxu0  ;;  %6299 = vmatpush3.bf16.msra.mxu0 %v7127_v56  ;;  %v7123_v62 = vld [vmem:[%s9655_s0 + $0x498] ss:$80 sps:$4 sm:$0xff]  }
 0x102   :  { %v5811_v7 = vadd.f32 %v5810_v5, %v5809_v63  ;;  %v5874_v8 = vpop.f32.mrf.mxu1  ;;  %3120 = vmatpush1.bf16.msra.mxu1 %v7119_v60  ;;  %6348 = vmatprep.subr.bf16.mxu0 %v7135_v61  ;;  %v7134_v5 = vld [vmem:[%s9655_s0 + $0x4c] ss:$80 sps:$4 sm:$0xff]  }
 0x103   :  { %v5875_v10 = vadd.f32 %v5874_v8, %v5873_v1  ;;  %v5812_v11 = vpop.f32.mrf.mxu0  ;;  %2879 = vmatmul.mubr.bf16.gmra.mxu0 %v7092_v55  ;;  %3135 = vmatprep.subr.bf16.mxu1 %v7379_v23  ;;  %v7101_v23 = vld [vmem:[%s9655_s0 + $0x350] ss:$80 sps:$4 sm:$0xff]  }
 0x104   :  { %v5876_v13 = vpop.f32.mrf.mxu1  ;;  %2976 = vmatmul.mubr.bf16.gmra.mxu1 %v7095_v0  ;;  %2886 = vmatprep.mubr.bf16.mxu0 %v7103_v2  ;;  %v7131_v0 = vld [vmem:[%s9655_s0 + $0x44] ss:$80 sps:$4 sm:$0xff]  }
 0x105   :  { %v8276_v14 = vadd.f32 %v5875_v10, %v5811_v7  ;;  %v5813_v15 = vpop.f32.mrf.mxu0  ;;  %2983 = vmatprep.mubr.bf16.mxu1 %v7106_v6 }
 0x106   :  { %v5814_v16 = vadd.f32 %v5813_v15, %v5812_v11  ;;  %v5877_v17 = vpop.f32.mrf.mxu1  ;;  %3136 = vmatpush2.bf16.msra.mxu1 %v7128_v9 }
 0x107   :  { %v5878_v18 = vadd.f32 %v5877_v17, %v5876_v13  ;;  %v5815_v20 = vpop.f32.mrf.mxu0  ;;  %6496 = vmatprep.subr.bf16.mxu1 %v8274_v12  ;;  %v7129_v17 = vld [vmem:[%s9655_s0 + $0x40] ss:$80 sps:$4 sm:$0xff]  }
 0x108   :  { %v5879_v22 = vpop.f32.mrf.mxu1 }
 0x109   :  { %v8288_v25 = vadd.f32 %v5878_v18, %v5814_v16  ;;  %v5816_v26 = vpop.f32.mrf.mxu0 }
 0x10a   :  { %v5817_v28 = vadd.f32 %v5816_v26, %v5815_v20  ;;  %v5880_v30 = vpop.f32.mrf.mxu1 }
 0x10b   :  { %v5881_v31 = vadd.f32 %v5880_v30, %v5879_v22  ;;  %v5818_v32 = vpop.f32.mrf.mxu0  ;;  %2887 = vmatmul.mubr.bf16.gmra.mxu0 %v7101_v23  ;;  %v7132_v23 = vld [vmem:[%s9655_s0 + $0x48] ss:$80 sps:$4 sm:$0xff]  }
 0x10c   :  { %v5882_v33 = vpop.f32.mrf.mxu1  ;;  %2984 = vmatmul.mubr.bf16.gmra.mxu1 %v7104_v21  ;;  %2894 = vmatprep.mubr.bf16.mxu0 %v7113_v24  ;;  %v7136_v22 = vld [vmem:[%s9659_s4 + $0x38] sm:$0xff]  }
 0x10d   :  { %v8293_v34 = vadd.f32 %v5881_v31, %v5817_v28  ;;  %v5819_v35 = vpop.f32.mrf.mxu0  ;;  %2991 = vmatprep.mubr.bf16.mxu1 %v7116_v27  ;;  %v7140_v27 = vld [vmem:[%s9655_s0 + $0xe4] ss:$80 sps:$4 sm:$0xff]   ;;  %v7141_v31 = vld [vmem:[%s9655_s0 + $0xec] ss:$80 sps:$4 sm:$0xff]  }
 0x10e   :  { %v5820_v36 = vadd.f32 %v5819_v35, %v5818_v32  ;;  %v5883_v37 = vpop.f32.mrf.mxu1  ;;  %v7144_v32 = vld [vmem:[%s9659_s4 + $0x70] sm:$0xff]  }
 0x10f   :  { %v5884_v39 = vadd.f32 %v5883_v37, %v5882_v33  ;;  %v5821_v40 = vpop.f32.mrf.mxu0 }
 0x110   :  { %v5885_v42 = vpop.f32.mrf.mxu1 }
 0x111   :  { %v8304_v45 = vadd.f32 %v5884_v39, %v5820_v36  ;;  %v5822_v46 = vpop.f32.mrf.mxu0  ;;  %v7170_v36 = vld [vmem:[%s9659_s4 + $0x80] sm:$0xff]  }
 0x112   :  { %v5823_v48 = vadd.f32 %v5822_v46, %v5821_v40  ;;  %v5886_v49 = vpop.f32.mrf.mxu1 }
 0x113   :  { %v5887_v50 = vadd.f32 %v5886_v49, %v5885_v42  ;;  %v5824_v51 = vpop.f32.mrf.mxu0  ;;  %2895 = vmatmul.mubr.bf16.gmra.mxu0 %v7111_v38  ;;  %v7145_v38 = vld [vmem:[%s9659_s4 + $0x30] sm:$0xff]   ;;  %v7152_v42 = vld [vmem:[%s9659_s4 + $0x68] sm:$0xff]  }
 0x114   :  { %v5888_v52 = vpop.f32.mrf.mxu1  ;;  %2992 = vmatmul.mubr.bf16.gmra.mxu1 %v7114_v41  ;;  %2902 = vmatprep.mubr.bf16.mxu0 %v7122_v43  ;;  %v7138_v41 = vld [vmem:[%s9655_s0 + $0xe0] ss:$80 sps:$4 sm:$0xff]  }
 0x115   :  { %v8309_v54 = vadd.f32 %v5887_v50, %v5823_v48  ;;  %v5825_v55 = vpop.f32.mrf.mxu0  ;;  %2999 = vmatprep.mubr.bf16.mxu1 %v7125_v47  ;;  %v7143_v47 = vld [vmem:[%s9655_s0 + $0xe8] ss:$80 sps:$4 sm:$0xff]   ;;  %v7149_v50 = vld [vmem:[%s9655_s0 + $0x18c] ss:$80 sps:$4 sm:$0xff]  }
 0x116   :  { %v5826_v56 = vadd.f32 %v5825_v55, %v5824_v51  ;;  %v5889_v57 = vpop.f32.mrf.mxu1  ;;  %v7153_v51 = vld [vmem:[%s9659_s4 + $0x28] sm:$0xff]  }
 0x117   :  { %v5890_v60 = vadd.f32 %v5889_v57, %v5888_v52  ;;  %v5827_v61 = vpop.f32.mrf.mxu0 }
 0x118   :  { %v5891_v63 = vpop.f32.mrf.mxu1 }
 0x119   :  { %v8320_v1 = vadd.f32 %v5890_v60, %v5826_v56  ;;  %v5828_v2 = vpop.f32.mrf.mxu0  ;;  %v7160_v56 = vld [vmem:[%s9659_s4 + $0x60] sm:$0xff]  }
 0x11a   :  { %v5829_v6 = vadd.f32 %v5828_v2, %v5827_v61  ;;  %v5892_v7 = vpop.f32.mrf.mxu1 }
 0x11b   :  { %v5893_v8 = vadd.f32 %v5892_v7, %v5891_v63  ;;  %v5830_v9 = vpop.f32.mrf.mxu0  ;;  %2903 = vmatmul.mubr.bf16.gmra.mxu0 %v7120_v58  ;;  %v7146_v7 = vld [vmem:[%s9655_s0 + $0x180] ss:$80 sps:$4 sm:$0xff]  }
 0x11c   :  { %v5894_v10 = vpop.f32.mrf.mxu1  ;;  %3000 = vmatmul.mubr.bf16.gmra.mxu1 %v7123_v62  ;;  %3040 = vmatprep.mubr.bf16.mxu0 %v7131_v0 }
 0x11d   :  { %v8325_v11 = vadd.f32 %v5893_v8, %v5829_v6  ;;  %v5831_v13 = vpop.f32.mrf.mxu0  ;;  %5670 = vmatprep.mubr.msk.bf16.mxu1 %vm2207_vm0, %v7134_v5  ;;  %v7168_v5 = vld [vmem:[%s9659_s4 + $0x58] sm:$0xff]  }
 0x11e   :  { %v5832_v15 = vadd.f32 %v5831_v13, %v5830_v9  ;;  %v5895_v16 = vpop.f32.mrf.mxu1  ;;  %v7156_v13 = vld [vmem:[%s9655_s0 + $0x224] ss:$80 sps:$4 sm:$0xff]  }
 0x11f   :  { %v5896_v18 = vadd.f32 %v5895_v16, %v5894_v10  ;;  %v5833_v20 = vpop.f32.mrf.mxu0 }
 0x120   :  { %v5897_v21 = vpop.f32.mrf.mxu1 }
 0x121   :  { %v8337_v24 = vadd.f32 %v5896_v18, %v5832_v15  ;;  %v5834_v26 = vpop.f32.mrf.mxu0  ;;  %v7169_v18 = vld [vmem:[%s9659_s4 + $0x18] sm:$0xff]  }
 0x122   :  { %v5835_v28 = vadd.f32 %v5834_v26, %v5833_v20  ;;  %v5898_v30 = vpop.f32.mrf.mxu1 }
 0x123   :  { %v5899_v33 = vadd.f32 %v5898_v30, %v5897_v21  ;;  %v5916_v35 = vpop.f32.mrf.mxu0  ;;  %3041 = vmatmul.mubr.bf16.vlgmr.msra.gmra.mxu0 %v7129_v17  ;;  %v7157_v17 = vld [vmem:[%s9655_s0 + $0x22c] ss:$80 sps:$4 sm:$0xff]   ;;  %v7177_v21 = vld [vmem:[%s9659_s4 + $0x50] sm:$0xff]  }
 0x124   :  { %v5980_v37 = vpop.f32.mrf.mxu1  ;;  %3138 = vmatmul.mubr.bf16.vlgmr.msra.gmra.mxu1 %v7132_v23  ;;  %6349 = vmatpush3.bf16.msra.mxu0 %v7136_v22 }
 0x125   :  { %v8354_v39 = vadd.f32 %v5899_v33, %v5835_v28  ;;  %v5917_v40 = vpop.f32.mrf.mxu0  ;;  %6497 = vmatpush3.bf16.msra.mxu1 %v8274_v12  ;;  %3048 = vmatprep.mubr.bf16.mxu0 %v7140_v27  ;;  %v7148_v12 = vld [vmem:[%s9655_s0 + $0x184] ss:$80 sps:$4 sm:$0xff]  }
 0x126   :  { %v5918_v43 = vadd.f32 %v5917_v40, %v5916_v35  ;;  %v5981_v46 = vpop.f32.mrf.mxu1  ;;  %5671 = vmatprep.mubr.msk.bf16.mxu1 %vm2207_vm0, %v7141_v31  ;;  %6350 = vmatprep.subr.bf16.mxu0 %v7144_v32 }
 0x127   :  { %v5982_v48 = vadd.f32 %v5981_v46, %v5980_v37  ;;  %v5919_v49 = vpop.f32.mrf.mxu0  ;;  %6498 = vmatprep.subr.bf16.mxu1 %v7170_v36 }
 0x128   :  { %v2461_v52 = vadd.f32 %v5918_v43, %v8160_v59  ;;  %v5983_v55 = vpop.f32.mrf.mxu1  ;;  %6351 = vmatpush3.bf16.msra.mxu0 %v7145_v38  ;;  %v7161_v59 = vld [vmem:[%s9659_s4 + $0x20] sm:$0xff]  }
 0x129   :  { %v5920_v57 = vpop.f32.mrf.mxu0  ;;  %6352 = vmatprep.subr.bf16.mxu0 %v7152_v42  ;;  %6499 = vmatpush3.bf16.msra.mxu1 %v7170_v36 }
 0x12a   :  { %v8380_v58 = vadd.f32 %v5982_v48, %v2461_v52  ;;  %v5921_v60 = vadd.f32 %v5920_v57, %v5919_v49  ;;  %v5984_v61 = vpop.f32.mrf.mxu1 }
 0x12b   :  { %v5985_v62 = vadd.f32 %v5984_v61, %v5983_v55  ;;  %v5922_v63 = vpop.f32.mrf.mxu0  ;;  %3049 = vmatmul.mubr.bf16.gmra.mxu0 %v7138_v41 }
 0x12c   :  { %v2464_v0 = vadd.f32 %v5921_v60, %v8169_v4  ;;  %v5986_v2 = vpop.f32.mrf.mxu1  ;;  %3146 = vmatmul.mubr.bf16.gmra.mxu1 %v7143_v47  ;;  %3056 = vmatprep.mubr.bf16.mxu0 %v7148_v12  ;;  %v7151_v4 = vld [vmem:[%s9655_s0 + $0x188] ss:$80 sps:$4 sm:$0xff]  }
 0x12d   :  { %v5923_v6 = vpop.f32.mrf.mxu0  ;;  %5672 = vmatprep.mubr.msk.bf16.mxu1 %vm2207_vm0, %v7149_v50  ;;  %6353 = vmatpush3.bf16.msra.mxu0 %v7153_v51 }
 0x12e   :  { %v8393_v8 = vadd.f32 %v5985_v62, %v2464_v0  ;;  %v5924_v9 = vadd.f32 %v5923_v6, %v5922_v63  ;;  %v5987_v10 = vpop.f32.mrf.mxu1  ;;  %6354 = vmatprep.subr.bf16.mxu0 %v7160_v56 }
 0x12f   :  { %v5988_v15 = vadd.f32 %v5987_v10, %v5986_v2  ;;  %v5925_v16 = vpop.f32.mrf.mxu0 }
 0x130   :  { %v2469_v20 = vadd.f32 %v5924_v9, %v8196_v19  ;;  %v5989_v23 = vpop.f32.mrf.mxu1 }
 0x131   :  { %v5926_v22 = vpop.f32.mrf.mxu0  ;;  %6355 = vmatpush3.bf16.msra.mxu0 %v7161_v59 }
 0x132   :  { %v8411_v26 = vadd.f32 %v5988_v15, %v2469_v20  ;;  %v5927_v27 = vadd.f32 %v5926_v22, %v5925_v16  ;;  %v5990_v28 = vpop.f32.mrf.mxu1  ;;  %6356 = vmatprep.subr.bf16.mxu0 %v7168_v5 }
 0x133   :  { %v5991_v30 = vadd.f32 %v5990_v28, %v5989_v23  ;;  %v5928_v31 = vpop.f32.mrf.mxu0  ;;  %3057 = vmatmul.mubr.bf16.gmra.mxu0 %v7146_v7 }
 0x134   :  { %13 = vsyncpa [#allocation4], 0  ;;  %v2472_v32 = vadd.f32 %v5927_v27, %v8205_v29  ;;  %v5992_v33 = vpop.f32.mrf.mxu1  ;;  %3154 = vmatmul.mubr.bf16.gmra.mxu1 %v7151_v4  ;;  %3064 = vmatprep.mubr.bf16.mxu0 %v7156_v13  ;;  %v7178_v35 = vld [vmem:[%s9659_s4 + $0x10] sm:$0xff]   ;;  %v7185_v29 = vld [vmem:[%s9659_s4 + $0x48] sm:$0xff]   ;;  %vm3498_vm1 = vcmask 261120   ;;  %vm3949_vm2 = vcmask 254976  }
 0x135   :  { %v5929_v19 = vpop.f32.mrf.mxu0  ;;  %5673 = vmatprep.mubr.msk.bf16.mxu1 %vm2207_vm0, %v7157_v17  ;;  %6357 = vmatpush3.bf16.msra.mxu0 %v7169_v18  ;;  %v7154_v42 = vld [vmem:[%s9655_s0 + $0x220] ss:$80 sps:$4 sm:$0xff]   ;;  %v7159_v47 = vld [vmem:[%s9655_s0 + $0x228] ss:$80 sps:$4 sm:$0xff]   ;;  %v7164_v12 = vld [vmem:[%s9655_s0 + $0x2c4] ss:$80 sps:$4 sm:$0xff]  }
 0x136   :  { %v8418_v36 = vadd.f32 %v5991_v30, %v2472_v32  ;;  %v5930_v37 = vadd.f32 %v5929_v19, %v5928_v31  ;;  %v5993_v38 = vpop.f32.mrf.mxu1  ;;  %6358 = vmatprep.subr.bf16.mxu0 %v7177_v21  ;;  %v7165_v49 = vld [vmem:[%s9655_s0 + $0x2cc] ss:$80 sps:$4 sm:$0xff]   ;;  %v7193_v55 = vld [vmem:[%s9659_s4 + $0x40] sm:$0xff]   ;;  %v7167_v10 = vld [vmem:[%s9655_s0 + $0x2c8] ss:$80 sps:$4 sm:$0xff]   ;;  %vm4142_vm3 = vcmask 1046528  }
 0x137   :  { %v5994_v40 = vadd.f32 %v5993_v38, %v5992_v33  ;;  %v5931_v41 = vpop.f32.mrf.mxu0  ;;  %v7186_v50 = vld [vmem:[%s9659_s4 + $0x8] sm:$0xff]   ;;  %v7194_v63 = vld [vmem:[%s9659_s4] sm:$0xff]   ;;  %vm4191_vm4 = vcmask 1045504   ;;  %s7383_s19 = smov 64   ;;  %vm4608_vm5 = vcmask 523264   ;;  %vm4625_vm6 = vcmask 785408  }
 0x138   :  { %v2477_v43 = vadd.f32 %v5930_v37, %v8232_v44  ;;  %v5995_v46 = vpop.f32.mrf.mxu1  ;;  %v7173_v4 = vld [vmem:[%s9655_s0 + $0x364] ss:$80 sps:$4 sm:$0xff]   ;;  %v7174_v15 = vld [vmem:[%s9655_s0 + $0x36c] ss:$80 sps:$4 sm:$0xff]   ;;  %v7171_v33 = vld [vmem:[%s9655_s0 + $0x360] ss:$80 sps:$4 sm:$0xff]  }
 0x139   :  { %v5932_v48 = vpop.f32.mrf.mxu0  ;;  %6359 = vmatpush3.bf16.msra.mxu0 %v7178_v35  ;;  %v7181_v37 = vld [vmem:[%s9655_s0 + $0x404] ss:$80 sps:$4 sm:$0xff]  }
 0x13a   :  { %v8439_v44 = vadd.f32 %v5994_v40, %v2477_v43  ;;  %v5933_v51 = vadd.f32 %v5932_v48, %v5931_v41  ;;  %v5996_v52 = vpop.f32.mrf.mxu1  ;;  %6360 = vmatprep.subr.bf16.mxu0 %v7185_v29  ;;  %v7182_v29 = vld [vmem:[%s9655_s0 + $0x40c] ss:$80 sps:$4 sm:$0xff]  }
 0x13b   :  { %v5997_v56 = vadd.f32 %v5996_v52, %v5995_v46  ;;  %v5934_v57 = vpop.f32.mrf.mxu0  ;;  %3065 = vmatmul.mubr.bf16.gmra.mxu0 %v7154_v42 }
 0x13c   :  { %v2480_v60 = vadd.f32 %v5933_v51, %v8241_v53  ;;  %v5998_v61 = vpop.f32.mrf.mxu1  ;;  %3162 = vmatmul.mubr.bf16.gmra.mxu1 %v7159_v47  ;;  %3072 = vmatprep.mubr.bf16.mxu0 %v7164_v12  ;;  %v7162_v53 = vld [vmem:[%s9655_s0 + $0x2c0] ss:$80 sps:$4 sm:$0xff]  }
 0x13d   :  { %v5935_v62 = vpop.f32.mrf.mxu0  ;;  %5674 = vmatprep.mubr.msk.bf16.mxu1 %vm2207_vm0, %v7165_v49  ;;  %6361 = vmatpush3.bf16.msra.mxu0 %v7186_v50 }
 0x13e   :  { %v8449_v59 = vadd.f32 %v5997_v56, %v2480_v60  ;;  %v5936_v0 = vadd.f32 %v5935_v62, %v5934_v57  ;;  %v5999_v2 = vpop.f32.mrf.mxu1  ;;  %6362 = vmatprep.subr.bf16.mxu0 %v7193_v55  ;;  %v7179_v55 = vld [vmem:[%s9655_s0 + $0x400] ss:$80 sps:$4 sm:$0xff]   ;;  %v7189_v60 = vld [vmem:[%s9655_s0 + $0x4a4] ss:$80 sps:$4 sm:$0xff]   ;;  %v7190_v62 = vld [vmem:[%s9655_s0 + $0x4ac] ss:$80 sps:$4 sm:$0xff]  }
 0x13f   :  { %v6000_v5 = vadd.f32 %v5999_v2, %v5998_v61  ;;  %v5937_v6 = vpop.f32.mrf.mxu0 }
 0x140   :  { %v2485_v7 = vadd.f32 %v5936_v0, %v8262_v3  ;;  %v6001_v9 = vpop.f32.mrf.mxu1 }
 0x141   :  { %v5938_v13 = vpop.f32.mrf.mxu0  ;;  %6363 = vmatpush3.bf16.msra.mxu0 %v7194_v63 }
 0x142   :  { %v8464_v16 = vadd.f32 %v6000_v5, %v2485_v7  ;;  %v5939_v17 = vadd.f32 %v5938_v13, %v5937_v6  ;;  %v6002_v18 = vpop.f32.mrf.mxu1 }
 0x143   :  { %v6003_v3 = vadd.f32 %v6002_v18, %v6001_v9  ;;  %v5940_v20 = vpop.f32.mrf.mxu0  ;;  %3073 = vmatmul.mubr.bf16.gmra.mxu0 %v7162_v53 }
 0x144   :  { %v2488_v23 = vadd.f32 %v5939_v17, %v8276_v14  ;;  %v6004_v21 = vpop.f32.mrf.mxu1  ;;  %3170 = vmatmul.mubr.bf16.gmra.mxu1 %v7167_v10  ;;  %3080 = vmatprep.mubr.bf16.mxu0 %v7173_v4  ;;  %v7176_v14 = vld [vmem:[%s9655_s0 + $0x368] ss:$80 sps:$4 sm:$0xff]   ;;  %v7187_v17 = vld [vmem:[%s9655_s0 + $0x4a0] ss:$80 sps:$4 sm:$0xff]  }
 0x145   :  { %v5941_v22 = vpop.f32.mrf.mxu0  ;;  %5675 = vmatprep.mubr.msk.bf16.mxu1 %vm2207_vm0, %v7174_v15 }
 0x146   :  { %v8468_v27 = vadd.f32 %v6003_v3, %v2488_v23  ;;  %v5942_v28 = vadd.f32 %v5941_v22, %v5940_v20  ;;  %v6005_v30 = vpop.f32.mrf.mxu1  ;;  %v7197_v20 = vld [vmem:[%s9656_s1 + $0x4] ss:$12 sps:$4 sm:$0xff]  }
 0x147   :  { %v6006_v31 = vadd.f32 %v6005_v30, %v6004_v21  ;;  %v5943_v32 = vpop.f32.mrf.mxu0  ;;  %v7198_v21 = vld [vmem:[%s9656_s1 + $0x8] ss:$12 sps:$4 sm:$0xff]  }
 0x148   :  { %v2493_v19 = vadd.f32 %v5942_v28, %v8288_v25  ;;  %v6007_v35 = vpop.f32.mrf.mxu1 }
 0x149   :  { %v5944_v38 = vpop.f32.mrf.mxu0 }
 0x14a   :  { %v8483_v40 = vadd.f32 %v6006_v31, %v2493_v19  ;;  %v5945_v41 = vadd.f32 %v5944_v38, %v5943_v32  ;;  %v6008_v42 = vpop.f32.mrf.mxu1  ;;  %v3852_v32 = vld [vmem:[%s9657_s2] sm:$0xff] }
 0x14b   :  { %v6009_v43 = vadd.f32 %v6008_v42, %v6007_v35  ;;  %v5946_v25 = vpop.f32.mrf.mxu0  ;;  %3081 = vmatmul.mubr.bf16.gmra.mxu0 %v7171_v33  ;;  %v7195_v42 = vld [vmem:[%s9656_s1] ss:$12 sps:$4 sm:$0xff]  }
 0x14c   :  { %v2496_v46 = vadd.f32 %v5945_v41, %v8293_v34  ;;  %v6010_v47 = vpop.f32.mrf.mxu1  ;;  %3178 = vmatmul.mubr.bf16.gmra.mxu1 %v7176_v14  ;;  %3088 = vmatprep.mubr.bf16.mxu0 %v7181_v37  ;;  %v7184_v34 = vld [vmem:[%s9655_s0 + $0x408] ss:$80 sps:$4 sm:$0xff]  }
 0x14d   :  { %v5947_v12 = vpop.f32.mrf.mxu0  ;;  %5676 = vmatprep.mubr.msk.bf16.mxu1 %vm2207_vm0, %v7182_v29 }
 0x14e   :  { %v8487_v48 = vadd.f32 %v6009_v43, %v2496_v46  ;;  %v5948_v49 = vadd.f32 %v5947_v12, %v5946_v25  ;;  %v6011_v50 = vpop.f32.mrf.mxu1  ;;  %v7199_v46 = vld [vmem:[%s9656_s1 + $0x20] ss:$12 sps:$4 sm:$0xff]  }
 0x14f   :  { %v6012_v51 = vadd.f32 %v6011_v50, %v6010_v47  ;;  %v5949_v52 = vpop.f32.mrf.mxu0  ;;  %v7202_v47 = vld [vmem:[%s9656_s1 + $0x1c] ss:$12 sps:$4 sm:$0xff]  }
 0x150   :  { %v2501_v56 = vadd.f32 %v5948_v49, %v8304_v45  ;;  %v6013_v57 = vpop.f32.mrf.mxu1  ;;  %v7206_v49 = vld [vmem:[%s9656_s1 + $0x38] ss:$12 sps:$4 sm:$0xff]  }
 0x151   :  { %v5950_v61 = vpop.f32.mrf.mxu0 }
 0x152   :  { %v8502_v63 = vadd.f32 %v6012_v51, %v2501_v56  ;;  %v5951_v0 = vadd.f32 %v5950_v61, %v5949_v52  ;;  %v6014_v2 = vpop.f32.mrf.mxu1  ;;  %v3854_v56 = vld [vmem:[%s9657_s2 + $0x10] sm:$0xff] }
 0x153   :  { %v6015_v5 = vadd.f32 %v6014_v2, %v6013_v57  ;;  %v5952_v45 = vpop.f32.mrf.mxu0  ;;  %3089 = vmatmul.mubr.bf16.gmra.mxu0 %v7179_v55 }
 0x154   :  { %v2504_v6 = vadd.f32 %v5951_v0, %v8309_v54  ;;  %v6016_v53 = vpop.f32.mrf.mxu1  ;;  %3186 = vmatmul.mubr.bf16.gmra.mxu1 %v7184_v34  ;;  %3096 = vmatprep.mubr.bf16.mxu0 %v7189_v60  ;;  %v7192_v54 = vld [vmem:[%s9655_s0 + $0x4a8] ss:$80 sps:$4 sm:$0xff]   ;;  %s7380_s0 = smov 32  }
 0x155   :  { %v5953_v7 = vpop.f32.mrf.mxu0  ;;  %5677 = vmatprep.mubr.msk.bf16.mxu1 %vm2207_vm0, %v7190_v62  ;;  %3884 = vrot.lane.b32.xlu0 %v3852_v32, %s7380_s0 }
 0x156   :  { %v8506_v9 = vadd.f32 %v6015_v5, %v2504_v6  ;;  %v5954_v10 = vadd.f32 %v5953_v7, %v5952_v45  ;;  %v6017_v4 = vpop.f32.mrf.mxu1  ;;  %3888 = vrot.lane.b32.xlu1 %v3854_v56, %s7380_s0  ;;  %v7200_v45 = vld [vmem:[%s9656_s1 + $0x18] ss:$12 sps:$4 sm:$0xff]   ;;  %v7205_v7 = vld [vmem:[%s9656_s1 + $0x34] ss:$12 sps:$4 sm:$0xff]  }
 0x157   :  { %v6018_v13 = vadd.f32 %v6017_v4, %v6016_v53  ;;  %v5955_v15 = vpop.f32.mrf.mxu0 }
 0x158   :  { %v2509_v18 = vadd.f32 %v5954_v10, %v8320_v1  ;;  %v6019_v3 = vpop.f32.mrf.mxu1  ;;  %v7207_v10 = vld [vmem:[%s9656_s1 + $0x50] ss:$12 sps:$4 sm:$0xff]  }
 0x159   :  { %v5956_v23 = vpop.f32.mrf.mxu0 }
 0x15a   :  { %v8521_v22 = vadd.f32 %v6018_v13, %v2509_v18  ;;  %v5957_v28 = vadd.f32 %v5956_v23, %v5955_v15  ;;  %v6020_v30 = vpop.f32.mrf.mxu1  ;;  %v7214_v13 = vld [vmem:[%s9656_s1 + $0x68] ss:$12 sps:$4 sm:$0xff]  }
 0x15b   :  { %v6021_v1 = vadd.f32 %v6020_v30, %v6019_v3  ;;  %v5958_v31 = vpop.f32.mrf.mxu0  ;;  %3097 = vmatmul.mubr.bf16.gmra.mxu0 %v7187_v17  ;;  %v3856_v3 = vld [vmem:[%s9657_s2 + $0x20] sm:$0xff] }
 0x15c   :  { %v2512_v33 = vadd.f32 %v5957_v28, %v8325_v11  ;;  %v6022_v19 = vpop.f32.mrf.mxu1  ;;  %3194 = vmatmul.mubr.bf16.gmra.mxu1 %v7192_v54  ;;  %3555 = vmatprep.mubr.bf16.mxu0 %v7197_v20  ;;  %v3853_v11 = vld [vmem:[%s9657_s2 + $0x8] sm:$0xff] }
 0x15d   :  { %v5959_v35 = vpop.f32.mrf.mxu0  ;;  %6500 = vmatprep.mubr.msk.bf16.mxu1 %vm3498_vm1, %v7198_v21  ;;  %3886 = vrot.lane.b32.xlu0 %v3853_v11, %s7380_s0 }
 0x15e   :  { %v8529_v14 = vadd.f32 %v6021_v1, %v2512_v33  ;;  %v5960_v37 = vadd.f32 %v5959_v35, %v5958_v31  ;;  %v6023_v38 = vpop.f32.mrf.mxu1  ;;  %v3857_v33 = vld [vmem:[%s9657_s2 + $0x28] sm:$0xff] }
 0x15f   :  { %v6024_v29 = vadd.f32 %v6023_v38, %v6022_v19  ;;  %v5961_v41 = vpop.f32.mrf.mxu0  ;;  %v7215_v38 = vld [vmem:[%s9656_s1 + $0x80] ss:$12 sps:$4 sm:$0xff]  }
 0x160   :  { %v2517_v43 = vadd.f32 %v5960_v37, %v8337_v24  ;;  %v6025_v25 = vpop.f32.mrf.mxu1  ;;  %v7210_v37 = vld [vmem:[%s9656_s1 + $0x4c] ss:$12 sps:$4 sm:$0xff]  }
 0x161   :  { %v5962_v12 = vpop.f32.mrf.mxu0  ;;  %3892 = vrot.lane.b32.xlu0 %v3856_v3, %s7380_s0 }
 0x162   :  { %v8548_v50 = vadd.f32 %v6024_v29, %v2517_v43  ;;  %v5963_v51 = vadd.f32 %v5962_v12, %v5961_v41  ;;  %v6026_v24 = vpop.f32.mrf.mxu1  ;;  %v7222_v41 = vld [vmem:[%s9656_s1 + $0x98] ss:$12 sps:$4 sm:$0xff]  }
 0x163   :  { %v6027_v52 = vadd.f32 %v6026_v24, %v6025_v25  ;;  %v6044_v55 = vpop.f32.mrf.mxu0  ;;  %3556 = vmatmul.mubr.bf16.vlgmr.msra.gmra.mxu0 %v7195_v42  ;;  %v3858_v25 = vld [vmem:[%s9657_s2 + $0x30] sm:$0xff] }
 0x164   :  { %v2520_v57 = vadd.f32 %v5963_v51, %v8354_v39  ;;  %v6108_v34 = vpop.f32.mrf.mxu1  ;;  %6501 = vmatmul.mubr.msk.bf16.vlgmr.msra.gmra.mxu1 %vm3498_vm1, %v7199_v46  ;;  %3563 = vmatprep.mubr.bf16.mxu0 %v7202_v47  ;;  %v3855_v39 = vld [vmem:[%s9657_s2 + $0x18] sm:$0xff] }
 0x165   :  { %v6045_v60 = vpop.f32.mrf.mxu0  ;;  %6504 = vmatprep.mubr.msk.bf16.mxu1 %vm3498_vm1, %v7206_v49  ;;  %3890 = vrot.lane.b32.xlu1 %v3855_v39, %s7380_s0 }
 0x166   :  { %v8557_v61 = vadd.f32 %v6027_v52, %v2520_v57  ;;  %v6046_v62 = vadd.f32 %v6045_v60, %v6044_v55  ;;  %v6109_v0 = vpop.f32.mrf.mxu1  ;;  %3896 = vrot.lane.b32.xlu0 %v3858_v25, %s7380_s0  ;;  %v3859_v57 = vld [vmem:[%s9657_s2 + $0x38] sm:$0xff] }
 0x167   :  { %v6110_v2 = vadd.f32 %v6109_v0, %v6108_v34  ;;  %v6047_v5 = vpop.f32.mrf.mxu0  ;;  %v7223_v0 = vld [vmem:[%s9656_s1 + $0xb0] ss:$12 sps:$4 sm:$0xff]  }
 0x168   :  { %v2655_v6 = vadd.f32 %v6046_v62, %v8380_v58  ;;  %v6111_v53 = vpop.f32.mrf.mxu1  ;;  %v7213_v62 = vld [vmem:[%s9656_s1 + $0x64] ss:$12 sps:$4 sm:$0xff]  }
 0x169   :  { %v6048_v4 = vpop.f32.mrf.mxu0  ;;  %3894 = vrot.lane.b32.xlu1 %v3857_v33, %s7380_s0  ;;  %v3862_v33 = vld [vmem:[%s9657_s2 + $0x50] sm:$0xff] }
 0x16a   :  { %v8576_v15 = vadd.f32 %v6110_v2, %v2655_v6  ;;  %v6049_v17 = vadd.f32 %v6048_v4, %v6047_v5  ;;  %v6112_v58 = vpop.f32.mrf.mxu1 }
 0x16b   :  { %v6050_v18 = vpop.f32.mrf.mxu0  ;;  %3564 = vmatmul.mubr.bf16.gmra.mxu0 %v7200_v45  ;;  %v6113_v20 = vadd.f32 %v6112_v58, %v6111_v53 }
 0x16c   :  { %v2658_v54 = vadd.f32 %v6049_v17, %v8393_v8  ;;  %v6114_v23 = vpop.f32.mrf.mxu1  ;;  %3571 = vmatprep.mubr.bf16.mxu0 %v7205_v7  ;;  %6505 = vmatmul.mubr.msk.bf16.gmra.mxu1 %vm3498_vm1, %v7207_v10  ;;  %v7203_v8 = vld [vmem:[%s9656_s1 + $0x30] ss:$12 sps:$4 sm:$0xff]  }
 0x16d   :  { %v6051_v21 = vpop.f32.mrf.mxu0  ;;  %6508 = vmatprep.mubr.msk.bf16.mxu1 %vm3498_vm1, %v7214_v13  ;;  %3898 = vrot.lane.b32.xlu1 %v3859_v57, %s7380_s0 }
 0x16e   :  { %v8585_v28 = vadd.f32 %v6113_v20, %v2658_v54  ;;  %v6052_v30 = vadd.f32 %v6051_v21, %v6050_v18  ;;  %v6115_v1 = vpop.f32.mrf.mxu1  ;;  %v7211_v54 = vld [vmem:[%s9656_s1 + $0x60] ss:$12 sps:$4 sm:$0xff]   ;;  %v7218_v21 = vld [vmem:[%s9656_s1 + $0x7c] ss:$12 sps:$4 sm:$0xff]  }
 0x16f   :  { %v6116_v31 = vadd.f32 %v6115_v1, %v6114_v23  ;;  %v6053_v32 = vpop.f32.mrf.mxu0 }
 0x170   :  { %v2663_v19 = vadd.f32 %v6052_v30, %v8411_v26  ;;  %v6117_v35 = vpop.f32.mrf.mxu1 }
 0x171   :  { %v6054_v29 = vpop.f32.mrf.mxu0 }
 0x172   :  { %v8604_v42 = vadd.f32 %v6116_v31, %v2663_v19  ;;  %v6055_v11 = vadd.f32 %v6054_v29, %v6053_v32  ;;  %v6118_v26 = vpop.f32.mrf.mxu1 }
 0x173   :  { %v6056_v43 = vpop.f32.mrf.mxu0  ;;  %3572 = vmatmul.mubr.bf16.gmra.mxu0 %v7203_v8  ;;  %v6119_v47 = vadd.f32 %v6118_v26, %v6117_v35 }
 0x174   :  { %v2666_v46 = vadd.f32 %v6055_v11, %v8418_v36  ;;  %v6120_v12 = vpop.f32.mrf.mxu1  ;;  %3579 = vmatprep.mubr.bf16.mxu0 %v7210_v37  ;;  %6509 = vmatmul.mubr.msk.bf16.gmra.mxu1 %vm3498_vm1, %v7215_v38  ;;  %v7208_v36 = vld [vmem:[%s9656_s1 + $0x48] ss:$12 sps:$4 sm:$0xff]  }
 0x175   :  { %v6057_v49 = vpop.f32.mrf.mxu0  ;;  %6512 = vmatprep.mubr.msk.bf16.mxu1 %vm3498_vm1, %v7222_v41 }
 0x176   :  { %v8613_v51 = vadd.f32 %v6119_v47, %v2666_v46  ;;  %v6058_v24 = vadd.f32 %v6057_v49, %v6056_v43  ;;  %v6121_v52 = vpop.f32.mrf.mxu1  ;;  %v7216_v43 = vld [vmem:[%s9656_s1 + $0x78] ss:$12 sps:$4 sm:$0xff]   ;;  %v7221_v47 = vld [vmem:[%s9656_s1 + $0x94] ss:$12 sps:$4 sm:$0xff]  }
 0x177   :  { %v6122_v55 = vadd.f32 %v6121_v52, %v6120_v12  ;;  %v6059_v56 = vpop.f32.mrf.mxu0 }
 0x178   :  { %v2671_v34 = vadd.f32 %v6058_v24, %v8439_v44  ;;  %v6123_v60 = vpop.f32.mrf.mxu1  ;;  %v3860_v44 = vld [vmem:[%s9657_s2 + $0x40] sm:$0xff] }
 0x179   :  { %v6060_v2 = vpop.f32.mrf.mxu0  ;;  %3900 = vrot.lane.b32.xlu0 %v3860_v44, %s7380_s0 }
 0x17a   :  { %v8629_v5 = vadd.f32 %v6122_v55, %v2671_v34  ;;  %v6061_v45 = vadd.f32 %v6060_v2, %v6059_v56  ;;  %v6124_v39 = vpop.f32.mrf.mxu1  ;;  %v3864_v56 = vld [vmem:[%s9657_s2 + $0x60] sm:$0xff] }
 0x17b   :  { %v6062_v6 = vpop.f32.mrf.mxu0  ;;  %3580 = vmatmul.mubr.bf16.gmra.mxu0 %v7208_v36  ;;  %v6125_v7 = vadd.f32 %v6124_v39, %v6123_v60  ;;  %v7219_v39 = vld [vmem:[%s9656_s1 + $0x90] ss:$12 sps:$4 sm:$0xff]  }
 0x17c   :  { %v2674_v53 = vadd.f32 %v6061_v45, %v8449_v59  ;;  %v6126_v10 = vpop.f32.mrf.mxu1  ;;  %3587 = vmatprep.mubr.bf16.mxu0 %v7213_v62  ;;  %6513 = vmatmul.mubr.msk.bf16.gmra.mxu1 %vm3498_vm1, %v7223_v0  ;;  %v3861_v59 = vld [vmem:[%s9657_s2 + $0x48] sm:$0xff] }
 0x17d   :  { %v6063_v4 = vpop.f32.mrf.mxu0  ;;  %3902 = vrot.lane.b32.xlu1 %v3861_v59, %s7380_s0  ;;  %3904 = vrot.lane.b32.xlu0 %v3862_v33, %s7380_s0 }
 0x17e   :  { %v8637_v13 = vadd.f32 %v6125_v7, %v2674_v53  ;;  %v6064_v17 = vadd.f32 %v6063_v4, %v6062_v6  ;;  %v6127_v58 = vpop.f32.mrf.mxu1  ;;  %v7226_v53 = vld [vmem:[%s9656_s1 + $0xac] ss:$12 sps:$4 sm:$0xff]  }
 0x17f   :  { %v6128_v18 = vadd.f32 %v6127_v58, %v6126_v10  ;;  %v6065_v3 = vpop.f32.mrf.mxu0 }
 0x180   :  { %v2679_v20 = vadd.f32 %v6064_v17, %v8464_v16  ;;  %v6129_v23 = vpop.f32.mrf.mxu1 }
 0x181   :  { %v6066_v30 = vpop.f32.mrf.mxu0  ;;  %3908 = vrot.lane.b32.xlu0 %v3864_v56, %s7380_s0 }
 0x182   :  { %v8650_v1 = vadd.f32 %v6128_v18, %v2679_v20  ;;  %v6067_v31 = vadd.f32 %v6066_v30, %v6065_v3  ;;  %v6130_v32 = vpop.f32.mrf.mxu1  ;;  %v3866_v18 = vld [vmem:[%s9657_s2 + $0x70] sm:$0xff] }
 0x183   :  { %v6068_v8 = vpop.f32.mrf.mxu0  ;;  %3588 = vmatmul.mubr.bf16.gmra.mxu0 %v7211_v54  ;;  %v6131_v19 = vadd.f32 %v6130_v32, %v6129_v23  ;;  %v7224_v32 = vld [vmem:[%s9656_s1 + $0xa8] ss:$12 sps:$4 sm:$0xff]  }
 0x184   :  { %v2682_v16 = vadd.f32 %v6067_v31, %v8468_v27  ;;  %v6132_v35 = vpop.f32.mrf.mxu1  ;;  %3595 = vmatprep.mubr.bf16.mxu0 %v7218_v21  ;;  %v3863_v27 = vld [vmem:[%s9657_s2 + $0x58] sm:$0xff] }
 0x185   :  { %v6069_v37 = vpop.f32.mrf.mxu0  ;;  %3906 = vrot.lane.b32.xlu1 %v3863_v27, %s7380_s0  ;;  %3912 = vrot.lane.b32.xlu0 %v3866_v18, %s7380_s0 }
 0x186   :  { %v8657_v38 = vadd.f32 %v6131_v19, %v2682_v16  ;;  %v6070_v29 = vadd.f32 %v6069_v37, %v6068_v8  ;;  %v6133_v41 = vpop.f32.mrf.mxu1 }
 0x187   :  { %v6134_v11 = vadd.f32 %v6133_v41, %v6132_v35  ;;  %v6071_v26 = vpop.f32.mrf.mxu0 }
 0x188   :  { %v2687_v25 = vadd.f32 %v6070_v29, %v8483_v40  ;;  %v6135_v46 = vpop.f32.mrf.mxu1 }
 0x189   :  { %v6072_v12 = vpop.f32.mrf.mxu0 }
 0x18a   :  { %v8670_v49 = vadd.f32 %v6134_v11, %v2687_v25  ;;  %v6073_v24 = vadd.f32 %v6072_v12, %v6071_v26  ;;  %v6136_v52 = vpop.f32.mrf.mxu1 }
 0x18b   :  { %v6074_v55 = vpop.f32.mrf.mxu0  ;;  %3596 = vmatmul.mubr.bf16.gmra.mxu0 %v7216_v43  ;;  %v6137_v36 = vadd.f32 %v6136_v52, %v6135_v46 }
 0x18c   :  { %v2690_v40 = vadd.f32 %v6073_v24, %v8487_v48  ;;  %v6138_v57 = vpop.f32.mrf.mxu1  ;;  %3603 = vmatprep.mubr.bf16.mxu0 %v7221_v47  ;;  %v3865_v48 = vld [vmem:[%s9657_s2 + $0x68] sm:$0xff] }
 0x18d   :  { %v6075_v34 = vpop.f32.mrf.mxu0  ;;  %3910 = vrot.lane.b32.xlu1 %v3865_v48, %s7380_s0 }
 0x18e   :  { %v8677_v60 = vadd.f32 %v6137_v36, %v2690_v40  ;;  %v6076_v62 = vadd.f32 %v6075_v34, %v6074_v55  ;;  %v6139_v0 = vpop.f32.mrf.mxu1 }
 0x18f   :  { %v6140_v2 = vadd.f32 %v6139_v0, %v6138_v57  ;;  %v6077_v45 = vpop.f32.mrf.mxu0 }
 0x190   :  { %v2695_v6 = vadd.f32 %v6076_v62, %v8502_v63  ;;  %v6141_v44 = vpop.f32.mrf.mxu1 }
 0x191   :  { %v6078_v7 = vpop.f32.mrf.mxu0 }
 0x192   :  { %v8690_v10 = vadd.f32 %v6140_v2, %v2695_v6  ;;  %v6079_v4 = vadd.f32 %v6078_v7, %v6077_v45  ;;  %v6142_v17 = vpop.f32.mrf.mxu1 }
 0x193   :  { %v6080_v58 = vpop.f32.mrf.mxu0  ;;  %3604 = vmatmul.mubr.bf16.gmra.mxu0 %v7219_v39  ;;  %v6143_v3 = vadd.f32 %v6142_v17, %v6141_v44 }
 0x194   :  { %v2698_v63 = vadd.f32 %v6079_v4, %v8506_v9  ;;  %v6144_v54 = vpop.f32.mrf.mxu1  ;;  %3611 = vmatprep.mubr.bf16.mxu0 %v7226_v53  ;;  %v3867_v9 = vld [vmem:[%s9657_s2 + $0x78] sm:$0xff] }
 0x195   :  { %v6081_v59 = vpop.f32.mrf.mxu0  ;;  %3914 = vrot.lane.b32.xlu1 %v3867_v9, %s7380_s0 }
 0x196   :  { %v8697_v20 = vadd.f32 %v6143_v3, %v2698_v63  ;;  %v6082_v23 = vadd.f32 %v6081_v59, %v6080_v58  ;;  %v6145_v21 = vpop.f32.mrf.mxu1 }
 0x197   :  { %v6146_v30 = vadd.f32 %v6145_v21, %v6144_v54  ;;  %v6083_v31 = vpop.f32.mrf.mxu0 }
 0x198   :  { %v2703_v8 = vadd.f32 %v6082_v23, %v8521_v22  ;;  %v6147_v33 = vpop.f32.mrf.mxu1 }
 0x199   :  { %v6084_v16 = vpop.f32.mrf.mxu0 }
 0x19a   :  { %v8707_v19 = vadd.f32 %v6146_v30, %v2703_v8  ;;  %v6085_v35 = vadd.f32 %v6084_v16, %v6083_v31  ;;  %v6148_v37 = vpop.f32.mrf.mxu1 }
 0x19b   :  { %v6086_v29 = vpop.f32.mrf.mxu0  ;;  %3612 = vmatmul.mubr.bf16.gmra.mxu0 %v7224_v32  ;;  %v6149_v11 = vadd.f32 %v6148_v37, %v6147_v33 }
 0x19c   :  { %v2706_v41 = vadd.f32 %v6085_v35, %v8529_v14  ;;  %v6150_v26 = vpop.f32.mrf.mxu1 }
 0x19d   :  { %v6087_v43 = vpop.f32.mrf.mxu0 }
 0x19e   :  { %v8710_v27 = vadd.f32 %v6149_v11, %v2706_v41  ;;  %v6088_v25 = vadd.f32 %v6087_v43, %v6086_v29  ;;  %v6151_v46 = vpop.f32.mrf.mxu1 }
 0x19f   :  { %v6152_v22 = vadd.f32 %v6151_v46, %v6150_v26  ;;  %v6089_v47 = vpop.f32.mrf.mxu0 }
 0x1a0   :  { %v2711_v12 = vadd.f32 %v6088_v25, %v8548_v50  ;;  %v6153_v24 = vpop.f32.mrf.mxu1 }
 0x1a1   :  { %v6090_v52 = vpop.f32.mrf.mxu0 }
 0x1a2   :  { %v8713_v55 = vadd.f32 %v6152_v22, %v2711_v12  ;;  %v6091_v56 = vadd.f32 %v6090_v52, %v6089_v47  ;;  %v6154_v40 = vpop.f32.mrf.mxu1 }
 0x1a3   :  { %v6172_v36 = vpop.f32.mrf.mxu0  ;;  %v6155_v57 = vadd.f32 %v6154_v40, %v6153_v24 }
 0x1a4   :  { %v2714_v14 = vadd.f32 %v6091_v56, %v8557_v61  ;;  %v6236_v34 = vpop.f32.mrf.mxu1 }
 0x1a5   :  { %v6173_v62 = vpop.f32.mrf.mxu0 }
 0x1a6   :  { %v8716_v0 = vadd.f32 %v6155_v57, %v2714_v14  ;;  %v6174_v2 = vadd.f32 %v6173_v62, %v6172_v36  ;;  %v6237_v45 = vpop.f32.mrf.mxu1 }
 0x1a7   :  { %v6238_v39 = vadd.f32 %v6237_v45, %v6236_v34  ;;  %v6175_v48 = vpop.f32.mrf.mxu0 }
 0x1a8   :  { %v2849_v50 = vadd.f32 %v6174_v2, %v8576_v15  ;;  %v6239_v6 = vpop.f32.mrf.mxu1 }
 0x1a9   :  { %v6176_v44 = vpop.f32.mrf.mxu0 }
 0x1aa   :  { %v8719_v53 = vadd.f32 %v6238_v39, %v2849_v50  ;;  %v6177_v7 = vadd.f32 %v6176_v44, %v6175_v48  ;;  %v6240_v4 = vpop.f32.mrf.mxu1 }
 0x1ab   :  { %v6241_v17 = vadd.f32 %v6240_v4, %v6239_v6  ;;  %v6178_v58 = vpop.f32.mrf.mxu0 }
 0x1ac   :  { %v2852_v61 = vadd.f32 %v6177_v7, %v8585_v28  ;;  %v6242_v18 = vpop.f32.mrf.mxu1 }
 0x1ad   :  { %v6179_v63 = vpop.f32.mrf.mxu0 }
 0x1ae   :  { %v8722_v3 = vadd.f32 %v6241_v17, %v2852_v61  ;;  %v6180_v54 = vadd.f32 %v6179_v63, %v6178_v58  ;;  %v6243_v59 = vpop.f32.mrf.mxu1 }
 0x1af   :  { %v6244_v23 = vadd.f32 %v6243_v59, %v6242_v18  ;;  %v6181_v21 = vpop.f32.mrf.mxu0 }
 0x1b0   :  { %v2857_v15 = vadd.f32 %v6180_v54, %v8604_v42  ;;  %v6245_v30 = vpop.f32.mrf.mxu1 }
 0x1b1   :  { %v6182_v31 = vpop.f32.mrf.mxu0 }
 0x1b2   :  { %v8725_v32 = vadd.f32 %v6244_v23, %v2857_v15  ;;  %v6183_v9 = vadd.f32 %v6182_v31, %v6181_v21  ;;  %v6246_v8 = vpop.f32.mrf.mxu1 }
 0x1b3   :  { %v6247_v33 = vadd.f32 %v6246_v8, %v6245_v30  ;;  %v6184_v16 = vpop.f32.mrf.mxu0 }
 0x1b4   :  { %v2860_v28 = vadd.f32 %v6183_v9, %v8613_v51  ;;  %v6248_v35 = vpop.f32.mrf.mxu1 }
 0x1b5   :  { %v6185_v37 = vpop.f32.mrf.mxu0 }
 0x1b6   :  { %v8728_v29 = vadd.f32 %v6247_v33, %v2860_v28  ;;  %v6186_v41 = vadd.f32 %v6185_v37, %v6184_v16  ;;  %v6249_v11 = vpop.f32.mrf.mxu1 }
 0x1b7   :  { %v6250_v26 = vadd.f32 %v6249_v11, %v6248_v35  ;;  %v6187_v43 = vpop.f32.mrf.mxu0 }
 0x1b8   :  { %v2865_v42 = vadd.f32 %v6186_v41, %v8629_v5  ;;  %v6251_v25 = vpop.f32.mrf.mxu1 }
 0x1b9   :  { %v6188_v46 = vpop.f32.mrf.mxu0 }
 0x1ba   :  { %v8731_v22 = vadd.f32 %v6250_v26, %v2865_v42  ;;  %v6189_v47 = vadd.f32 %v6188_v46, %v6187_v43  ;;  %v6252_v12 = vpop.f32.mrf.mxu1 }
 0x1bb   :  { %v6253_v24 = vadd.f32 %v6252_v12, %v6251_v25  ;;  %v6190_v52 = vpop.f32.mrf.mxu0 }
 0x1bc   :  { %v2868_v51 = vadd.f32 %v6189_v47, %v8637_v13  ;;  %v6254_v56 = vpop.f32.mrf.mxu1 }
 0x1bd   :  { %v6191_v40 = vpop.f32.mrf.mxu0 }
 0x1be   :  { %v8734_v36 = vadd.f32 %v6253_v24, %v2868_v51  ;;  %v6192_v14 = vadd.f32 %v6191_v40, %v6190_v52  ;;  %v6255_v57 = vpop.f32.mrf.mxu1 }
 0x1bf   :  { %v6256_v34 = vadd.f32 %v6255_v57, %v6254_v56  ;;  %v6193_v62 = vpop.f32.mrf.mxu0 }
 0x1c0   :  { %v2873_v5 = vadd.f32 %v6192_v14, %v8650_v1  ;;  %v6257_v2 = vpop.f32.mrf.mxu1 }
 0x1c1   :  { %v6194_v45 = vpop.f32.mrf.mxu0 }
 0x1c2   :  { %v8737_v39 = vadd.f32 %v6256_v34, %v2873_v5  ;;  %v6195_v48 = vadd.f32 %v6194_v45, %v6193_v62  ;;  %v6258_v50 = vpop.f32.mrf.mxu1 }
 0x1c3   :  { %v6259_v6 = vadd.f32 %v6258_v50, %v6257_v2  ;;  %v6196_v44 = vpop.f32.mrf.mxu0 }
 0x1c4   :  { %v2876_v13 = vadd.f32 %v6195_v48, %v8657_v38  ;;  %v6260_v7 = vpop.f32.mrf.mxu1 }
 0x1c5   :  { %v6197_v4 = vpop.f32.mrf.mxu0 }
 0x1c6   :  { %v8740_v17 = vadd.f32 %v6259_v6, %v2876_v13  ;;  %v6198_v58 = vadd.f32 %v6197_v4, %v6196_v44  ;;  %v6261_v61 = vpop.f32.mrf.mxu1 }
 0x1c7   :  { %v6262_v18 = vadd.f32 %v6261_v61, %v6260_v7  ;;  %v6199_v63 = vpop.f32.mrf.mxu0 }
 0x1c8   :  { %v2881_v1 = vadd.f32 %v6198_v58, %v8670_v49  ;;  %v6263_v54 = vpop.f32.mrf.mxu1 }
 0x1c9   :  { %v6200_v59 = vpop.f32.mrf.mxu0 }
 0x1ca   :  { %v8743_v23 = vadd.f32 %v6262_v18, %v2881_v1  ;;  %v6201_v21 = vadd.f32 %v6200_v59, %v6199_v63  ;;  %v6264_v15 = vpop.f32.mrf.mxu1 }
 0x1cb   :  { %v6265_v30 = vadd.f32 %v6264_v15, %v6263_v54  ;;  %v6202_v31 = vpop.f32.mrf.mxu0 }
 0x1cc   :  { %v2884_v38 = vadd.f32 %v6201_v21, %v8677_v60  ;;  %v6266_v9 = vpop.f32.mrf.mxu1 }
 0x1cd   :  { %v6203_v8 = vpop.f32.mrf.mxu0 }
 0x1ce   :  { %v8746_v33 = vadd.f32 %v6265_v30, %v2884_v38  ;;  %v6204_v16 = vadd.f32 %v6203_v8, %v6202_v31  ;;  %v6267_v28 = vpop.f32.mrf.mxu1 }
 0x1cf   :  { %v6268_v35 = vadd.f32 %v6267_v28, %v6266_v9  ;;  %v6205_v37 = vpop.f32.mrf.mxu0 }
 0x1d0   :  { %v2889_v49 = vadd.f32 %v6204_v16, %v8690_v10  ;;  %v6269_v41 = vpop.f32.mrf.mxu1 }
 0x1d1   :  { %v6206_v11 = vpop.f32.mrf.mxu0 }
 0x1d2   :  { %v8749_v26 = vadd.f32 %v6268_v35, %v2889_v49  ;;  %v6207_v43 = vadd.f32 %v6206_v11, %v6205_v37  ;;  %v6270_v42 = vpop.f32.mrf.mxu1 }
 0x1d3   :  { %v6271_v25 = vadd.f32 %v6270_v42, %v6269_v41  ;;  %v6208_v46 = vpop.f32.mrf.mxu0 }
 0x1d4   :  { %v2892_v60 = vadd.f32 %v6207_v43, %v8697_v20  ;;  %v6272_v47 = vpop.f32.mrf.mxu1 }
 0x1d5   :  { %v6209_v12 = vpop.f32.mrf.mxu0 }
 0x1d6   :  { %v8752_v24 = vadd.f32 %v6271_v25, %v2892_v60  ;;  %v6210_v52 = vadd.f32 %v6209_v12, %v6208_v46  ;;  %v6273_v51 = vpop.f32.mrf.mxu1 }
 0x1d7   :  { %v6274_v56 = vadd.f32 %v6273_v51, %v6272_v47  ;;  %v6211_v40 = vpop.f32.mrf.mxu0 }
 0x1d8   :  { %v2897_v10 = vadd.f32 %v6210_v52, %v8707_v19  ;;  %v6275_v14 = vpop.f32.mrf.mxu1 }
 0x1d9   :  { %v6212_v57 = vpop.f32.mrf.mxu0 }
 0x1da   :  { %v8755_v34 = vadd.f32 %v6274_v56, %v2897_v10  ;;  %v6213_v62 = vadd.f32 %v6212_v57, %v6211_v40  ;;  %v6276_v5 = vpop.f32.mrf.mxu1 }
 0x1db   :  { %v6277_v2 = vadd.f32 %v6276_v5, %v6275_v14  ;;  %v6214_v45 = vpop.f32.mrf.mxu0 }
 0x1dc   :  { %v2900_v20 = vadd.f32 %v6213_v62, %v8710_v27  ;;  %v6278_v48 = vpop.f32.mrf.mxu1 }
 0x1dd   :  { %v6215_v50 = vpop.f32.mrf.mxu0 }
 0x1de   :  { %v8758_v6 = vadd.f32 %v6277_v2, %v2900_v20  ;;  %v6216_v44 = vadd.f32 %v6215_v50, %v6214_v45  ;;  %v6279_v13 = vpop.f32.mrf.mxu1 }
 0x1df   :  { %v6280_v7 = vadd.f32 %v6279_v13, %v6278_v48  ;;  %v6217_v4 = vpop.f32.mrf.mxu0 }
 0x1e0   :  { %v2905_v19 = vadd.f32 %v6216_v44, %v8713_v55  ;;  %v6281_v58 = vpop.f32.mrf.mxu1 }
 0x1e1   :  { %v6218_v61 = vpop.f32.mrf.mxu0 }
 0x1e2   :  { %v8761_v18 = vadd.f32 %v6280_v7, %v2905_v19  ;;  %v6219_v63 = vadd.f32 %v6218_v61, %v6217_v4  ;;  %v6282_v1 = vpop.f32.mrf.mxu1 }
 0x1e3   :  { %v6283_v54 = vadd.f32 %v6282_v1, %v6281_v58  ;;  %v6300_v59 = vpop.f32.mrf.mxu0 }
 0x1e4   :  { %v2908_v27 = vadd.f32 %v6219_v63, %v8716_v0  ;;  %v3139_v21 = vpop.f32.mrf.mxu1 }
 0x1e5   :  { %v6301_v15 = vpop.f32.mrf.mxu0 }
 0x1e6   :  { %v8764_v30 = vadd.f32 %v6283_v54, %v2908_v27  ;;  %v6302_v31 = vadd.f32 %v6301_v15, %v6300_v59  ;;  %v3141_v38 = vpop.f32.mrf.mxu1 }
 0x1e7   :  { %v6303_v9 = vpop.f32.mrf.mxu0 }
 0x1e8   :  { %v3043_v8 = vadd.f32 %v6302_v31, %v8719_v53  ;;  %v3142_v55 = vpop.f32.mrf.mxu1 }
 0x1e9   :  { %v6304_v16 = vpop.f32.mrf.mxu0 }
 0x1ea   :  { %v6305_v28 = vadd.f32 %v6304_v16, %v6303_v9  ;;  %v3144_v35 = vpop.f32.mrf.mxu1  ;;  %v8767_v37 = vadd.f32 %v3139_v21, %v3043_v8 }
 0x1eb   :  { %v6306_v49 = vpop.f32.mrf.mxu0 }
 0x1ec   :  { %v3046_v41 = vadd.f32 %v6305_v28, %v8722_v3  ;;  %v3147_v11 = vpop.f32.mrf.mxu1 }
 0x1ed   :  { %v6307_v0 = vpop.f32.mrf.mxu0 }
 0x1ee   :  { %v6308_v43 = vadd.f32 %v6307_v0, %v6306_v49  ;;  %v3149_v42 = vpop.f32.mrf.mxu1  ;;  %v8770_v25 = vadd.f32 %v3142_v55, %v3046_v41 }
 0x1ef   :  { %v6309_v46 = vpop.f32.mrf.mxu0 }
 0x1f0   :  { %v3051_v60 = vadd.f32 %v6308_v43, %v8725_v32  ;;  %v3150_v47 = vpop.f32.mrf.mxu1 }
 0x1f1   :  { %v6310_v53 = vpop.f32.mrf.mxu0 }
 0x1f2   :  { %v8773_v12 = vadd.f32 %v3147_v11, %v3051_v60  ;;  %v6311_v52 = vadd.f32 %v6310_v53, %v6309_v46  ;;  %v3152_v51 = vpop.f32.mrf.mxu1 }
 0x1f3   :  { %v6312_v56 = vpop.f32.mrf.mxu0 }
 0x1f4   :  { %v3054_v40 = vadd.f32 %v6311_v52, %v8728_v29  ;;  %v3155_v10 = vpop.f32.mrf.mxu1 }
 0x1f5   :  { %v6313_v3 = vpop.f32.mrf.mxu0 }
 0x1f6   :  { %v8776_v14 = vadd.f32 %v3150_v47, %v3054_v40  ;;  %v6314_v57 = vadd.f32 %v6313_v3, %v6312_v56  ;;  %v3157_v62 = vpop.f32.mrf.mxu1  ;;  %v7381_v47 = vmov 0.0  }
 0x1f7   :  { %v6315_v5 = vpop.f32.mrf.mxu0  ;;  %3951 = vst.msk [vmem:[#allocation2 + $0x10] sm:$0xff] %vm3498_vm1, %v7381_v47  ;;  %3948 = vst.msk [vmem:[#allocation2] sm:$0xff] %vm3498_vm1, %v7381_v47 }
 0x1f8   :  { %v3059_v2 = vadd.f32 %v6314_v57, %v8731_v22  ;;  %v3158_v45 = vpop.f32.mrf.mxu1  ;;  %3952 = vst.msk [vmem:[#allocation2 + $0x18] sm:$0x3] %vm3949_vm2, %v7381_v47  ;;  %3950 = vst.msk [vmem:[#allocation2 + $0x8] sm:$0x3] %vm3949_vm2, %v7381_v47 }
 0x1f9   :  { %v6316_v32 = vpop.f32.mrf.mxu0  ;;  %3953 = vst.msk [vmem:[#allocation2 + $0x20] sm:$0xff] %vm3498_vm1, %v7381_v47  ;;  %3955 = vst.msk [vmem:[#allocation2 + $0x30] sm:$0xff] %vm3498_vm1, %v7381_v47 }
 0x1fa   :  { %v6317_v20 = vadd.f32 %v6316_v32, %v6315_v5  ;;  %v3160_v48 = vpop.f32.mrf.mxu1  ;;  %v8779_v50 = vadd.f32 %v3155_v10, %v3059_v2  ;;  %3954 = vst.msk [vmem:[#allocation2 + $0x28] sm:$0x3] %vm3949_vm2, %v7381_v47  ;;  %3956 = vst.msk [vmem:[#allocation2 + $0x38] sm:$0x3] %vm3949_vm2, %v7381_v47 }
 0x1fb   :  { %v6318_v44 = vpop.f32.mrf.mxu0  ;;  %3957 = vst.msk [vmem:[#allocation2 + $0x40] sm:$0xff] %vm3498_vm1, %v7381_v47  ;;  %3959 = vst.msk [vmem:[#allocation2 + $0x50] sm:$0xff] %vm3498_vm1, %v7381_v47 }
 0x1fc   :  { %v3062_v13 = vadd.f32 %v6317_v20, %v8734_v36  ;;  %v3163_v7 = vpop.f32.mrf.mxu1  ;;  %3958 = vst.msk [vmem:[#allocation2 + $0x48] sm:$0x3] %vm3949_vm2, %v7381_v47  ;;  %3960 = vst.msk [vmem:[#allocation2 + $0x58] sm:$0x3] %vm3949_vm2, %v7381_v47 }
 0x1fd   :  { %v6319_v29 = vpop.f32.mrf.mxu0  ;;  %3961 = vst.msk [vmem:[#allocation2 + $0x60] sm:$0xff] %vm3498_vm1, %v7381_v47  ;;  %3963 = vst.msk [vmem:[#allocation2 + $0x70] sm:$0xff] %vm3498_vm1, %v7381_v47 }
 0x1fe   :  { %v6320_v4 = vadd.f32 %v6319_v29, %v6318_v44  ;;  %v3165_v19 = vpop.f32.mrf.mxu1  ;;  %v8782_v58 = vadd.f32 %v3158_v45, %v3062_v13  ;;  %3962 = vst.msk [vmem:[#allocation2 + $0x68] sm:$0x3] %vm3949_vm2, %v7381_v47  ;;  %3964 = vst.msk [vmem:[#allocation2 + $0x78] sm:$0x3] %vm3949_vm2, %v7381_v47 }
 0x1ff   :  { %v6321_v61 = vpop.f32.mrf.mxu0  ;;  %3965 = vst.msk [vmem:[#allocation2 + $0x80] sm:$0xff] %vm3498_vm1, %v7381_v47  ;;  %3967 = vst.msk [vmem:[#allocation2 + $0x90] sm:$0xff] %vm3498_vm1, %v7381_v47 }
 0x200   :  { %v3067_v63 = vadd.f32 %v6320_v4, %v8737_v39  ;;  %v3166_v1 = vpop.f32.mrf.mxu1  ;;  %3966 = vst.msk [vmem:[#allocation2 + $0x88] sm:$0x3] %vm3949_vm2, %v7381_v47  ;;  %3968 = vst.msk [vmem:[#allocation2 + $0x98] sm:$0x3] %vm3949_vm2, %v7381_v47 }
 0x201   :  { %v6322_v22 = vpop.f32.mrf.mxu0  ;;  %3969 = vst.msk [vmem:[#allocation2 + $0xa0] sm:$0xff] %vm3498_vm1, %v7381_v47  ;;  %3971 = vst.msk [vmem:[#allocation2 + $0xb0] sm:$0xff] %vm3498_vm1, %v7381_v47 }
 0x202   :  { %v8785_v54 = vadd.f32 %v3163_v7, %v3067_v63  ;;  %v6323_v59 = vadd.f32 %v6322_v22, %v6321_v61  ;;  %v3168_v27 = vpop.f32.mrf.mxu1  ;;  %3970 = vst.msk [vmem:[#allocation2 + $0xa8] sm:$0x3] %vm3949_vm2, %v7381_v47  ;;  %3972 = vst.msk [vmem:[#allocation2 + $0xb8] sm:$0x3] %vm3949_vm2, %v7381_v47 }
 0x203   :  { %v6324_v21 = vpop.f32.mrf.mxu0  ;;  %3973 = vst.msk [vmem:[#allocation2 + $0xc0] sm:$0xff] %vm3498_vm1, %v7381_v47  ;;  %3975 = vst.msk [vmem:[#allocation2 + $0xd0] sm:$0xff] %vm3498_vm1, %v7381_v47 }
 0x204   :  { %v3070_v15 = vadd.f32 %v6323_v59, %v8740_v17  ;;  %v3171_v31 = vpop.f32.mrf.mxu1  ;;  %3974 = vst.msk [vmem:[#allocation2 + $0xc8] sm:$0x3] %vm3949_vm2, %v7381_v47  ;;  %3976 = vst.msk [vmem:[#allocation2 + $0xd8] sm:$0x3] %vm3949_vm2, %v7381_v47 }
 0x205   :  { %v6325_v36 = vpop.f32.mrf.mxu0  ;;  %3977 = vst.msk [vmem:[#allocation2 + $0xe0] sm:$0xff] %vm3498_vm1, %v7381_v47  ;;  %3979 = vst.msk [vmem:[#allocation2 + $0xf0] sm:$0xff] %vm3498_vm1, %v7381_v47 }
 0x206   :  { %v8788_v38 = vadd.f32 %v3166_v1, %v3070_v15  ;;  %v6326_v9 = vadd.f32 %v6325_v36, %v6324_v21  ;;  %v3173_v8 = vpop.f32.mrf.mxu1  ;;  %3978 = vst.msk [vmem:[#allocation2 + $0xe8] sm:$0x3] %vm3949_vm2, %v7381_v47  ;;  %3980 = vst.msk [vmem:[#allocation2 + $0xf8] sm:$0x3] %vm3949_vm2, %v7381_v47 }
 0x207   :  { %v6327_v55 = vpop.f32.mrf.mxu0  ;;  %3981 = vst.msk [vmem:[#allocation2 + $0x100] sm:$0xff] %vm3498_vm1, %v7381_v47  ;;  %3983 = vst.msk [vmem:[#allocation2 + $0x110] sm:$0xff] %vm3498_vm1, %v7381_v47 }
 0x208   :  { %v3075_v16 = vadd.f32 %v6326_v9, %v8743_v23  ;;  %v3174_v28 = vpop.f32.mrf.mxu1  ;;  %3982 = vst.msk [vmem:[#allocation2 + $0x108] sm:$0x3] %vm3949_vm2, %v7381_v47  ;;  %3984 = vst.msk [vmem:[#allocation2 + $0x118] sm:$0x3] %vm3949_vm2, %v7381_v47 }
 0x209   :  { %v6328_v39 = vpop.f32.mrf.mxu0  ;;  %3985 = vst.msk [vmem:[#allocation2 + $0x120] sm:$0xff] %vm3498_vm1, %v7381_v47  ;;  %3987 = vst.msk [vmem:[#allocation2 + $0x130] sm:$0xff] %vm3498_vm1, %v7381_v47 }
 0x20a   :  { %v6329_v35 = vadd.f32 %v6328_v39, %v6327_v55  ;;  %v3176_v49 = vpop.f32.mrf.mxu1  ;;  %v8791_v41 = vadd.f32 %v3171_v31, %v3075_v16  ;;  %3986 = vst.msk [vmem:[#allocation2 + $0x128] sm:$0x3] %vm3949_vm2, %v7381_v47  ;;  %3988 = vst.msk [vmem:[#allocation2 + $0x138] sm:$0x3] %vm3949_vm2, %v7381_v47 }
 0x20b   :  { %v6330_v11 = vpop.f32.mrf.mxu0 }
 0x20c   :  { %9704 = vst [vmem:[#allocation6_spill] sm:$0xff] %v8791_v41  ;;  %v3078_v0 = vadd.f32 %v6329_v35, %v8746_v33  ;;  %v3179_v43 = vpop.f32.mrf.mxu1 }
 0x20d   :  { %v6331_v17 = vpop.f32.mrf.mxu0 }
 0x20e   :  { %v6332_v42 = vadd.f32 %v6331_v17, %v6330_v11  ;;  %v3181_v46 = vpop.f32.mrf.mxu1  ;;  %v8794_v60 = vadd.f32 %v3174_v28, %v3078_v0 }
 0x20f   :  { %v6333_v23 = vpop.f32.mrf.mxu0 }
 0x210   :  { %9705 = vst [vmem:[#allocation7_spill] sm:$0xff] %v8794_v60  ;;  %v3083_v33 = vadd.f32 %v6332_v42, %v8749_v26  ;;  %v3182_v53 = vpop.f32.mrf.mxu1 }
 0x211   :  { %v6334_v52 = vpop.f32.mrf.mxu0 }
 0x212   :  { %v8837_v51 = vadd.f32 %v3179_v43, %v3083_v33  ;;  %v6335_v56 = vadd.f32 %v6334_v52, %v6333_v23  ;;  %v3184_v40 = vpop.f32.mrf.mxu1 }
 0x213   :  { %v6336_v10 = vpop.f32.mrf.mxu0 }
 0x214   :  { %9706 = vst [vmem:[#allocation8_spill] sm:$0xff] %v8837_v51  ;;  %v3086_v3 = vadd.f32 %v6335_v56, %v8752_v24  ;;  %v3187_v57 = vpop.f32.mrf.mxu1 }
 0x215   :  { %v6337_v62 = vpop.f32.mrf.mxu0 }
 0x216   :  { %v8840_v5 = vadd.f32 %v3182_v53, %v3086_v3  ;;  %v6338_v2 = vadd.f32 %v6337_v62, %v6336_v10  ;;  %v3189_v45 = vpop.f32.mrf.mxu1 }
 0x217   :  { %v6339_v32 = vpop.f32.mrf.mxu0 }
 0x218   :  { %9707 = vst [vmem:[#allocation9_spill] sm:$0xff] %v8840_v5  ;;  %v3091_v20 = vadd.f32 %v6338_v2, %v8755_v34  ;;  %v3190_v48 = vpop.f32.mrf.mxu1 }
 0x219   :  { %v6340_v26 = vpop.f32.mrf.mxu0 }
 0x21a   :  { %v6341_v44 = vadd.f32 %v6340_v26, %v6339_v32  ;;  %v3192_v13 = vpop.f32.mrf.mxu1  ;;  %v8843_v7 = vadd.f32 %v3187_v57, %v3091_v20 }
 0x21b   :  { %v6342_v29 = vpop.f32.mrf.mxu0 }
 0x21c   :  { %9708 = vst [vmem:[#allocation10_spill] sm:$0xff] %v8843_v7  ;;  %v3094_v4 = vadd.f32 %v6341_v44, %v8758_v6  ;;  %v3195_v19 = vpop.f32.mrf.mxu1 }
 0x21d   :  { %v6343_v24 = vpop.f32.mrf.mxu0 }
 0x21e   :  { %v6344_v61 = vadd.f32 %v6343_v24, %v6342_v29  ;;  %v3197_v63 = vpop.f32.mrf.mxu1  ;;  %v8846_v1 = vadd.f32 %v3190_v48, %v3094_v4 }
 0x21f   :  { %v6345_v22 = vpop.f32.mrf.mxu0 }
 0x220   :  { %9709 = vst [vmem:[#allocation11_spill] sm:$0xff] %v8846_v1  ;;  %v3099_v59 = vadd.f32 %v6344_v61, %v8761_v18  ;;  %v3198_v27 = vpop.f32.mrf.mxu1  ;;  %v8857_v18 = vld [vmem:[%s9661_s6] ss:$0 sm:$0xff]  ;;  %s7382_s6 = smov 96  }
 0x221   :  { %v6346_v34 = vpop.f32.mrf.mxu0 }
 0x222   :  { %v8849_v21 = vadd.f32 %v3195_v19, %v3099_v59  ;;  %v6347_v15 = vadd.f32 %v6346_v34, %v6345_v22  ;;  %v3200_v31 = vpop.f32.mrf.mxu1 }
 0x223   :  { %v6364_v36 = vpop.f32.mrf.mxu0 }
 0x224   :  { %9710 = vst [vmem:[#allocation12_spill] sm:$0xff] %v8849_v21  ;;  %v3102_v9 = vadd.f32 %v6347_v15, %v8764_v30  ;;  %v6502_v8 = vpop.f32.mrf.mxu1 }
 0x225   :  { %v6365_v6 = vpop.f32.mrf.mxu0 }
 0x226   :  { %v8852_v55 = vadd.f32 %v3198_v27, %v3102_v9  ;;  %v6366_v16 = vadd.f32 %v6365_v6, %v6364_v36  ;;  %v3654_v28 = vpop.f32.mrf.mxu1 }
 0x227   :  { %v6367_v39 = vpop.f32.mrf.mxu0 }
 0x228   :  { %9711 = vst [vmem:[#allocation13_spill] sm:$0xff] %v8852_v55  ;;  %v3655_v35 = vadd.f32 %v6366_v16, %v3654_v28  ;;  %v6503_v49 = vpop.f32.mrf.mxu1 }
 0x229   :  { %v6368_v11 = vpop.f32.mrf.mxu0 }
 0x22a   :  { %v3717_v0 = vadd.f32 %v3655_v35, %v8767_v37  ;;  %v6369_v43 = vadd.f32 %v6368_v11, %v6367_v39  ;;  %v3657_v17 = vpop.f32.mrf.mxu1 }
 0x22b   :  { %v6370_v30 = vpop.f32.mrf.mxu0 }
 0x22c   :  { %v3740_v42 = vadd.f32 %v8857_v18, %v3717_v0  ;;  %v3658_v46 = vadd.f32 %v6369_v43, %v3657_v17  ;;  %v6506_v23 = vpop.f32.mrf.mxu1 }
 0x22d   :  { %v6371_v47 = vpop.f32.mrf.mxu0 }
 0x22e   :  { %v5729_v33 = vmul.f32 -1.442695, %v3740_v42  ;;  %v3718_v53 = vadd.f32 %v3658_v46, %v8770_v25  ;;  %v6372_v52 = vadd.f32 %v6371_v47, %v6370_v30  ;;  %v3670_v57 = vpop.f32.mrf.mxu1 }
 0x22f   :  { %v6373_v56 = vpop.f32.mrf.mxu0 }
 0x230   :  { %7245 = vpow2.f32 %v5729_v33  ;;  %v3741_v40 = vadd.f32 %v8857_v18, %v3718_v53  ;;  %v3663_v10 = vadd.f32 %v6502_v8, %v6372_v52  ;;  %v6507_v44 = vpop.f32.mrf.mxu1 }
 0x231   :  { %v6374_v3 = vpop.f32.mrf.mxu0 }
 0x232   :  { %v5730_v62 = vmul.f32 -1.442695, %v3741_v40  ;;  %v3719_v2 = vadd.f32 %v3663_v10, %v8773_v12  ;;  %v6375_v45 = vadd.f32 %v6374_v3, %v6373_v56  ;;  %v3673_v22 = vpop.f32.mrf.mxu1 }
 0x233   :  { %v6376_v32 = vpop.f32.mrf.mxu0 }
 0x234   :  { %7247 = vpow2.f32 %v5730_v62  ;;  %v3742_v20 = vadd.f32 %v8857_v18, %v3719_v2  ;;  %v3666_v48 = vadd.f32 %v6503_v49, %v6375_v45  ;;  %v6510_v6 = vpop.f32.mrf.mxu1 }
 0x235   :  { %v6377_v26 = vpop.f32.mrf.mxu0 }
 0x236   :  { %v5731_v13 = vmul.f32 -1.442695, %v3742_v20  ;;  %v3720_v29 = vadd.f32 %v3666_v48, %v8776_v14  ;;  %v6378_v4 = vadd.f32 %v6377_v26, %v6376_v32  ;;  %v3686_v30 = vpop.f32.mrf.mxu1  ;;  %v3885_v48 = vpop.permute.xlu0 %3884 }
 0x237   :  { %v6379_v19 = vpop.f32.mrf.mxu0 }
 0x238   :  { %7249 = vpow2.f32 %v5731_v13  ;;  %v3743_v24 = vadd.f32 %v8857_v18, %v3720_v29  ;;  %v3671_v61 = vadd.f32 %v6378_v4, %v3670_v57  ;;  %v6511_v3 = vpop.f32.mrf.mxu1 }
 0x239   :  { %v6380_v63 = vpop.f32.mrf.mxu0 }
 0x23a   :  { %v5732_v59 = vmul.f32 -1.442695, %v3743_v24  ;;  %v3721_v27 = vadd.f32 %v3671_v61, %v8779_v50  ;;  %v6381_v34 = vadd.f32 %v6380_v63, %v6379_v19  ;;  %v3689_v29 = vpop.f32.mrf.mxu1 }
 0x23b   :  { %v6382_v15 = vpop.f32.mrf.mxu0 }
 0x23c   :  { %7251 = vpow2.f32 %v5732_v59  ;;  %v3744_v31 = vadd.f32 %v8857_v18, %v3721_v27  ;;  %v3674_v36 = vadd.f32 %v6381_v34, %v3673_v22  ;;  %v8879_v34 = vpop.f32.mrf.mxu1 }
 0x23d   :  { %v7246_v9 = vpop.eup %7245  ;;  %v6383_v8 = vpop.f32.mrf.mxu0 }
 0x23e   :  { %v3804_v16 = vadd.f32 1.0, %v7246_v9  ;;  %v5733_v28 = vmul.f32 -1.442695, %v3744_v31  ;;  %v3722_v39 = vadd.f32 %v3674_v36, %v8782_v58  ;;  %v6384_v35 = vadd.f32 %v6383_v8, %v6382_v15 }
 0x23f   :  { %v6385_v49 = vpop.f32.mrf.mxu0 }
 0x240   :  { %7253 = vrcp.f32 %v3804_v16  ;;  %v3745_v11 = vadd.f32 %v8857_v18, %v3722_v39  ;;  %v3679_v0 = vadd.f32 %v6506_v23, %v6384_v35  ;;  %v3887_v39 = vpop.permute.xlu0 %3886 }
 0x241   :  { %v7248_v43 = vpop.eup %7247  ;;  %7255 = vpow2.f32 %v5733_v28  ;;  %v6386_v17 = vpop.f32.mrf.mxu0 }
 0x242   :  { %v3805_v42 = vadd.f32 1.0, %v7248_v43  ;;  %v5734_v46 = vmul.f32 -1.442695, %v3745_v11  ;;  %v3723_v47 = vadd.f32 %v3679_v0, %v8785_v54  ;;  %v6387_v33 = vadd.f32 %v6386_v17, %v6385_v49  ;;  %v3889_v11 = vpop.permute.xlu1 %3888  ;;  %v3702_v17 = vpop.f32.mrf.mxu1 }
 0x243   :  { %v6388_v53 = vpop.f32.mrf.mxu0 }
 0x244   :  { %7257 = vrcp.f32 %v3805_v42  ;;  %v3746_v52 = vadd.f32 %v8857_v18, %v3723_v47  ;;  %v3682_v56 = vadd.f32 %v6507_v44, %v6387_v33 }
 0x245   :  { %v7250_v40 = vpop.eup %7249  ;;  %7259 = vpow2.f32 %v5734_v46  ;;  %v6389_v10 = vpop.f32.mrf.mxu0 }
 0x246   :  { %v3806_v57 = vadd.f32 1.0, %v7250_v40  ;;  %v5735_v23 = vmul.f32 -1.442695, %v3746_v52  ;;  %v3724_v62 = vadd.f32 %v3682_v56, %v8788_v38  ;;  %v6390_v2 = vadd.f32 %v6389_v10, %v6388_v53 }
 0x247   :  { %v6391_v45 = vpop.f32.mrf.mxu0 }
 0x248   :  { %7261 = vrcp.f32 %v3806_v57  ;;  %v3747_v32 = vadd.f32 %v8857_v18, %v3724_v62  ;;  %v3687_v20 = vadd.f32 %v6390_v2, %v3686_v30  ;;  %v6515_v57 = vpop.f32.mrf.mxu1 }
 0x249   :  { %v7252_v26 = vpop.eup %7251  ;;  %7263 = vpow2.f32 %v5735_v23  ;;  %v6392_v13 = vpop.f32.mrf.mxu0 }
 0x24a   :  { %v3807_v44 = vadd.f32 1.0, %v7252_v26  ;;  %v5736_v4 = vmul.f32 -1.442695, %v3747_v32  ;;  %v3725_v19 = vadd.f32 %v3687_v20, %v8791_v41  ;;  %v6393_v24 = vadd.f32 %v6392_v13, %v6391_v45  ;;  %v3891_v26 = vpop.permute.xlu1 %3890 }
 0x24b   :  { %v6394_v61 = vpop.f32.mrf.mxu0 }
 0x24c   :  { %7265 = vrcp.f32 %v3807_v44  ;;  %v3748_v63 = vadd.f32 %v8857_v18, %v3725_v19  ;;  %v3690_v22 = vadd.f32 %v6393_v24, %v3689_v29  ;;  %v3705_v19 = vpop.f32.mrf.mxu1 }
 0x24d   :  { %v8877_v59 = vpop.eup %7253  ;;  %7267 = vpow2.f32 %v5736_v4  ;;  %v6395_v27 = vpop.f32.mrf.mxu0 }
 0x24e   :  { %9712 = vst [vmem:[#allocation14_spill] sm:$0xff] %v8877_v59  ;;  %v7256_v15 = vpop.eup %7255  ;;  %v5737_v31 = vmul.f32 -1.442695, %v3748_v63  ;;  %v3726_v36 = vadd.f32 %v3690_v22, %v8794_v60  ;;  %v3932_v9 = vmul.f32 %v8877_v59, %v3885_v48  ;;  %v6396_v8 = vadd.f32 %v6395_v27, %v6394_v61 }
 0x24f   :  { %v3808_v16 = vadd.f32 1.0, %v7256_v15  ;;  %v6397_v28 = vpop.f32.mrf.mxu0 }
 0x250   :  { %7269 = vpow2.f32 %v5737_v31  ;;  %v3749_v35 = vadd.f32 %v8857_v18, %v3726_v36  ;;  %v3695_v49 = vadd.f32 %v6510_v6, %v6396_v8  ;;  %4005 = vrot.lane.b32.xlu0 %v3932_v9, %s7382_s6  ;;  %v7228_v36 = vld [vmem:[%s9660_s5 + $0x80] sm:$0xff]  }
 0x251   :  { %v8885_v0 = vpop.eup %7257  ;;  %7271 = vrcp.f32 %v3808_v16  ;;  %v6398_v43 = vpop.f32.mrf.mxu0 }
 0x252   :  { %9713 = vst [vmem:[#allocation15_spill] sm:$0xff] %v8885_v0  ;;  %v7260_v30 = vpop.eup %7259  ;;  %v5738_v42 = vmul.f32 -1.442695, %v3749_v35  ;;  %v3727_v46 = vadd.f32 %v3695_v49, %v8837_v51  ;;  %v3933_v47 = vmul.f32 %v8885_v0, %v3887_v39  ;;  %v6399_v33 = vadd.f32 %v6398_v43, %v6397_v28  ;;  %v3893_v16 = vpop.permute.xlu0 %3892 }
 0x253   :  { %v3809_v53 = vadd.f32 1.0, %v7260_v30  ;;  %v6400_v52 = vpop.f32.mrf.mxu0 }
 0x254   :  { %7273 = vpow2.f32 %v5738_v42  ;;  %v3750_v6 = vadd.f32 %v8857_v18, %v3727_v46  ;;  %v3698_v56 = vadd.f32 %v6511_v3, %v6399_v33  ;;  %4007 = vrot.lane.b32.xlu1 %v3933_v47, %s7382_s6  ;;  %v7227_v3 = vld [vmem:[%s9660_s5 + $0x88] sm:$0xff]   ;;  %v3895_v33 = vpop.permute.xlu1 %3894 }
 0x255   :  { %v8891_v40 = vpop.eup %7261  ;;  %7275 = vrcp.f32 %v3809_v53  ;;  %v6401_v10 = vpop.f32.mrf.mxu0  ;;  %6516 = vmatprep.subr.bf16.mxu0 %v7227_v3 }
 0x256   :  { %9714 = vst [vmem:[#allocation16_spill] sm:$0xff] %v8891_v40  ;;  %v7264_v23 = vpop.eup %7263  ;;  %v5739_v62 = vmul.f32 -1.442695, %v3750_v6  ;;  %v3728_v2 = vadd.f32 %v3698_v56, %v8840_v5  ;;  %v3934_v45 = vmul.f32 %v8891_v40, %v3889_v11  ;;  %v6402_v32 = vadd.f32 %v6401_v10, %v6400_v52  ;;  %6517 = vmatpush3.bf16.msra.mxu0 %v7227_v3 }
 0x257   :  { %v3810_v20 = vadd.f32 1.0, %v7264_v23  ;;  %v6403_v48 = vpop.f32.mrf.mxu0  ;;  %6518 = vmatprep.subr.bf16.mxu0 %v7228_v36 }
 0x258   :  { %7277 = vpow2.f32 %v5739_v62  ;;  %v3751_v13 = vadd.f32 %v8857_v18, %v3728_v2  ;;  %v3703_v29 = vadd.f32 %v6402_v32, %v3702_v17  ;;  %4009 = vrot.lane.b32.xlu0 %v3934_v45, %s7382_s6 }
 0x259   :  { %v8900_v44 = vpop.eup %7265  ;;  %7279 = vrcp.f32 %v3810_v20  ;;  %v6404_v4 = vpop.f32.mrf.mxu0 }
 0x25a   :  { %9715 = vst [vmem:[#allocation17_spill] sm:$0xff] %v8900_v44  ;;  %v7268_v24 = vpop.eup %7267  ;;  %v5740_v61 = vmul.f32 -1.442695, %v3751_v13  ;;  %v3729_v63 = vadd.f32 %v3703_v29, %v8843_v7  ;;  %v3935_v22 = vmul.f32 %v8900_v44, %v3891_v26  ;;  %v6405_v27 = vadd.f32 %v6404_v4, %v6403_v48  ;;  %6519 = vmatpush3.bf16.msra.mxu0 %v7228_v36 }
 0x25b   :  { %v3811_v15 = vadd.f32 1.0, %v7268_v24  ;;  %v6406_v31 = vpop.f32.mrf.mxu0 }
 0x25c   :  { %7281 = vpow2.f32 %v5740_v61  ;;  %v3752_v9 = vadd.f32 %v8857_v18, %v3729_v63  ;;  %v3706_v8 = vadd.f32 %v6405_v27, %v3705_v19  ;;  %4011 = vrot.lane.b32.xlu1 %v3935_v22, %s7382_s6  ;;  %v3899_v19 = vpop.permute.xlu1 %3898 }
 0x25d   :  { %v7270_v28 = vpop.eup %7269  ;;  %7283 = vrcp.f32 %v3811_v15  ;;  %v6407_v39 = vpop.f32.mrf.mxu0 }
 0x25e   :  { %v8909_v35 = vpop.eup %7271  ;;  %v3812_v49 = vadd.f32 1.0, %v7270_v28  ;;  %v5741_v11 = vmul.f32 -1.442695, %v3752_v9  ;;  %v3730_v43 = vadd.f32 %v3706_v8, %v8846_v1  ;;  %v6408_v17 = vadd.f32 %v6407_v39, %v6406_v31 }
 0x25f   :  { %9716 = vst [vmem:[#allocation18_spill] sm:$0xff] %v8909_v35  ;;  %v3936_v30 = vmul.f32 %v8909_v35, %v3893_v16  ;;  %v6409_v42 = vpop.f32.mrf.mxu0 }
 0x260   :  { %7285 = vrcp.f32 %v3812_v49  ;;  %v3753_v46 = vadd.f32 %v8857_v18, %v3730_v43  ;;  %v3711_v47 = vadd.f32 %v8879_v34, %v6408_v17  ;;  %v3897_v34 = vpop.permute.xlu0 %3896  ;;  %v3903_v9 = vpop.permute.xlu1 %3902 }
 0x261   :  { %v7274_v53 = vpop.eup %7273  ;;  %7287 = vpow2.f32 %v5741_v11  ;;  %4013 = vrot.lane.b32.xlu0 %v3936_v30, %s7382_s6  ;;  %v6410_v52 = vpop.f32.mrf.mxu0 }
 0x262   :  { %v8916_v6 = vpop.eup %7275  ;;  %v3813_v56 = vadd.f32 1.0, %v7274_v53  ;;  %v5742_v10 = vmul.f32 -1.442695, %v3753_v46  ;;  %v3731_v23 = vadd.f32 %v3711_v47, %v8849_v21  ;;  %v6411_v62 = vadd.f32 %v6410_v52, %v6409_v42 }
 0x263   :  { %9717 = vst [vmem:[#allocation19_spill] sm:$0xff] %v8916_v6  ;;  %v3937_v2 = vmul.f32 %v8916_v6, %v3895_v33 }
 0x264   :  { %7289 = vrcp.f32 %v3813_v56  ;;  %v3754_v45 = vadd.f32 %v8857_v18, %v3731_v23  ;;  %v3714_v32 = vadd.f32 %v6515_v57, %v6411_v62  ;;  %v3901_v27 = vpop.permute.xlu0 %3900  ;;  %v3907_v42 = vpop.permute.xlu1 %3906 }
 0x265   :  { %v7278_v20 = vpop.eup %7277  ;;  %7291 = vpow2.f32 %v5742_v10  ;;  %4015 = vrot.lane.b32.xlu1 %v3937_v2, %s7382_s6 }
 0x266   :  { %v8922_v48 = vpop.eup %7279  ;;  %v3814_v26 = vadd.f32 1.0, %v7278_v20  ;;  %v5743_v3 = vmul.f32 -1.442695, %v3754_v45  ;;  %v3732_v13 = vadd.f32 %v3714_v32, %v8852_v55 }
 0x267   :  { %9718 = vst [vmem:[#allocation20_spill] sm:$0xff] %v8922_v48  ;;  %v3938_v29 = vmul.f32 %v8922_v48, %v3897_v34 }
 0x268   :  { %7293 = vrcp.f32 %v3814_v26  ;;  %v3755_v4 = vadd.f32 %v8857_v18, %v3732_v13  ;;  %v3905_v49 = vpop.permute.xlu0 %3904  ;;  %v3911_v23 = vpop.permute.xlu1 %3910  ;;  %v7229_v13 = vld [vmem:[%s9660_s5 + $0x78] sm:$0xff]  }
 0x269   :  { %v7282_v24 = vpop.eup %7281  ;;  %7295 = vpow2.f32 %v5743_v3  ;;  %4017 = vrot.lane.b32.xlu0 %v3938_v29, %s7382_s6  ;;  %v7230_v29 = vld [vmem:[%s9660_s5 + $0x38] sm:$0xff]   ;;  %6422 = vmatprep.subr.bf16.mxu1 %v7229_v13 }
 0x26a   :  { %v8928_v57 = vpop.eup %7283  ;;  %v3815_v61 = vadd.f32 1.0, %v7282_v24  ;;  %v5744_v63 = vmul.f32 -1.442695, %v3755_v4  ;;  %v7231_v4 = vld [vmem:[%s9660_s5 + $0x70] sm:$0xff]   ;;  %6423 = vmatpush3.bf16.msra.mxu1 %v7230_v29  ;;  %v7233_v24 = vld [vmem:[%s9660_s5 + $0x68] sm:$0xff]  }
 0x26b   :  { %9719 = vst [vmem:[#allocation21_spill] sm:$0xff] %v8928_v57  ;;  %v3939_v22 = vmul.f32 %v8928_v57, %v3899_v19  ;;  %v7232_v19 = vld [vmem:[%s9660_s5 + $0x30] sm:$0xff]   ;;  %6424 = vmatprep.subr.bf16.mxu1 %v7231_v4  ;;  %v7242_v4 = vld [vmem:[%s9660_s5 + $0x8] sm:$0xff]  }
 0x26c   :  { %7297 = vrcp.f32 %v3815_v61  ;;  %v3909_v52 = vpop.permute.xlu0 %3908  ;;  %v3915_v20 = vpop.permute.xlu1 %3914  ;;  %v7234_v61 = vld [vmem:[%s9660_s5 + $0x28] sm:$0xff]  }
 0x26d   :  { %v8931_v15 = vpop.eup %7285  ;;  %7299 = vpow2.f32 %v5744_v63  ;;  %4019 = vrot.lane.b32.xlu1 %v3939_v22, %s7382_s6  ;;  %v7235_v63 = vld [vmem:[%s9660_s5 + $0x60] sm:$0xff]  }
 0x26e   :  { %9720 = vst [vmem:[#allocation22_spill] sm:$0xff] %v8931_v15  ;;  %v7288_v31 = vpop.eup %7287  ;;  %v3940_v18 = vmul.f32 %v8931_v15, %v3901_v27  ;;  %6425 = vmatpush3.bf16.msra.mxu1 %v7232_v19  ;;  %v7236_v22 = vld [vmem:[%s9660_s5 + $0x20] sm:$0xff]  }
 0x26f   :  { %v3816_v36 = vadd.f32 1.0, %v7288_v31  ;;  %6426 = vmatprep.subr.bf16.mxu1 %v7233_v24  ;;  %v8989_v31 = vld [vmem:[#allocation2] sm:$0xff] }
 0x270   :  { %4021 = vrot.lane.b32.xlu0 %v3940_v18, %s7382_s6  ;;  %v3913_v45 = vpop.permute.xlu0 %3912  ;;  %v4071_v18 = vld [vmem:[#allocation2 + $0x8] sm:$0x3] }
 0x271   :  { %v8936_v8 = vpop.eup %7289  ;;  %7301 = vrcp.f32 %v3816_v36  ;;  %v7237_v36 = vld [vmem:[%s9660_s5 + $0x58] sm:$0xff]  }
 0x272   :  { %9721 = vst [vmem:[#allocation23_spill] sm:$0xff] %v8936_v8  ;;  %v7292_v16 = vpop.eup %7291  ;;  %v3941_v28 = vmul.f32 %v8936_v8, %v3903_v9  ;;  %6427 = vmatpush3.bf16.msra.mxu1 %v7234_v61  ;;  %v7238_v9 = vld [vmem:[%s9660_s5 + $0x18] sm:$0xff]  }
 0x273   :  { %v3817_v39 = vadd.f32 1.0, %v7292_v16  ;;  %6428 = vmatprep.subr.bf16.mxu1 %v7235_v63 }
 0x274   :  { %4023 = vrot.lane.b32.xlu1 %v3941_v28, %s7382_s6  ;;  %v4143_v28 = vrot.slane %v8989_v31, 1 }
 0x275   :  { %v8940_v11 = vpop.eup %7293  ;;  %7303 = vrcp.f32 %v3817_v39  ;;  %v4144_v39 = vrot.slane %v4071_v18, 1 }
 0x276   :  { %9722 = vst [vmem:[#allocation24_spill] sm:$0xff] %v8940_v11  ;;  %v7296_v43 = vpop.eup %7295  ;;  %v3942_v17 = vmul.f32 %v8940_v11, %v3905_v49  ;;  %6429 = vmatpush3.bf16.msra.mxu1 %v7236_v22  ;;  %v7239_v49 = vld [vmem:[%s9660_s5 + $0x50] sm:$0xff]  }
 0x277   :  { %v3818_v30 = vadd.f32 1.0, %v7296_v43  ;;  %6430 = vmatprep.subr.bf16.mxu1 %v7237_v36  ;;  %v7240_v43 = vld [vmem:[%s9660_s5 + $0x10] sm:$0xff]  }
 0x278   :  { %4025 = vrot.lane.b32.xlu0 %v3942_v17, %s7382_s6 }
 0x279   :  { %v8944_v46 = vpop.eup %7297  ;;  %7305 = vrcp.f32 %v3818_v30 }
 0x27a   :  { %9723 = vst [vmem:[#allocation25_spill] sm:$0xff] %v8944_v46  ;;  %v7300_v47 = vpop.eup %7299  ;;  %v3943_v33 = vmul.f32 %v8944_v46, %v3907_v42  ;;  %6431 = vmatpush3.bf16.msra.mxu1 %v7238_v9 }
 0x27b   :  { %v3819_v53 = vadd.f32 1.0, %v7300_v47  ;;  %v4145_v47 = vsel %vm4142_vm3, %v4143_v28, %v4144_v39  ;;  %6432 = vmatprep.subr.bf16.mxu1 %v7239_v49 }
 0x27c   :  { %4027 = vrot.lane.b32.xlu1 %v3943_v33, %s7382_s6  ;;  %v4192_v33 = vrot.slane %v8989_v31, 2 }
 0x27d   :  { %7307 = vrcp.f32 %v3819_v53  ;;  %v4193_v53 = vrot.slane %v4071_v18, 2  ;;  %v7244_v18 = vld [vmem:[%s9660_s5] sm:$0xff]  }
 0x27e   :  { %v8948_v56 = vpop.eup %7301  ;;  %6433 = vmatpush3.bf16.msra.mxu1 %v7240_v43 }
 0x27f   :  { %9724 = vst [vmem:[#allocation26_spill] sm:$0xff] %v8948_v56  ;;  %v3944_v10 = vmul.f32 %v8948_v56, %v3909_v52  ;;  %v4194_v63 = vsel %vm4191_vm4, %v4192_v33, %v4193_v53 }
 0x281   :  { %4029 = vrot.lane.b32.xlu0 %v3944_v10, %s7382_s6 }
 0x282   :  { %v8952_v62 = vpop.eup %7303 }
 0x283   :  { %9725 = vst [vmem:[#allocation27_spill] sm:$0xff] %v8952_v62  ;;  %v3945_v2 = vmul.f32 %v8952_v62, %v3911_v23 }
 0x285   :  { %4031 = vrot.lane.b32.xlu1 %v3945_v2, %s7382_s6 }
 0x286   :  { %v8956_v32 = vpop.eup %7305 }
 0x287   :  { %9726 = vst [vmem:[#allocation28_spill] sm:$0xff] %v8956_v32  ;;  %v3946_v34 = vmul.f32 %v8956_v32, %v3913_v45 }
 0x289   :  { %4033 = vrot.lane.b32.xlu0 %v3946_v34, %s7382_s6  ;;  %v7241_v34 = vld [vmem:[%s9660_s5 + $0x48] sm:$0xff]  }
 0x28a   :  { %v8960_v26 = vpop.eup %7307  ;;  %6434 = vmatprep.subr.bf16.mxu1 %v7241_v34 }
 0x28b   :  { %9727 = vst [vmem:[#allocation29_spill] sm:$0xff] %v8960_v26  ;;  %v3947_v3 = vmul.f32 %v8960_v26, %v3915_v20  ;;  %6435 = vmatpush3.bf16.msra.mxu1 %v7242_v4 }
 0x28d   :  { %4035 = vrot.lane.b32.xlu1 %v3947_v3, %s7382_s6 }
 0x2c2   :  { %v4006_v27 = vpop.permute.xlu0 %4005 }
 0x2c3   :  { %4054 = vst.msk [vmem:[#allocation2 + $0x11] sm:$0xff] %vm3498_vm1, %v4006_v27  ;;  %v7243_v27 = vld [vmem:[%s9660_s5 + $0x40] sm:$0xff]  }
 0x2c4   :  { %6436 = vmatprep.subr.bf16.mxu1 %v7243_v27 }
 0x2c5   :  { %6437 = vmatpush3.bf16.msra.mxu1 %v7244_v18 }
 0x2c6   :  { %v4008_v16 = vpop.permute.xlu1 %4007 }
 0x2c7   :  { %4055 = vst.msk [vmem:[#allocation2 + $0x21] sm:$0xff] %vm3498_vm1, %v4008_v16 }
 0x2ca   :  { %v4010_v17 = vpop.permute.xlu0 %4009  ;;  %v9005_v30 = vld [vmem:[#allocation2 + $0x10] sm:$0xff]  ;;  %v4073_v42 = vld [vmem:[#allocation2 + $0x18] sm:$0x3] }
 0x2cb   :  { %4056 = vst.msk [vmem:[#allocation2 + $0x31] sm:$0xff] %vm3498_vm1, %v4010_v17  ;;  %v4146_v52 = vrot.slane %v9005_v30, 1  ;;  %v4147_v10 = vrot.slane %v4073_v42, 1  ;;  %v4195_v23 = vrot.slane %v9005_v30, 2  ;;  %v4196_v2 = vrot.slane %v4073_v42, 2 }
 0x2cd   :  { %v9013_v45 = vsel %vm4142_vm3, %v4146_v52, %v4147_v10  ;;  %v4197_v19 = vsel %vm4191_vm4, %v4195_v23, %v4196_v2 }
 0x2ce   :  { %v4012_v20 = vpop.permute.xlu1 %4011  ;;  %v6544_v3 = vpack.i.bf16 %v9013_v45, %v4145_v47  ;;  %v9019_v13 = vld [vmem:[#allocation2 + $0x20] sm:$0xff]  ;;  %v4075_v29 = vld [vmem:[#allocation2 + $0x28] sm:$0x3]  ;;  %v6549_v9 = vpack.i.bf16 %v4197_v19, %v4194_v63 }
 0x2cf   :  { %4057 = vst.msk [vmem:[#allocation2 + $0x41] sm:$0xff] %vm3498_vm1, %v4012_v20  ;;  %v4198_v24 = vrot.slane %v9019_v13, 2  ;;  %v4199_v61 = vrot.slane %v4075_v29, 2  ;;  %v4149_v33 = vrot.slane %v9019_v13, 1  ;;  %v4150_v53 = vrot.slane %v4075_v29, 1 }
 0x2d0   :  { %6545 = vrot.lane.b32.xlu1 %v6544_v3, %s7380_s0  ;;  %v6554_v52 = vpack.i.bf16 %v9019_v13, %v9005_v30 }
 0x2d1   :  { %v4200_v22 = vsel %vm4191_vm4, %v4198_v24, %v4199_v61  ;;  %v9060_v29 = vsel %vm4142_vm3, %v4149_v33, %v4150_v53 }
 0x2d2   :  { %v6559_v36 = vpack.i.bf16 %v4200_v22, %v4197_v19  ;;  %v9036_v16 = vld [vmem:[#allocation2 + $0x30] sm:$0xff]  ;;  %v4077_v28 = vld [vmem:[#allocation2 + $0x38] sm:$0x3] }
 0x2d3   :  { %v4014_v39 = vpop.permute.xlu0 %4013  ;;  %v4201_v49 = vrot.slane %v9036_v16, 2  ;;  %v4202_v43 = vrot.slane %v4077_v28, 2  ;;  %v4152_v17 = vrot.slane %v9036_v16, 1  ;;  %v4153_v42 = vrot.slane %v4077_v28, 1 }
 0x2d4   :  { %4058 = vst.msk [vmem:[#allocation2 + $0x51] sm:$0xff] %vm3498_vm1, %v4014_v39  ;;  %6560 = vrot.lane.b32.xlu0 %v6559_v36, %s7380_s0  ;;  %6550 = vrot.lane.b32.xlu1 %v6549_v9, %s7383_s19  ;;  %v6564_v10 = vpack.i.bf16 %v9036_v16, %v9019_v13 }
 0x2d5   :  { %v4203_v47 = vsel %vm4191_vm4, %v4201_v49, %v4202_v43  ;;  %v9052_v3 = vsel %vm4142_vm3, %v4152_v17, %v4153_v42 }
 0x2d6   :  { %v4692_v23 = vpack.c.bf16 %v4203_v47, %v4200_v22  ;;  %v9049_v2 = vld [vmem:[#allocation2 + $0x40] sm:$0xff]  ;;  %v4079_v34 = vld [vmem:[#allocation2 + $0x48] sm:$0x3]  ;;  %v6574_v24 = vpack.i.bf16 %v9052_v3, %v9060_v29  ;;  %v6579_v28 = vpack.i.bf16 %v4203_v47, %v4200_v22 }
 0x2d7   :  { %v4016_v20 = vpop.permute.xlu1 %4015  ;;  %v4204_v4 = vrot.slane %v9049_v2, 2  ;;  %v4205_v19 = vrot.slane %v4079_v34, 2  ;;  %v4155_v22 = vrot.slane %v9049_v2, 1 }
 0x2d8   :  { %4059 = vst.msk [vmem:[#allocation2 + $0x61] sm:$0xff] %vm3498_vm1, %v4016_v20  ;;  %6555 = vrot.lane.b32.xlu1 %v6554_v52, %s7382_s6  ;;  %6565 = vrot.lane.b32.xlu0 %v6564_v10, %s7383_s19  ;;  %v9086_v10 = vld [vmem:[#allocation2 + $0x90] sm:$0xff] }
 0x2d9   :  { %6520 = vmatprep.mubr.msk.bf16.mxu0 %vm3498_vm1, %v4692_v23  ;;  %v9065_v63 = vsel %vm4191_vm4, %v4204_v4, %v4205_v19  ;;  %v9088_v23 = vld [vmem:[#allocation2 + $0x98] sm:$0x3]  ;;  %v6584_v4 = vpack.i.bf16 %v9049_v2, %v9036_v16 }
 0x2da   :  { %v6589_v39 = vpack.i.bf16 %v9065_v63, %v4203_v47  ;;  %v4156_v47 = vrot.slane %v4079_v34, 1 }
 0x2db   :  { %v4018_v61 = vpop.permute.xlu0 %4017  ;;  %v9067_v27 = vld [vmem:[#allocation2 + $0x50] sm:$0xff]  ;;  %v4081_v18 = vld [vmem:[#allocation2 + $0x58] sm:$0x3] }
 0x2dc   :  { %4060 = vst.msk [vmem:[#allocation2 + $0x71] sm:$0xff] %vm3498_vm1, %v4018_v61  ;;  %6575 = vrot.lane.b32.xlu1 %v6574_v24, %s7380_s0  ;;  %6570 = vrot.lane.b32.xlu0 %v6574_v24, %s7382_s6  ;;  %v4207_v36 = vrot.slane %v9067_v27, 2  ;;  %v4208_v9 = vrot.slane %v4081_v18, 2  ;;  %v4158_v42 = vrot.slane %v9067_v27, 1  ;;  %v4159_v33 = vrot.slane %v4081_v18, 1 }
 0x2dd   :  { %v6594_v19 = vpack.i.bf16 %v9067_v27, %v9049_v2 }
 0x2de   :  { %v4209_v49 = vsel %vm4191_vm4, %v4207_v36, %v4208_v9  ;;  %v9098_v18 = vsel %vm4142_vm3, %v4158_v42, %v4159_v33 }
 0x2df   :  { %v4020_v43 = vpop.permute.xlu1 %4019  ;;  %v4695_v17 = vpack.c.bf16 %v4209_v49, %v9065_v63  ;;  %v9077_v53 = vld [vmem:[#allocation2 + $0x60] sm:$0xff]  ;;  %v9079_v52 = vld [vmem:[#allocation2 + $0x68] sm:$0x3] }
 0x2e0   :  { %4061 = vst.msk [vmem:[#allocation2 + $0x81] sm:$0xff] %vm3498_vm1, %v4020_v43  ;;  %6580 = vrot.lane.b32.xlu1 %v6579_v28, %s7383_s19  ;;  %6590 = vrot.lane.b32.xlu0 %v6589_v39, %s7380_s0  ;;  %v4210_v24 = vrot.slane %v9077_v53, 2  ;;  %v4211_v61 = vrot.slane %v9079_v52, 2  ;;  %v4282_v39 = vrot.slane %v9086_v10, 2  ;;  %v4283_v43 = vrot.slane %v9088_v23, 2 }
 0x2e1   :  { %6521 = vmatmul.mubr.msk.bf16.vlgmr.msra.gmra.mxu0 %vm3498_vm1, %v4695_v17  ;;  %v9108_v17 = vsel %vm4142_vm3, %v4155_v22, %v4156_v47 }
 0x2e2   :  { %v4022_v20 = vpop.permute.xlu0 %4021  ;;  %v6604_v42 = vpack.i.bf16 %v9098_v18, %v9108_v17  ;;  %v9113_v33 = vsel %vm4191_vm4, %v4210_v24, %v4211_v61  ;;  %v4284_v24 = vsel %vm4191_vm4, %v4282_v39, %v4283_v43  ;;  %v6614_v43 = vpack.i.bf16 %v9077_v53, %v9067_v27 }
 0x2e3   :  { %4062 = vst.msk [vmem:[#allocation2 + $0xb1] sm:$0xff] %vm3498_vm1, %v4022_v20  ;;  %v9100_v34 = vld [vmem:[#allocation2 + $0x70] sm:$0xff]  ;;  %v4085_v36 = vld [vmem:[#allocation2 + $0x78] sm:$0x3] }
 0x2e4   :  { %6585 = vrot.lane.b32.xlu1 %v6584_v4, %s7382_s6  ;;  %6595 = vrot.lane.b32.xlu0 %v6594_v19, %s7383_s19  ;;  %v4213_v9 = vrot.slane %v9100_v34, 2  ;;  %v4214_v28 = vrot.slane %v4085_v36, 2  ;;  %v4164_v62 = vrot.slane %v9100_v34, 1  ;;  %v4165_v56 = vrot.slane %v4085_v36, 1 }
 0x2e6   :  { %v4024_v20 = vpop.permute.xlu1 %4023  ;;  %v9116_v4 = vsel %vm4191_vm4, %v4213_v9, %v4214_v28  ;;  %v6609_v9 = vpack.i.bf16 %v4209_v49, %v9065_v63  ;;  %v6619_v28 = vpack.i.bf16 %v9113_v33, %v4209_v49  ;;  %v4161_v63 = vrot.slane %v9077_v53, 1 }
 0x2e7   :  { %4063 = vst.msk [vmem:[#allocation2 + $0xc1] sm:$0xff] %vm3498_vm1, %v4024_v20  ;;  %v4698_v19 = vpack.c.bf16 %v9116_v4, %v9113_v33  ;;  %v9121_v26 = vld [vmem:[#allocation2 + $0x80] sm:$0xff]  ;;  %v9123_v32 = vld [vmem:[#allocation2 + $0x88] sm:$0x3]  ;;  %v4162_v49 = vrot.slane %v9079_v52, 1  ;;  %v6639_v48 = vpack.i.bf16 %v9116_v4, %v9113_v33 }
 0x2e8   :  { %6605 = vrot.lane.b32.xlu1 %v6604_v42, %s7380_s0  ;;  %6600 = vrot.lane.b32.xlu0 %v6604_v42, %s7382_s6  ;;  %v4266_v22 = vrot.slane %v9121_v26, 2  ;;  %v4267_v47 = vrot.slane %v9123_v32, 2  ;;  %v4244_v6 = vrot.slane %v9121_v26, 1  ;;  %v6649_v0 = vpack.i.bf16 %v9121_v26, %v9100_v34 }
 0x2e9   :  { %6524 = vmatprep.mubr.msk.bf16.mxu0 %vm3498_vm1, %v4698_v19  ;;  %v6624_v19 = vpack.i.bf16 %v9100_v34, %v9077_v53  ;;  %v9159_v52 = vsel %vm4142_vm3, %v4161_v63, %v4162_v49  ;;  %v4276_v49 = vrot.slane %v9086_v10, 1 }
 0x2ea   :  { %v4026_v61 = vpop.permute.xlu0 %4025  ;;  %v9134_v20 = vsel %vm4191_vm4, %v4266_v22, %v4267_v47  ;;  %v9154_v47 = vsel %vm4142_vm3, %v4164_v62, %v4165_v56  ;;  %v4091_v62 = vld [vmem:[#allocation2 + $0xa8] sm:$0x3]  ;;  %v9178_v46 = vld [vmem:[#allocation2 + $0xb0] sm:$0xff]  ;;  %v4093_v11 = vld [vmem:[#allocation2 + $0xb8] sm:$0x3] }
 0x2eb   :  { %4064 = vst.msk [vmem:[#allocation2 + $0xd1] sm:$0xff] %vm3498_vm1, %v4026_v61  ;;  %v4701_v42 = vpack.c.bf16 %v4284_v24, %v9134_v20  ;;  %v4217_v40 = vrot.slane %v4091_v62, 2  ;;  %v6654_v59 = vpack.i.bf16 %v9134_v20, %v9116_v4 }
 0x2ec   :  { %6610 = vrot.lane.b32.xlu1 %v6609_v9, %s7383_s19  ;;  %6620 = vrot.lane.b32.xlu0 %v6619_v28, %s7380_s0  ;;  %v9163_v9 = vld [vmem:[#allocation2 + $0xa0] sm:$0xff]  ;;  %v6634_v28 = vpack.i.bf16 %v9154_v47, %v9159_v52 }
 0x2ed   :  { %6525 = vmatmul.mubr.msk.bf16.gmra.mxu0 %vm3498_vm1, %v4701_v42  ;;  %v4167_v57 = vrot.slane %v9163_v9, 1 }
 0x2ee   :  { %v4028_v39 = vpop.permute.xlu1 %4027  ;;  %v9148_v22 = vld [vmem:[#allocation2 + $0xc0] sm:$0xff]  ;;  %v9150_v36 = vld [vmem:[#allocation2 + $0xc8] sm:$0x3] }
 0x2ef   :  { %4065 = vst.msk [vmem:[#allocation2 + $0xe1] sm:$0xff] %vm3498_vm1, %v4028_v39  ;;  %v4222_v24 = vrot.slane %v9148_v22, 2  ;;  %v4223_v61 = vrot.slane %v9150_v36, 2  ;;  %v6674_v21 = vpack.i.bf16 %v9148_v22, %v9178_v46 }
 0x2f0   :  { %6615 = vrot.lane.b32.xlu1 %v6614_v43, %s7382_s6  ;;  %6625 = vrot.lane.b32.xlu0 %v6624_v19, %s7383_s19  ;;  %v4277_v19 = vrot.slane %v9088_v23, 1 }
 0x2f1   :  { %v9181_v8 = vsel %vm4191_vm4, %v4222_v24, %v4223_v61  ;;  %v4245_v24 = vrot.slane %v9123_v32, 1  ;;  %v4170_v61 = vrot.slane %v9178_v46, 1  ;;  %v4216_v32 = vrot.slane %v9163_v9, 2 }
 0x2f2   :  { %v9167_v42 = vld [vmem:[#allocation2 + $0xd0] sm:$0xff]  ;;  %v9169_v56 = vld [vmem:[#allocation2 + $0xd8] sm:$0x3] }
 0x2f3   :  { %v4030_v39 = vpop.permute.xlu0 %4029  ;;  %v4225_v43 = vrot.slane %v9167_v42, 2  ;;  %v4226_v63 = vrot.slane %v9169_v56, 2 }
 0x2f4   :  { %4066 = vst.msk [vmem:[#allocation2 + $0xf1] sm:$0xff] %vm3498_vm1, %v4030_v39  ;;  %6635 = vrot.lane.b32.xlu1 %v6634_v28, %s7380_s0  ;;  %6630 = vrot.lane.b32.xlu0 %v6634_v28, %s7382_s6  ;;  %v4168_v39 = vrot.slane %v4091_v62, 1  ;;  %v6644_v28 = vpack.i.bf16 %v9086_v10, %v9121_v26  ;;  %v4278_v10 = vsel %vm4142_vm3, %v4276_v49, %v4277_v19  ;;  %v4219_v26 = vrot.slane %v9178_v46, 2 }
 0x2f5   :  { %v9184_v15 = vsel %vm4191_vm4, %v4225_v43, %v4226_v63  ;;  %v4171_v43 = vrot.slane %v4093_v11, 1  ;;  %v4220_v19 = vrot.slane %v4093_v11, 2 }
 0x2f6   :  { %v4704_v23 = vpack.c.bf16 %v9184_v15, %v9181_v8  ;;  %v9196_v63 = vld [vmem:[#allocation2 + $0xe0] sm:$0xff]  ;;  %v9198_v44 = vld [vmem:[#allocation2 + $0xe8] sm:$0x3]  ;;  %v4169_v33 = vsel %vm4142_vm3, %v4167_v57, %v4168_v39 }
 0x2f7   :  { %v4032_v35 = vpop.permute.xlu1 %4031  ;;  %v9217_v49 = vsel %vm4142_vm3, %v4170_v61, %v4171_v43  ;;  %v4218_v43 = vsel %vm4191_vm4, %v4216_v32, %v4217_v40 }
 0x2f8   :  { %4067 = vst.msk [vmem:[#allocation2 + $0x101] sm:$0xff] %vm3498_vm1, %v4032_v35  ;;  %6640 = vrot.lane.b32.xlu1 %v6639_v48, %s7383_s19  ;;  %6645 = vrot.lane.b32.xlu0 %v6644_v28, %s7383_s19  ;;  %v4228_v35 = vrot.slane %v9196_v63, 2  ;;  %v4229_v48 = vrot.slane %v9198_v44, 2  ;;  %v6664_v39 = vpack.i.bf16 %v9217_v49, %v4169_v33  ;;  %v9251_v33 = vld [vmem:[#allocation2 + $0x138] sm:$0x3] }
 0x2f9   :  { %6528 = vmatprep.mubr.msk.bf16.mxu0 %vm3498_vm1, %v4704_v23  ;;  %v9214_v23 = vsel %vm4142_vm3, %v4244_v6, %v4245_v24 }
 0x2fa   :  { %v6659_v20 = vpack.i.bf16 %v4278_v10, %v9214_v23  ;;  %v9232_v24 = vsel %vm4191_vm4, %v4228_v35, %v4229_v48  ;;  %v9249_v10 = vld [vmem:[#allocation2 + $0x130] sm:$0xff] }
 0x2fb   :  { %v4034_v28 = vpop.permute.xlu0 %4033  ;;  %v9219_v57 = vld [vmem:[#allocation2 + $0xf0] sm:$0xff]  ;;  %v9221_v62 = vld [vmem:[#allocation2 + $0xf8] sm:$0x3] }
 0x2fc   :  { %4068 = vst.msk [vmem:[#allocation2 + $0x111] sm:$0xff] %vm3498_vm1, %v4034_v28  ;;  %6650 = vrot.lane.b32.xlu1 %v6649_v0, %s7382_s6  ;;  %6655 = vrot.lane.b32.xlu0 %v6654_v59, %s7380_s0  ;;  %v4231_v4 = vrot.slane %v9219_v57, 2  ;;  %v4232_v6 = vrot.slane %v9221_v62, 2  ;;  %v4221_v59 = vsel %vm4191_vm4, %v4219_v26, %v4220_v19 }
 0x2fd   :  { %v6679_v35 = vpack.i.bf16 %v9181_v8, %v4221_v59  ;;  %v6669_v48 = vpack.i.bf16 %v4221_v59, %v4218_v43  ;;  %v4173_v59 = vrot.slane %v9148_v22, 1  ;;  %v4174_v43 = vrot.slane %v9150_v36, 1 }
 0x2fe   :  { %v9235_v61 = vsel %vm4191_vm4, %v4231_v4, %v4232_v6  ;;  %v4176_v4 = vrot.slane %v9167_v42, 1  ;;  %v4177_v6 = vrot.slane %v9169_v56, 1  ;;  %v6684_v56 = vpack.i.bf16 %v9167_v42, %v9148_v22 }
 0x2ff   :  { %v4036_v11 = vpop.permute.xlu1 %4035  ;;  %v4707_v0 = vpack.c.bf16 %v9235_v61, %v9232_v24  ;;  %v9241_v28 = vld [vmem:[#allocation2 + $0x100] sm:$0xff]  ;;  %v9243_v55 = vld [vmem:[#allocation2 + $0x108] sm:$0x3] }
 0x300   :  { %4069 = vst.msk [vmem:[#allocation2 + $0x121] sm:$0xff] %vm3498_vm1, %v4036_v11  ;;  %6660 = vrot.lane.b32.xlu0 %v6659_v20, %s7382_s6  ;;  %6665 = vrot.lane.b32.xlu1 %v6664_v39, %s7380_s0  ;;  %v4234_v40 = vrot.slane %v9241_v28, 2  ;;  %v4235_v32 = vrot.slane %v9243_v55, 2  ;;  %v4285_v11 = vrot.slane %v9249_v10, 2  ;;  %v9277_v7 = vsel %vm4142_vm3, %v4176_v4, %v4177_v6 }
 0x301   :  { %6529 = vmatmul.mubr.msk.bf16.gmra.mxu0 %vm3498_vm1, %v4707_v0  ;;  %v4286_v0 = vrot.slane %v9251_v33, 2 }
 0x303   :  { %v9256_v26 = vld [vmem:[#allocation2 + $0x110] sm:$0xff]  ;;  %v4105_v19 = vld [vmem:[#allocation2 + $0x118] sm:$0x3]  ;;  %v4287_v41 = vsel %vm4191_vm4, %v4285_v11, %v4286_v0  ;;  %v6704_v11 = vpack.i.bf16 %v9196_v63, %v9167_v42 }
 0x304   :  { %6680 = vrot.lane.b32.xlu0 %v6679_v35, %s7380_s0  ;;  %6670 = vrot.lane.b32.xlu1 %v6669_v48, %s7383_s19  ;;  %v4237_v20 = vrot.slane %v9256_v26, 2  ;;  %v4238_v39 = vrot.slane %v4105_v19, 2  ;;  %v4236_v35 = vsel %vm4191_vm4, %v4234_v40, %v4235_v32  ;;  %v9284_v40 = vsel %vm4142_vm3, %v4173_v59, %v4174_v43 }
 0x305   :  { %v6694_v32 = vpack.i.bf16 %v9277_v7, %v9284_v40  ;;  %v6739_v59 = vpack.i.bf16 %v4236_v35, %v9235_v61  ;;  %v4188_v43 = vrot.slane %v9256_v26, 1 }
 0x306   :  { %v9273_v48 = vsel %vm4191_vm4, %v4237_v20, %v4238_v39  ;;  %v4182_v20 = vrot.slane %v9219_v57, 1  ;;  %v4183_v39 = vrot.slane %v9221_v62, 1 }
 0x307   :  { %v4710_v1 = vpack.c.bf16 %v9273_v48, %v4236_v35  ;;  %v4106_v5 = vld [vmem:[#allocation2 + $0x120] sm:$0xff]  ;;  %v4107_v51 = vld [vmem:[#allocation2 + $0x128] sm:$0x3] }
 0x308   :  { %6675 = vrot.lane.b32.xlu1 %v6674_v21, %s7382_s6  ;;  %6685 = vrot.lane.b32.xlu0 %v6684_v56, %s7383_s19  ;;  %v4269_v36 = vrot.slane %v4106_v5, 2  ;;  %v4270_v60 = vrot.slane %v4107_v51, 2  ;;  %v6699_v21 = vpack.i.bf16 %v9184_v15, %v9181_v8  ;;  %v6714_v8 = vpack.i.bf16 %v9219_v57, %v9196_v63 }
 0x309   :  { %6532 = vmatprep.mubr.msk.bf16.mxu0 %vm3498_vm1, %v4710_v1  ;;  %v6709_v1 = vpack.i.bf16 %v9232_v24, %v9184_v15  ;;  %v9307_v15 = vsel %vm4142_vm3, %v4182_v20, %v4183_v39  ;;  %v4189_v56 = vrot.slane %v4105_v19, 1  ;;  %v4247_v20 = vrot.slane %v4106_v5, 1 }
 0x30a   :  { %v4271_v4 = vsel %vm4191_vm4, %v4269_v36, %v4270_v60  ;;  %v4180_v60 = vrot.slane %v9198_v44, 1  ;;  %v6729_v44 = vpack.i.bf16 %v9235_v61, %v9232_v24  ;;  %v4185_v36 = vrot.slane %v9241_v28, 1 }
 0x30b   :  { %v4713_v6 = vpack.c.bf16 %v4287_v41, %v4271_v4  ;;  %v4179_v41 = vrot.slane %v9196_v63, 1  ;;  %v9331_v24 = vsel %vm4142_vm3, %v4188_v43, %v4189_v56  ;;  %v4248_v39 = vrot.slane %v4107_v51, 1 }
 0x30c   :  { %6695 = vrot.lane.b32.xlu1 %v6694_v32, %s7380_s0  ;;  %6690 = vrot.lane.b32.xlu0 %v6694_v32, %s7382_s6  ;;  %v4186_v32 = vrot.slane %v9243_v55, 1  ;;  %v6759_v55 = vpack.i.bf16 %v9273_v48, %v4236_v35 }
 0x30d   :  { %6533 = vmatmul.mubr.msk.bf16.gmra.mxu0 %vm3498_vm1, %v4713_v6  ;;  %v9312_v62 = vsel %vm4142_vm3, %v4179_v41, %v4180_v60  ;;  %v6734_v6 = vpack.i.bf16 %v9241_v28, %v9219_v57  ;;  %v4279_v41 = vrot.slane %v9249_v10, 1  ;;  %v4280_v60 = vrot.slane %v9251_v33, 1 }
 0x30e   :  { %v6724_v0 = vpack.i.bf16 %v9307_v15, %v9312_v62  ;;  %v9336_v61 = vsel %vm4142_vm3, %v4185_v36, %v4186_v32 }
 0x30f   :  { %v6754_v19 = vpack.i.bf16 %v9331_v24, %v9336_v61  ;;  %v4281_v35 = vsel %vm4142_vm3, %v4279_v41, %v4280_v60 }
 0x310   :  { %6700 = vrot.lane.b32.xlu1 %v6699_v21, %s7383_s19  ;;  %6710 = vrot.lane.b32.xlu0 %v6709_v1, %s7380_s0  ;;  %v6744_v21 = vpack.i.bf16 %v9256_v26, %v9241_v28  ;;  %v6764_v1 = vpack.i.bf16 %v9249_v10, %v4106_v5  ;;  %v5745_v10 = vld [vmem:[%s9662_s7] ss:$0 sm:$0xff] }
 0x314   :  { %6705 = vrot.lane.b32.xlu1 %v6704_v11, %s7382_s6  ;;  %6715 = vrot.lane.b32.xlu0 %v6714_v8, %s7383_s19  ;;  %v6779_v11 = vpack.i.bf16 %v4106_v5, %v9256_v26  ;;  %v6769_v8 = vpack.i.bf16 %v4271_v4, %v9273_v48 }
 0x318   :  { %6725 = vrot.lane.b32.xlu1 %v6724_v0, %s7380_s0  ;;  %6720 = vrot.lane.b32.xlu0 %v6724_v0, %s7382_s6  ;;  %v9351_v0 = vsel %vm4142_vm3, %v4247_v20, %v4248_v39 }
 0x319   :  { %v6774_v51 = vpack.i.bf16 %v4281_v35, %v9351_v0 }
 0x31c   :  { %6730 = vrot.lane.b32.xlu1 %v6729_v44, %s7383_s19  ;;  %6740 = vrot.lane.b32.xlu0 %v6739_v59, %s7380_s0 }
 0x320   :  { %6735 = vrot.lane.b32.xlu1 %v6734_v6, %s7382_s6  ;;  %6745 = vrot.lane.b32.xlu0 %v6744_v21, %s7383_s19 }
 0x324   :  { %6755 = vrot.lane.b32.xlu1 %v6754_v19, %s7380_s0  ;;  %6750 = vrot.lane.b32.xlu0 %v6754_v19, %s7382_s6 }
 0x328   :  { %6760 = vrot.lane.b32.xlu1 %v6759_v55, %s7383_s19  ;;  %6765 = vrot.lane.b32.xlu0 %v6764_v1, %s7383_s19 }
 0x32c   :  { %6780 = vrot.lane.b32.xlu1 %v6779_v11, %s7382_s6  ;;  %6770 = vrot.lane.b32.xlu0 %v6769_v8, %s7380_s0  ;;  %s7384_s0 = smov [#allocation3]  }
 0x330   :  { %6775 = vrot.lane.b32.xlu0 %v6774_v51, %s7382_s6  ;;  %s5346_s6 = sshll.u32 %s7384_s0, 4  ;;  %s5347_s6 = int_to_ptr.vmem [resolvable:$true] %s5346_s6 }
 0x331   :  { %s7357_s3 = scalar_lea.vmem %s5347_s6, 2048  ;;  %p7362_p1 = scmp.lt.s32.totalorder %s5347_s6, %s5347_s6 }
 0x332   :  { %p7358_p0 = scmp.ne.s32.totalorder %s5347_s6, %s7357_s3  ;;  %p7363_p2 = scmp.lt.s32.totalorder %s7357_s3, %s7357_s3 }
 0x334   :  { %4720 = vrot.lane.b32.xlu0 %v5745_v10, %s7383_s19  ;;  %p7364_p3 = por %p7363_p2, %p7362_p1 }
 0x336   :  { %p7365_p4 = pnand %p7364_p3, %p7358_p0 }
 0x342   :  { %v6546_v5 = vpop.permute.xlu1 %6545 }
 0x343   :  { %v6548_v4 = vunpack.i.h.bf16 %v6546_v5  ;;  %v6547_v44 = vunpack.i.l.bf16 %v6546_v5 }
 0x345   :  { %v4593_v20 = vsel %vm3498_vm1, %v9005_v30, %v6548_v4  ;;  %v4592_v39 = vsel %vm3498_vm1, %v8989_v31, %v6547_v44 }
 0x346   :  { %v6551_v33 = vpop.permute.xlu1 %6550  ;;  %v6561_v48 = vpop.permute.xlu0 %6560 }
 0x347   :  { %v6553_v59 = vunpack.i.h.bf16 %v6551_v33  ;;  %v6552_v43 = vunpack.i.l.bf16 %v6551_v33  ;;  %v6563_v32 = vunpack.i.h.bf16 %v6561_v48  ;;  %v6562_v6 = vunpack.i.l.bf16 %v6561_v48 }
 0x349   :  { %v4609_v41 = vsel %vm4608_vm5, %v4592_v39, %v6552_v43  ;;  %v4610_v60 = vsel %vm4608_vm5, %v4593_v20, %v6553_v59  ;;  %v4643_v35 = vsel %vm3498_vm1, %v9060_v29, %v6563_v32  ;;  %v4642_v51 = vsel %vm3498_vm1, %v9013_v45, %v6562_v6 }
 0x34a   :  { %v6556_v56 = vpop.permute.xlu1 %6555  ;;  %v6566_v36 = vpop.permute.xlu0 %6565 }
 0x34b   :  { %v6558_v21 = vunpack.i.h.bf16 %v6556_v56  ;;  %v6557_v19 = vunpack.i.l.bf16 %v6556_v56  ;;  %v6568_v55 = vunpack.i.h.bf16 %v6566_v36  ;;  %v6567_v1 = vunpack.i.l.bf16 %v6566_v36 }
 0x34d   :  { %v4626_v30 = vsel %vm4625_vm6, %v4609_v41, %v6557_v19  ;;  %v4627_v33 = vsel %vm4625_vm6, %v4610_v60, %v6558_v21  ;;  %v4658_v31 = vsel %vm4608_vm5, %v4642_v51, %v6567_v1  ;;  %v4659_v48 = vsel %vm4608_vm5, %v4643_v35, %v6568_v55 }
 0x34e   :  { %v6576_v11 = vpop.permute.xlu1 %6575  ;;  %v6571_v8 = vpop.permute.xlu0 %6570  ;;  %v4690_v56 = vpack.c.bf16 %v4627_v33, %v4626_v30 }
 0x34f   :  { %v6573_v10 = vunpack.i.h.bf16 %v6571_v8  ;;  %v6572_v5 = vunpack.i.l.bf16 %v6571_v8  ;;  %v6578_v45 = vunpack.i.h.bf16 %v6576_v11  ;;  %v6577_v36 = vunpack.i.l.bf16 %v6576_v11 }
 0x351   :  { %v4674_v4 = vsel %vm4625_vm6, %v4658_v31, %v6572_v5  ;;  %v4675_v44 = vsel %vm4625_vm6, %v4659_v48, %v6573_v10  ;;  %v4595_v8 = vsel %vm3498_vm1, %v9036_v16, %v6578_v45  ;;  %v4594_v35 = vsel %vm3498_vm1, %v9019_v13, %v6577_v36 }
 0x352   :  { %v6581_v59 = vpop.permute.xlu1 %6580  ;;  %v6591_v43 = vpop.permute.xlu0 %6590  ;;  %v4691_v29 = vpack.c.bf16 %v4675_v44, %v4674_v4 }
 0x353   :  { %v6583_v32 = vunpack.i.h.bf16 %v6581_v59  ;;  %v6582_v6 = vunpack.i.l.bf16 %v6581_v59  ;;  %v6593_v20 = vunpack.i.h.bf16 %v6591_v43  ;;  %v6592_v1 = vunpack.i.l.bf16 %v6591_v43 }
 0x354   :  { %4939 = vmatprep.mubr.bf16.mxu1 %v4691_v29 }
 0x355   :  { %4940 = vmatmul.mubr.bf16.vlgmr.msra.gmra.mxu1 %v4690_v56  ;;  %v4611_v51 = vsel %vm4608_vm5, %v4594_v35, %v6582_v6  ;;  %v4612_v11 = vsel %vm4608_vm5, %v4595_v8, %v6583_v32  ;;  %v4645_v30 = vsel %vm3498_vm1, %v9108_v17, %v6593_v20  ;;  %v4644_v33 = vsel %vm3498_vm1, %v9052_v3, %v6592_v1 }
 0x356   :  { %v6586_v19 = vpop.permute.xlu1 %6585  ;;  %v6596_v21 = vpop.permute.xlu0 %6595 }
 0x357   :  { %v6588_v39 = vunpack.i.h.bf16 %v6586_v19  ;;  %v6587_v55 = vunpack.i.l.bf16 %v6586_v19  ;;  %v6598_v41 = vunpack.i.h.bf16 %v6596_v21  ;;  %v6597_v60 = vunpack.i.l.bf16 %v6596_v21 }
 0x359   :  { %v4628_v4 = vsel %vm4625_vm6, %v4611_v51, %v6587_v55  ;;  %v4629_v16 = vsel %vm4625_vm6, %v4612_v11, %v6588_v39  ;;  %v4660_v13 = vsel %vm4608_vm5, %v4644_v33, %v6597_v60  ;;  %v4661_v44 = vsel %vm4608_vm5, %v4645_v30, %v6598_v41 }
 0x35a   :  { %v6606_v10 = vpop.permute.xlu1 %6605  ;;  %v6601_v5 = vpop.permute.xlu0 %6600  ;;  %v4693_v45 = vpack.c.bf16 %v4629_v16, %v4628_v4 }
 0x35b   :  { %v6603_v31 = vunpack.i.h.bf16 %v6601_v5  ;;  %v6602_v48 = vunpack.i.l.bf16 %v6601_v5  ;;  %v6608_v3 = vunpack.i.h.bf16 %v6606_v10  ;;  %v6607_v36 = vunpack.i.l.bf16 %v6606_v10 }
 0x35d   :  { %v4676_v59 = vsel %vm4625_vm6, %v4660_v13, %v6602_v48  ;;  %v4677_v43 = vsel %vm4625_vm6, %v4661_v44, %v6603_v31  ;;  %v4597_v8 = vsel %vm3498_vm1, %v9067_v27, %v6608_v3  ;;  %v4596_v35 = vsel %vm3498_vm1, %v9049_v2, %v6607_v36 }
 0x35e   :  { %v6611_v29 = vpop.permute.xlu1 %6610  ;;  %v6621_v56 = vpop.permute.xlu0 %6620  ;;  %v4694_v17 = vpack.c.bf16 %v4677_v43, %v4676_v59 }
 0x35f   :  { %v6613_v32 = vunpack.i.h.bf16 %v6611_v29  ;;  %v6612_v6 = vunpack.i.l.bf16 %v6611_v29  ;;  %v6623_v20 = vunpack.i.h.bf16 %v6621_v56  ;;  %v6622_v1 = vunpack.i.l.bf16 %v6621_v56 }
 0x360   :  { %4947 = vmatprep.mubr.bf16.mxu1 %v4694_v17 }
 0x361   :  { %4948 = vmatmul.mubr.bf16.gmra.mxu1 %v4693_v45  ;;  %v4613_v51 = vsel %vm4608_vm5, %v4596_v35, %v6612_v6  ;;  %v4614_v11 = vsel %vm4608_vm5, %v4597_v8, %v6613_v32  ;;  %v4647_v30 = vsel %vm3498_vm1, %v9159_v52, %v6623_v20  ;;  %v4646_v33 = vsel %vm3498_vm1, %v9098_v18, %v6622_v1 }
 0x362   :  { %v6616_v19 = vpop.permute.xlu1 %6615  ;;  %v6626_v21 = vpop.permute.xlu0 %6625 }
 0x363   :  { %v6618_v39 = vunpack.i.h.bf16 %v6616_v19  ;;  %v6617_v55 = vunpack.i.l.bf16 %v6616_v19  ;;  %v6628_v41 = vunpack.i.h.bf16 %v6626_v21  ;;  %v6627_v60 = vunpack.i.l.bf16 %v6626_v21 }
 0x365   :  { %v4630_v4 = vsel %vm4625_vm6, %v4613_v51, %v6617_v55  ;;  %v4631_v27 = vsel %vm4625_vm6, %v4614_v11, %v6618_v39  ;;  %v4662_v2 = vsel %vm4608_vm5, %v4646_v33, %v6627_v60  ;;  %v4663_v16 = vsel %vm4608_vm5, %v4647_v30, %v6628_v41 }
 0x366   :  { %v6636_v10 = vpop.permute.xlu1 %6635  ;;  %v6631_v5 = vpop.permute.xlu0 %6630  ;;  %v4696_v29 = vpack.c.bf16 %v4631_v27, %v4630_v4 }
 0x367   :  { %v6633_v31 = vunpack.i.h.bf16 %v6631_v5  ;;  %v6632_v48 = vunpack.i.l.bf16 %v6631_v5  ;;  %v6638_v18 = vunpack.i.h.bf16 %v6636_v10  ;;  %v6637_v56 = vunpack.i.l.bf16 %v6636_v10 }
 0x369   :  { %v4678_v13 = vsel %vm4625_vm6, %v4662_v2, %v6632_v48  ;;  %v4679_v44 = vsel %vm4625_vm6, %v4663_v16, %v6633_v31  ;;  %v4599_v39 = vsel %vm3498_vm1, %v9100_v34, %v6638_v18  ;;  %v4598_v55 = vsel %vm3498_vm1, %v9077_v53, %v6637_v56 }
 0x36a   :  { %v6641_v59 = vpop.permute.xlu1 %6640  ;;  %v6646_v43 = vpop.permute.xlu0 %6645  ;;  %v4697_v52 = vpack.c.bf16 %v4679_v44, %v4678_v13 }
 0x36b   :  { %v6643_v3 = vunpack.i.h.bf16 %v6641_v59  ;;  %v6642_v36 = vunpack.i.l.bf16 %v6641_v59  ;;  %v6648_v41 = vunpack.i.h.bf16 %v6646_v43  ;;  %v6647_v60 = vunpack.i.l.bf16 %v6646_v43 }
 0x36c   :  { %4955 = vmatprep.mubr.bf16.mxu1 %v4697_v52 }
 0x36d   :  { %4956 = vmatmul.mubr.bf16.gmra.mxu1 %v4696_v29  ;;  %v4615_v51 = vsel %vm4608_vm5, %v4598_v55, %v6642_v36  ;;  %v4616_v11 = vsel %vm4608_vm5, %v4599_v39, %v6643_v3 }
 0x36e   :  { %v6651_v17 = vpop.permute.xlu1 %6650  ;;  %v6656_v45 = vpop.permute.xlu0 %6655 }
 0x36f   :  { %v6658_v32 = vunpack.i.h.bf16 %v6656_v45  ;;  %v6657_v6 = vunpack.i.l.bf16 %v6656_v45  ;;  %v6653_v19 = vunpack.i.h.bf16 %v6651_v17  ;;  %v6652_v21 = vunpack.i.l.bf16 %v6651_v17 }
 0x371   :  { %v4649_v20 = vsel %vm3498_vm1, %v9214_v23, %v6658_v32  ;;  %v4648_v1 = vsel %vm3498_vm1, %v9154_v47, %v6657_v6  ;;  %v4632_v23 = vsel %vm4625_vm6, %v4615_v51, %v6652_v21  ;;  %v4633_v47 = vsel %vm4625_vm6, %v4616_v11, %v6653_v19 }
 0x372   :  { %v6666_v8 = vpop.permute.xlu1 %6665  ;;  %v6661_v35 = vpop.permute.xlu0 %6660  ;;  %v4664_v30 = vsel %vm4608_vm5, %v4648_v1, %v6647_v60  ;;  %v4665_v34 = vsel %vm4608_vm5, %v4649_v20, %v6648_v41  ;;  %v4699_v27 = vpack.c.bf16 %v4633_v47, %v4632_v23 }
 0x373   :  { %v6663_v10 = vunpack.i.h.bf16 %v6661_v35  ;;  %v6662_v5 = vunpack.i.l.bf16 %v6661_v35  ;;  %v6668_v2 = vunpack.i.h.bf16 %v6666_v8  ;;  %v6667_v16 = vunpack.i.l.bf16 %v6666_v8 }
 0x375   :  { %v4680_v53 = vsel %vm4625_vm6, %v4664_v30, %v6662_v5  ;;  %v4681_v33 = vsel %vm4625_vm6, %v4665_v34, %v6663_v10  ;;  %v4601_v3 = vsel %vm3498_vm1, %v9178_v46, %v6668_v2  ;;  %v4600_v36 = vsel %vm3498_vm1, %v9163_v9, %v6667_v16 }
 0x376   :  { %v6671_v31 = vpop.permute.xlu1 %6670  ;;  %v6681_v48 = vpop.permute.xlu0 %6680  ;;  %v4700_v4 = vpack.c.bf16 %v4681_v33, %v4680_v53 }
 0x377   :  { %v6673_v13 = vunpack.i.h.bf16 %v6671_v31  ;;  %v6672_v44 = vunpack.i.l.bf16 %v6671_v31  ;;  %v6683_v52 = vunpack.i.h.bf16 %v6681_v48  ;;  %v6682_v29 = vunpack.i.l.bf16 %v6681_v48 }
 0x378   :  { %4963 = vmatprep.mubr.bf16.mxu1 %v4700_v4 }
 0x379   :  { %4964 = vmatmul.mubr.bf16.gmra.mxu1 %v4699_v27  ;;  %v4617_v32 = vsel %vm4608_vm5, %v4600_v36, %v6672_v44  ;;  %v4618_v6 = vsel %vm4608_vm5, %v4601_v3, %v6673_v13  ;;  %v4651_v20 = vsel %vm3498_vm1, %v9284_v40, %v6683_v52  ;;  %v4650_v1 = vsel %vm3498_vm1, %v9217_v49, %v6682_v29 }
 0x37a   :  { %v6676_v59 = vpop.permute.xlu1 %6675  ;;  %v6686_v43 = vpop.permute.xlu0 %6685 }
 0x37b   :  { %v6678_v18 = vunpack.i.h.bf16 %v6676_v59  ;;  %v6677_v56 = vunpack.i.l.bf16 %v6676_v59  ;;  %v6688_v17 = vunpack.i.h.bf16 %v6686_v43  ;;  %v6687_v45 = vunpack.i.l.bf16 %v6686_v43 }
 0x37d   :  { %v4634_v41 = vsel %vm4625_vm6, %v4617_v32, %v6677_v56  ;;  %v4635_v46 = vsel %vm4625_vm6, %v4618_v6, %v6678_v18  ;;  %v4666_v9 = vsel %vm4608_vm5, %v4650_v1, %v6687_v45  ;;  %v4667_v60 = vsel %vm4608_vm5, %v4651_v20, %v6688_v17 }
 0x37e   :  { %v6696_v19 = vpop.permute.xlu1 %6695  ;;  %v6691_v21 = vpop.permute.xlu0 %6690  ;;  %v4702_v10 = vpack.c.bf16 %v4635_v46, %v4634_v41 }
 0x37f   :  { %v6693_v39 = vunpack.i.h.bf16 %v6691_v21  ;;  %v6692_v55 = vunpack.i.l.bf16 %v6691_v21  ;;  %v6698_v49 = vunpack.i.h.bf16 %v6696_v19  ;;  %v6697_v5 = vunpack.i.l.bf16 %v6696_v19 }
 0x381   :  { %v4682_v8 = vsel %vm4625_vm6, %v4666_v9, %v6692_v55  ;;  %v4683_v35 = vsel %vm4625_vm6, %v4667_v60, %v6693_v39  ;;  %v4603_v2 = vsel %vm3498_vm1, %v9167_v42, %v6698_v49  ;;  %v4602_v16 = vsel %vm3498_vm1, %v9148_v22, %v6697_v5 }
 0x382   :  { %v6701_v51 = vpop.permute.xlu1 %6700  ;;  %v6711_v11 = vpop.permute.xlu0 %6710  ;;  %v4703_v40 = vpack.c.bf16 %v4683_v35, %v4682_v8 }
 0x383   :  { %v6703_v23 = vunpack.i.h.bf16 %v6701_v51  ;;  %v6702_v47 = vunpack.i.l.bf16 %v6701_v51  ;;  %v6713_v53 = vunpack.i.h.bf16 %v6711_v11  ;;  %v6712_v33 = vunpack.i.l.bf16 %v6711_v11 }
 0x384   :  { %4971 = vmatprep.mubr.bf16.mxu1 %v4703_v40 }
 0x385   :  { %4972 = vmatmul.mubr.bf16.gmra.mxu1 %v4702_v10  ;;  %v4619_v13 = vsel %vm4608_vm5, %v4602_v16, %v6702_v47  ;;  %v4620_v44 = vsel %vm4608_vm5, %v4603_v2, %v6703_v23  ;;  %v4653_v52 = vsel %vm3498_vm1, %v9312_v62, %v6713_v53  ;;  %v4652_v29 = vsel %vm3498_vm1, %v9277_v7, %v6712_v33 }
 0x386   :  { %v6706_v30 = vpop.permute.xlu1 %6705  ;;  %v6716_v34 = vpop.permute.xlu0 %6715 }
 0x387   :  { %v6708_v31 = vunpack.i.h.bf16 %v6706_v30  ;;  %v6707_v48 = vunpack.i.l.bf16 %v6706_v30  ;;  %v6718_v4 = vunpack.i.h.bf16 %v6716_v34  ;;  %v6717_v27 = vunpack.i.l.bf16 %v6716_v34 }
 0x389   :  { %v4636_v17 = vsel %vm4625_vm6, %v4619_v13, %v6707_v48  ;;  %v4637_v42 = vsel %vm4625_vm6, %v4620_v44, %v6708_v31  ;;  %v4668_v22 = vsel %vm4608_vm5, %v4652_v29, %v6717_v27  ;;  %v4669_v45 = vsel %vm4608_vm5, %v4653_v52, %v6718_v4 }
 0x38a   :  { %v6726_v59 = vpop.permute.xlu1 %6725  ;;  %v6721_v43 = vpop.permute.xlu0 %6720  ;;  %v4705_v19 = vpack.c.bf16 %v4637_v42, %v4636_v17 }
 0x38b   :  { %v6723_v18 = vunpack.i.h.bf16 %v6721_v43  ;;  %v6722_v56 = vunpack.i.l.bf16 %v6721_v43  ;;  %v6728_v7 = vunpack.i.h.bf16 %v6726_v59  ;;  %v6727_v21 = vunpack.i.l.bf16 %v6726_v59 }
 0x38d   :  { %v4684_v3 = vsel %vm4625_vm6, %v4668_v22, %v6722_v56  ;;  %v4685_v36 = vsel %vm4625_vm6, %v4669_v45, %v6723_v18  ;;  %v4605_v51 = vsel %vm3498_vm1, %v9219_v57, %v6728_v7  ;;  %v4604_v11 = vsel %vm3498_vm1, %v9196_v63, %v6727_v21 }
 0x38e   :  { %v6731_v32 = vpop.permute.xlu1 %6730  ;;  %v6741_v6 = vpop.permute.xlu0 %6740  ;;  %v4706_v62 = vpack.c.bf16 %v4685_v36, %v4684_v3 }
 0x38f   :  { %v6733_v20 = vunpack.i.h.bf16 %v6731_v32  ;;  %v6732_v1 = vunpack.i.l.bf16 %v6731_v32  ;;  %v6743_v41 = vunpack.i.h.bf16 %v6741_v6  ;;  %v6742_v46 = vunpack.i.l.bf16 %v6741_v6 }
 0x390   :  { %4979 = vmatprep.mubr.bf16.mxu1 %v4706_v62 }
 0x391   :  { %4980 = vmatmul.mubr.bf16.gmra.mxu1 %v4705_v19  ;;  %v4621_v40 = vsel %vm4608_vm5, %v4604_v11, %v6732_v1  ;;  %v4622_v10 = vsel %vm4608_vm5, %v4605_v51, %v6733_v20  ;;  %v4655_v23 = vsel %vm3498_vm1, %v9336_v61, %v6743_v41  ;;  %v4654_v47 = vsel %vm3498_vm1, %v9307_v15, %v6742_v46 }
 0x392   :  { %v6736_v39 = vpop.permute.xlu1 %6735  ;;  %v6746_v55 = vpop.permute.xlu0 %6745 }
 0x393   :  { %v6738_v9 = vunpack.i.h.bf16 %v6736_v39  ;;  %v6737_v60 = vunpack.i.l.bf16 %v6736_v39  ;;  %v6748_v8 = vunpack.i.h.bf16 %v6746_v55  ;;  %v6747_v35 = vunpack.i.l.bf16 %v6746_v55 }
 0x395   :  { %v4638_v53 = vsel %vm4625_vm6, %v4621_v40, %v6737_v60  ;;  %v4639_v57 = vsel %vm4625_vm6, %v4622_v10, %v6738_v9  ;;  %v4670_v63 = vsel %vm4608_vm5, %v4654_v47, %v6747_v35  ;;  %v4671_v33 = vsel %vm4608_vm5, %v4655_v23, %v6748_v8 }
 0x396   :  { %v6756_v49 = vpop.permute.xlu1 %6755  ;;  %v6751_v5 = vpop.permute.xlu0 %6750  ;;  %v4708_v2 = vpack.c.bf16 %v4639_v57, %v4638_v53 }
 0x397   :  { %v6753_v30 = vunpack.i.h.bf16 %v6751_v5  ;;  %v6752_v34 = vunpack.i.l.bf16 %v6751_v5  ;;  %v6758_v15 = vunpack.i.h.bf16 %v6756_v49  ;;  %v6757_v16 = vunpack.i.l.bf16 %v6756_v49 }
 0x399   :  { %v4686_v31 = vsel %vm4625_vm6, %v4670_v63, %v6752_v34  ;;  %v4687_v48 = vsel %vm4625_vm6, %v4671_v33, %v6753_v30  ;;  %v4607_v22 = vsel %vm3498_vm1, %v9256_v26, %v6758_v15  ;;  %v4606_v45 = vsel %vm3498_vm1, %v9241_v28, %v6757_v16 }
 0x39a   :  { %v6761_v4 = vpop.permute.xlu1 %6760  ;;  %v6766_v27 = vpop.permute.xlu0 %6765  ;;  %v4709_v61 = vpack.c.bf16 %v4687_v48, %v4686_v31 }
 0x39b   :  { %v6763_v59 = vunpack.i.h.bf16 %v6761_v4  ;;  %v6762_v43 = vunpack.i.l.bf16 %v6761_v4  ;;  %v6768_v3 = vunpack.i.h.bf16 %v6766_v27  ;;  %v6767_v36 = vunpack.i.l.bf16 %v6766_v27 }
 0x39c   :  { %4987 = vmatprep.mubr.bf16.mxu1 %v4709_v61 }
 0x39d   :  { %4988 = vmatmul.mubr.bf16.gmra.mxu1 %v4708_v2  ;;  %v4623_v6 = vsel %vm4608_vm5, %v4606_v45, %v6762_v43  ;;  %v4624_v62 = vsel %vm4608_vm5, %v4607_v22, %v6763_v59 }
 0x39e   :  { %v6781_v13 = vpop.permute.xlu1 %6780  ;;  %v6771_v44 = vpop.permute.xlu0 %6770 }
 0x39f   :  { %v6773_v52 = vunpack.i.h.bf16 %v6771_v44  ;;  %v6772_v29 = vunpack.i.l.bf16 %v6771_v44  ;;  %v6783_v18 = vunpack.i.h.bf16 %v6781_v13  ;;  %v6782_v56 = vunpack.i.l.bf16 %v6781_v13 }
 0x3a1   :  { %v4657_v17 = vsel %vm3498_vm1, %v9351_v0, %v6773_v52  ;;  %v4656_v42 = vsel %vm3498_vm1, %v9331_v24, %v6772_v29  ;;  %v4640_v0 = vsel %vm4625_vm6, %v4623_v6, %v6782_v56  ;;  %v4641_v21 = vsel %vm4625_vm6, %v4624_v62, %v6783_v18  ;;  %v6522_v55 = vpop.f32.mrf.mxu0 }
 0x3a2   :  { %v6776_v32 = vpop.permute.xlu0 %6775  ;;  %v4672_v24 = vsel %vm4608_vm5, %v4656_v42, %v6767_v36  ;;  %v4673_v26 = vsel %vm4608_vm5, %v4657_v17, %v6768_v3  ;;  %v4711_v39 = vpack.c.bf16 %v4641_v21, %v4640_v0 }
 0x3a3   :  { %v6778_v19 = vunpack.i.h.bf16 %v6776_v32  ;;  %v6777_v7 = vunpack.i.l.bf16 %v6776_v32  ;;  %v5038_v41 = vpop.f32.mrf.mxu0 }
 0x3a5   :  { %v4688_v20 = vsel %vm4625_vm6, %v4672_v24, %v6777_v7  ;;  %v4689_v28 = vsel %vm4625_vm6, %v4673_v26, %v6778_v19  ;;  %v6523_v8 = vpop.f32.mrf.mxu0 }
 0x3a6   :  { %v4712_v1 = vpack.c.bf16 %v4689_v28, %v4688_v20 }
 0x3a7   :  { %v5041_v10 = vpop.f32.mrf.mxu0 }
 0x3a8   :  { %4995 = vmatprep.mubr.bf16.mxu1 %v4712_v1 }
 0x3a9   :  { %4996 = vmatmul.mubr.bf16.gmra.mxu1 %v4711_v39 }
 0x3ad   :  { %v6526_v63 = vpop.f32.mrf.mxu0 }
 0x3af   :  { %v5054_v31 = vpop.f32.mrf.mxu0 }
 0x3b1   :  { %v6527_v61 = vpop.f32.mrf.mxu0 }
 0x3b3   :  { %v5057_v44 = vpop.f32.mrf.mxu0 }
 0x3c1   :  { %v6530_v22 = vpop.f32.mrf.mxu0 }
 0x3c3   :  { %v5070_v3 = vpop.f32.mrf.mxu0 }
 0x3c5   :  { %v6531_v62 = vpop.f32.mrf.mxu0 }
 0x3c7   :  { %v5073_v24 = vpop.f32.mrf.mxu0 }
 0x415   :  { %v6438_v46 = vpop.f32.mrf.mxu1 }
 0x417   :  { %v6439_v9 = vpop.f32.mrf.mxu1 }
 0x418   :  { %v6440_v60 = vadd.f32 %v6439_v9, %v6438_v46  ;;  %v6534_v9 = vpop.f32.mrf.mxu0 }
 0x419   :  { %v6441_v35 = vpop.f32.mrf.mxu1 }
 0x41a   :  { %v5039_v51 = vadd.f32 %v6440_v60, %v5038_v41 }
 0x41b   :  { %v6442_v11 = vpop.f32.mrf.mxu1 }
 0x41c   :  { %v6443_v40 = vadd.f32 %v6442_v11, %v6441_v35  ;;  %5117 = vrot.lane.b32.xlu1 %v5039_v51, %s7383_s19 }
 0x41e   :  { %v5042_v49 = vadd.f32 %v6443_v40, %v5041_v10 }
 0x420   :  { %5119 = vrot.lane.b32.xlu0 %v5042_v49, %s7383_s19 }
 0x421   :  { %v6444_v5 = vpop.f32.mrf.mxu1 }
 0x423   :  { %v6445_v23 = vpop.f32.mrf.mxu1 }
 0x424   :  { %v6446_v47 = vadd.f32 %v6445_v23, %v6444_v5 }
 0x425   :  { %v6447_v30 = vpop.f32.mrf.mxu1 }
 0x426   :  { %v5047_v34 = vadd.f32 %v6522_v55, %v6446_v47 }
 0x427   :  { %v6448_v53 = vpop.f32.mrf.mxu1 }
 0x428   :  { %v6449_v57 = vadd.f32 %v6448_v53, %v6447_v30  ;;  %5121 = vrot.lane.b32.xlu1 %v5047_v34, %s7383_s19 }
 0x42a   :  { %v5050_v33 = vadd.f32 %v6523_v8, %v6449_v57  ;;  %v5086_v8 = vpop.f32.mrf.mxu0 }
 0x42c   :  { %5123 = vrot.lane.b32.xlu0 %v5050_v33, %s7383_s19  ;;  %v6535_v40 = vpop.f32.mrf.mxu0 }
 0x42d   :  { %v6450_v48 = vpop.f32.mrf.mxu1 }
 0x42e   :  { %v5089_v47 = vpop.f32.mrf.mxu0 }
 0x42f   :  { %v6451_v4 = vpop.f32.mrf.mxu1 }
 0x430   :  { %v6452_v27 = vadd.f32 %v6451_v4, %v6450_v48 }
 0x431   :  { %v6453_v2 = vpop.f32.mrf.mxu1 }
 0x432   :  { %v5055_v15 = vadd.f32 %v6452_v27, %v5054_v31  ;;  %v9506_v27 = vpop.permute.xlu0 %4720 }
 0x433   :  { %v6454_v16 = vpop.f32.mrf.mxu1 }
 0x434   :  { %v6455_v13 = vadd.f32 %v6454_v16, %v6453_v2  ;;  %5125 = vrot.lane.b32.xlu1 %v5055_v15, %s7383_s19  ;;  %v4724_v16 = vadd.f32 %v9506_v27, %v8770_v25  ;;  %v4727_v25 = vadd.f32 %v9506_v27, %v8779_v50 }
 0x436   :  { %v5058_v59 = vadd.f32 %v6455_v13, %v5057_v44 }
 0x438   :  { %5127 = vrot.lane.b32.xlu0 %v5058_v59, %s7383_s19  ;;  %v4725_v59 = vadd.f32 %v9506_v27, %v8773_v12 }
 0x439   :  { %v6456_v43 = vpop.f32.mrf.mxu1 }
 0x43b   :  { %v6457_v52 = vpop.f32.mrf.mxu1 }
 0x43c   :  { %v6458_v29 = vadd.f32 %v6457_v52, %v6456_v43 }
 0x43d   :  { %v6459_v18 = vpop.f32.mrf.mxu1 }
 0x43e   :  { %v5063_v56 = vadd.f32 %v6526_v63, %v6458_v29  ;;  %v4726_v29 = vadd.f32 %v9506_v27, %v8776_v14 }
 0x43f   :  { %v6460_v17 = vpop.f32.mrf.mxu1 }
 0x440   :  { %v6461_v42 = vadd.f32 %v6460_v17, %v6459_v18  ;;  %5129 = vrot.lane.b32.xlu1 %v5063_v56, %s7383_s19 }
 0x442   :  { %v5066_v45 = vadd.f32 %v6527_v61, %v6461_v42  ;;  %v4723_v61 = vadd.f32 %v9506_v27, %v8767_v37 }
 0x444   :  { %5131 = vrot.lane.b32.xlu0 %v5066_v45, %s7383_s19 }
 0x445   :  { %v6462_v36 = vpop.f32.mrf.mxu1 }
 0x447   :  { %v6463_v32 = vpop.f32.mrf.mxu1 }
 0x448   :  { %v6464_v6 = vadd.f32 %v6463_v32, %v6462_v36  ;;  %v4729_v32 = vadd.f32 %v9506_v27, %v8785_v54 }
 0x449   :  { %v6465_v19 = vpop.f32.mrf.mxu1 }
 0x44a   :  { %v5071_v7 = vadd.f32 %v6464_v6, %v5070_v3 }
 0x44b   :  { %v6466_v0 = vpop.f32.mrf.mxu1 }
 0x44c   :  { %v6467_v21 = vadd.f32 %v6466_v0, %v6465_v19  ;;  %5133 = vrot.lane.b32.xlu1 %v5071_v7, %s7383_s19 }
 0x44e   :  { %v5074_v26 = vadd.f32 %v6467_v21, %v5073_v24  ;;  %v9728_v21 = vld [vmem:[#allocation6_spill] sm:$0xff] }
 0x44f   :  { %v4731_v24 = vadd.f32 %v9506_v27, %v9728_v21 }
 0x450   :  { %5135 = vrot.lane.b32.xlu0 %v5074_v26, %s7383_s19 }
 0x451   :  { %v6468_v20 = vpop.f32.mrf.mxu1 }
 0x453   :  { %v6469_v28 = vpop.f32.mrf.mxu1 }
 0x454   :  { %v6470_v1 = vadd.f32 %v6469_v28, %v6468_v20  ;;  %v9729_v20 = vld [vmem:[#allocation7_spill] sm:$0xff] }
 0x455   :  { %v6471_v39 = vpop.f32.mrf.mxu1  ;;  %v4732_v28 = vadd.f32 %v9506_v27, %v9729_v20 }
 0x456   :  { %v5079_v55 = vadd.f32 %v6530_v22, %v6470_v1  ;;  %v4728_v22 = vadd.f32 %v9506_v27, %v8782_v58 }
 0x457   :  { %v6472_v41 = vpop.f32.mrf.mxu1 }
 0x458   :  { %v6473_v46 = vadd.f32 %v6472_v41, %v6471_v39  ;;  %5137 = vrot.lane.b32.xlu1 %v5079_v55, %s7383_s19  ;;  %v9730_v41 = vld [vmem:[#allocation8_spill] sm:$0xff] }
 0x45a   :  { %v5082_v60 = vadd.f32 %v6531_v62, %v6473_v46  ;;  %v4730_v62 = vadd.f32 %v9506_v27, %v8788_v38  ;;  %v4733_v46 = vadd.f32 %v9506_v27, %v9730_v41 }
 0x45c   :  { %5139 = vrot.lane.b32.xlu0 %v5082_v60, %s7383_s19 }
 0x45d   :  { %v6474_v35 = vpop.f32.mrf.mxu1 }
 0x45f   :  { %v6475_v51 = vpop.f32.mrf.mxu1 }
 0x460   :  { %v6476_v11 = vadd.f32 %v6475_v51, %v6474_v35 }
 0x461   :  { %v6477_v10 = vpop.f32.mrf.mxu1 }
 0x462   :  { %v5087_v49 = vadd.f32 %v6476_v11, %v5086_v8  ;;  %v9731_v8 = vld [vmem:[#allocation9_spill] sm:$0xff] }
 0x463   :  { %v6478_v5 = vpop.f32.mrf.mxu1  ;;  %v4734_v35 = vadd.f32 %v9506_v27, %v9731_v8 }
 0x464   :  { %v6479_v23 = vadd.f32 %v6478_v5, %v6477_v10  ;;  %5141 = vrot.lane.b32.xlu1 %v5087_v49, %s7383_s19  ;;  %v9732_v49 = vld [vmem:[#allocation10_spill] sm:$0xff] }
 0x465   :  { %v4735_v5 = vadd.f32 %v9506_v27, %v9732_v49  ;;  %v9742_v49 = vld [vmem:[#allocation20_spill] sm:$0xff] }
 0x466   :  { %v5090_v30 = vadd.f32 %v6479_v23, %v5089_v47 }
 0x468   :  { %5143 = vrot.lane.b32.xlu0 %v5090_v30, %s7383_s19  ;;  %v9733_v30 = vld [vmem:[#allocation11_spill] sm:$0xff] }
 0x469   :  { %v6480_v34 = vpop.f32.mrf.mxu1 }
 0x46b   :  { %v6481_v53 = vpop.f32.mrf.mxu1 }
 0x46c   :  { %v6482_v57 = vadd.f32 %v6481_v53, %v6480_v34  ;;  %v4736_v34 = vadd.f32 %v9506_v27, %v9733_v30 }
 0x46d   :  { %v6483_v63 = vpop.f32.mrf.mxu1 }
 0x46e   :  { %v5095_v33 = vadd.f32 %v6534_v9, %v6482_v57 }
 0x46f   :  { %v6484_v31 = vpop.f32.mrf.mxu1 }
 0x470   :  { %v6485_v48 = vadd.f32 %v6484_v31, %v6483_v63  ;;  %5145 = vrot.lane.b32.xlu1 %v5095_v33, %s7383_s19  ;;  %v9734_v31 = vld [vmem:[#allocation12_spill] sm:$0xff] }
 0x472   :  { %v5098_v4 = vadd.f32 %v6535_v40, %v6485_v48  ;;  %v4737_v48 = vadd.f32 %v9506_v27, %v9734_v31  ;;  %v7348_v31 = vld [vmem:[%s9657_s2 + $0x38] sm:$0xff] }
 0x474   :  { %5147 = vrot.lane.b32.xlu0 %v5098_v4, %s7383_s19 }
 0x48e   :  { %v5118_v2 = vpop.permute.xlu1 %5117 }
 0x48f   :  { %v5165_v15 = vadd.f32 %v5118_v2, %v4723_v61  ;;  %v9735_v2 = vld [vmem:[#allocation13_spill] sm:$0xff] }
 0x491   :  { %7309 = vtanh.f32 %v5165_v15  ;;  %v4738_v15 = vadd.f32 %v9506_v27, %v9735_v2  ;;  %v7341_v27 = vld [vmem:[%s9657_s2] sm:$0xff] }
 0x492   :  { %v5120_v13 = vpop.permute.xlu0 %5119  ;;  %v9744_v2 = vld [vmem:[#allocation22_spill] sm:$0xff] }
 0x493   :  { %v5166_v44 = vadd.f32 %v5120_v13, %v4724_v16 }
 0x495   :  { %7311 = vtanh.f32 %v5166_v44 }
 0x49a   :  { %v5122_v43 = vpop.permute.xlu1 %5121 }
 0x49b   :  { %v5167_v52 = vadd.f32 %v5122_v43, %v4725_v59 }
 0x49d   :  { %7313 = vtanh.f32 %v5167_v52 }
 0x49e   :  { %v7310_v18 = vpop.eup %7309  ;;  %v5124_v37 = vpop.permute.xlu0 %5123 }
 0x49f   :  { %v5168_v56 = vadd.f32 %v5124_v37, %v4726_v29  ;;  %5245 = vrot.lane.b32.xlu1 %v7310_v18, %s7383_s19  ;;  %v9736_v29 = vld [vmem:[#allocation14_spill] sm:$0xff] }
 0x4a0   :  { %v5197_v18 = vsub.f32 1.0, %v9736_v29 }
 0x4a1   :  { %7315 = vtanh.f32 %v5168_v56 }
 0x4a2   :  { %v7312_v17 = vpop.eup %7311  ;;  %v5213_v56 = vmul.f32 %v7341_v27, %v5197_v18 }
 0x4a3   :  { %5247 = vrot.lane.b32.xlu0 %v7312_v17, %s7383_s19 }
 0x4a6   :  { %v5126_v42 = vpop.permute.xlu1 %5125 }
 0x4a7   :  { %v5169_v12 = vadd.f32 %v5126_v42, %v4727_v25  ;;  %v9737_v25 = vld [vmem:[#allocation15_spill] sm:$0xff] }
 0x4a8   :  { %v5198_v42 = vsub.f32 1.0, %v9737_v25 }
 0x4a9   :  { %7317 = vtanh.f32 %v5169_v12 }
 0x4aa   :  { %v7314_v45 = vpop.eup %7313  ;;  %v5128_v14 = vpop.permute.xlu0 %5127 }
 0x4ab   :  { %v5170_v3 = vadd.f32 %v5128_v14, %v4728_v22  ;;  %5249 = vrot.lane.b32.xlu1 %v7314_v45, %s7383_s19  ;;  %v7342_v45 = vld [vmem:[%s9657_s2 + $0x8] sm:$0xff] }
 0x4ac   :  { %v5214_v14 = vmul.f32 %v7342_v45, %v5198_v42 }
 0x4ad   :  { %7319 = vtanh.f32 %v5170_v3 }
 0x4ae   :  { %v7316_v36 = vpop.eup %7315 }
 0x4af   :  { %5251 = vrot.lane.b32.xlu0 %v7316_v36, %s7383_s19 }
 0x4b2   :  { %v5130_v6 = vpop.permute.xlu1 %5129 }
 0x4b3   :  { %v5171_v50 = vadd.f32 %v5130_v6, %v4729_v32  ;;  %v9738_v32 = vld [vmem:[#allocation16_spill] sm:$0xff] }
 0x4b4   :  { %v5199_v6 = vsub.f32 1.0, %v9738_v32 }
 0x4b5   :  { %7321 = vtanh.f32 %v5171_v50 }
 0x4b6   :  { %v7318_v19 = vpop.eup %7317  ;;  %v5132_v58 = vpop.permute.xlu0 %5131 }
 0x4b7   :  { %v5172_v7 = vadd.f32 %v5132_v58, %v4730_v62  ;;  %5253 = vrot.lane.b32.xlu1 %v7318_v19, %s7383_s19  ;;  %v7343_v62 = vld [vmem:[%s9657_s2 + $0x10] sm:$0xff] }
 0x4b8   :  { %v5215_v19 = vmul.f32 %v7343_v62, %v5199_v6 }
 0x4b9   :  { %7323 = vtanh.f32 %v5172_v7  ;;  %v9739_v7 = vld [vmem:[#allocation17_spill] sm:$0xff] }
 0x4ba   :  { %v7320_v0 = vpop.eup %7319 }
 0x4bb   :  { %5255 = vrot.lane.b32.xlu0 %v7320_v0, %s7383_s19  ;;  %v5200_v0 = vsub.f32 1.0, %v9739_v7 }
 0x4be   :  { %v5134_v26 = vpop.permute.xlu1 %5133 }
 0x4bf   :  { %v5173_v54 = vadd.f32 %v5134_v26, %v4731_v24  ;;  %v7344_v26 = vld [vmem:[%s9657_s2 + $0x18] sm:$0xff] }
 0x4c1   :  { %7325 = vtanh.f32 %v5173_v54  ;;  %v5216_v54 = vmul.f32 %v7344_v26, %v5200_v0 }
 0x4c2   :  { %v7322_v1 = vpop.eup %7321  ;;  %v5136_v38 = vpop.permute.xlu0 %5135 }
 0x4c3   :  { %v5174_v39 = vadd.f32 %v5136_v38, %v4732_v28  ;;  %5257 = vrot.lane.b32.xlu1 %v7322_v1, %s7383_s19  ;;  %v9740_v1 = vld [vmem:[#allocation18_spill] sm:$0xff] }
 0x4c4   :  { %v5201_v38 = vsub.f32 1.0, %v9740_v1 }
 0x4c5   :  { %7327 = vtanh.f32 %v5174_v39 }
 0x4c6   :  { %v7324_v55 = vpop.eup %7323 }
 0x4c7   :  { %5259 = vrot.lane.b32.xlu0 %v7324_v55, %s7383_s19  ;;  %v7345_v55 = vld [vmem:[%s9657_s2 + $0x20] sm:$0xff] }
 0x4c8   :  { %v5217_v41 = vmul.f32 %v7345_v55, %v5201_v38 }
 0x4ca   :  { %v5138_v9 = vpop.permute.xlu1 %5137 }
 0x4cb   :  { %v5175_v60 = vadd.f32 %v5138_v9, %v4733_v46  ;;  %v9741_v9 = vld [vmem:[#allocation19_spill] sm:$0xff] }
 0x4cd   :  { %7329 = vtanh.f32 %v5175_v60  ;;  %v5202_v60 = vsub.f32 1.0, %v9741_v9 }
 0x4ce   :  { %v7326_v51 = vpop.eup %7325  ;;  %v5140_v11 = vpop.permute.xlu0 %5139 }
 0x4cf   :  { %v5176_v40 = vadd.f32 %v5140_v11, %v4734_v35  ;;  %5261 = vrot.lane.b32.xlu1 %v7326_v51, %s7383_s19  ;;  %v7346_v51 = vld [vmem:[%s9657_s2 + $0x28] sm:$0xff] }
 0x4d0   :  { %v5218_v11 = vmul.f32 %v7346_v51, %v5202_v60 }
 0x4d1   :  { %7331 = vtanh.f32 %v5176_v40 }
 0x4d2   :  { %v7328_v10 = vpop.eup %7327 }
 0x4d3   :  { %5263 = vrot.lane.b32.xlu0 %v7328_v10, %s7383_s19 }
 0x4d6   :  { %v5142_v23 = vpop.permute.xlu1 %5141 }
 0x4d7   :  { %v5177_v47 = vadd.f32 %v5142_v23, %v4735_v5  ;;  %v5203_v5 = vsub.f32 1.0, %v9742_v49 }
 0x4d9   :  { %7333 = vtanh.f32 %v5177_v47  ;;  %v7347_v47 = vld [vmem:[%s9657_s2 + $0x30] sm:$0xff] }
 0x4da   :  { %v7330_v53 = vpop.eup %7329  ;;  %v5144_v57 = vpop.permute.xlu0 %5143  ;;  %v5219_v30 = vmul.f32 %v7347_v47, %v5203_v5 }
 0x4db   :  { %v5178_v63 = vadd.f32 %v5144_v57, %v4736_v34  ;;  %5265 = vrot.lane.b32.xlu1 %v7330_v53, %s7383_s19  ;;  %v9743_v53 = vld [vmem:[#allocation21_spill] sm:$0xff] }
 0x4dc   :  { %v5204_v57 = vsub.f32 1.0, %v9743_v53 }
 0x4dd   :  { %7335 = vtanh.f32 %v5178_v63 }
 0x4de   :  { %v7332_v33 = vpop.eup %7331 }
 0x4df   :  { %5267 = vrot.lane.b32.xlu0 %v7332_v33, %s7383_s19 }
 0x4e2   :  { %v5146_v4 = vpop.permute.xlu1 %5145 }
 0x4e3   :  { %v5179_v61 = vadd.f32 %v5146_v4, %v4737_v48  ;;  %v5220_v48 = vmul.f32 %v7348_v31, %v5204_v57 }
 0x4e5   :  { %7337 = vtanh.f32 %v5179_v61 }
 0x4e6   :  { %v7334_v16 = vpop.eup %7333  ;;  %v5148_v13 = vpop.permute.xlu0 %5147 }
 0x4e7   :  { %v5180_v44 = vadd.f32 %v5148_v13, %v4738_v15  ;;  %5269 = vrot.lane.b32.xlu1 %v7334_v16, %s7383_s19  ;;  %v5205_v15 = vsub.f32 1.0, %v9744_v2  ;;  %v7349_v13 = vld [vmem:[%s9657_s2 + $0x40] sm:$0xff] }
 0x4e9   :  { %7339 = vtanh.f32 %v5180_v44  ;;  %v5221_v44 = vmul.f32 %v7349_v13, %v5205_v15 }
 0x4ea   :  { %v7336_v59 = vpop.eup %7335 }
 0x4eb   :  { %5271 = vrot.lane.b32.xlu0 %v7336_v59, %s7383_s19 }
 0x4f2   :  { %v7338_v43 = vpop.eup %7337 }
 0x4f3   :  { %5273 = vrot.lane.b32.xlu1 %v7338_v43, %s7383_s19  ;;  %v9745_v43 = vld [vmem:[#allocation23_spill] sm:$0xff] }
 0x4f6   :  { %v7340_v52 = vpop.eup %7339 }
 0x4f7   :  { %5275 = vrot.lane.b32.xlu0 %v7340_v52, %s7383_s19  ;;  %v5206_v52 = vsub.f32 1.0, %v9745_v43 }
 0x511   :  { %v5246_v37 = vpop.permute.xlu1 %5245 }
 0x512   :  { %v5293_v17 = vmul.f32 %v9736_v29, %v5246_v37  ;;  %v7350_v37 = vld [vmem:[%s9657_s2 + $0x48] sm:$0xff] }
 0x513   :  { %v5222_v27 = vmul.f32 %v7350_v37, %v5206_v52 }
 0x514   :  { %v5309_v12 = vadd.f32 %v5293_v17, %v5213_v56 }
 0x515   :  { %v5248_v22 = vpop.permute.xlu0 %5247 }
 0x516   :  { %5325 = vst.msk [vmem:[#allocation3] sm:$0xff] %vm3498_vm1, %v5309_v12  ;;  %v5294_v3 = vmul.f32 %v9737_v25, %v5248_v22  ;;  %v9746_v25 = vld [vmem:[#allocation24_spill] sm:$0xff] }
 0x517   :  { %v5207_v42 = vsub.f32 1.0, %v9746_v25  ;;  %v7351_v22 = vld [vmem:[%s9657_s2 + $0x50] sm:$0xff] }
 0x518   :  { %v5310_v36 = vadd.f32 %v5294_v3, %v5214_v14  ;;  %v9747_v3 = vld [vmem:[#allocation25_spill] sm:$0xff] }
 0x519   :  { %v5223_v45 = vmul.f32 %v7351_v22, %v5207_v42 }
 0x51a   :  { %5326 = vst.msk [vmem:[#allocation3 + $0x8] sm:$0xff] %vm3498_vm1, %v5310_v36  ;;  %v5208_v36 = vsub.f32 1.0, %v9747_v3 }
 0x51d   :  { %v5250_v50 = vpop.permute.xlu1 %5249 }
 0x51e   :  { %v5295_v58 = vmul.f32 %v9738_v32, %v5250_v50  ;;  %v7352_v50 = vld [vmem:[%s9657_s2 + $0x58] sm:$0xff] }
 0x51f   :  { %v5224_v62 = vmul.f32 %v7352_v50, %v5208_v36 }
 0x520   :  { %v5311_v21 = vadd.f32 %v5295_v58, %v5215_v19 }
 0x521   :  { %v5252_v24 = vpop.permute.xlu0 %5251 }
 0x522   :  { %5327 = vst.msk [vmem:[#allocation3 + $0x10] sm:$0xff] %vm3498_vm1, %v5311_v21  ;;  %v5296_v20 = vmul.f32 %v9739_v7, %v5252_v24  ;;  %v9748_v7 = vld [vmem:[#allocation26_spill] sm:$0xff] }
 0x523   :  { %v5209_v0 = vsub.f32 1.0, %v9748_v7  ;;  %v7353_v24 = vld [vmem:[%s9657_s2 + $0x60] sm:$0xff] }
 0x524   :  { %v5312_v28 = vadd.f32 %v5296_v20, %v5216_v54  ;;  %v9749_v20 = vld [vmem:[#allocation27_spill] sm:$0xff] }
 0x525   :  { %v5225_v26 = vmul.f32 %v7353_v24, %v5209_v0 }
 0x526   :  { %5328 = vst.msk [vmem:[#allocation3 + $0x18] sm:$0xff] %vm3498_vm1, %v5312_v28  ;;  %v5210_v28 = vsub.f32 1.0, %v9749_v20 }
 0x529   :  { %v5254_v39 = vpop.permute.xlu1 %5253 }
 0x52a   :  { %v5297_v46 = vmul.f32 %v9740_v1, %v5254_v39  ;;  %v7354_v39 = vld [vmem:[%s9657_s2 + $0x68] sm:$0xff] }
 0x52b   :  { %v5226_v55 = vmul.f32 %v7354_v39, %v5210_v28 }
 0x52c   :  { %v5313_v8 = vadd.f32 %v5297_v46, %v5217_v41 }
 0x52d   :  { %v5256_v35 = vpop.permute.xlu0 %5255 }
 0x52e   :  { %5329 = vst.msk [vmem:[#allocation3 + $0x20] sm:$0xff] %vm3498_vm1, %v5313_v8  ;;  %v5298_v40 = vmul.f32 %v9741_v9, %v5256_v35  ;;  %v9750_v9 = vld [vmem:[#allocation28_spill] sm:$0xff] }
 0x52f   :  { %v5211_v60 = vsub.f32 1.0, %v9750_v9  ;;  %v7355_v35 = vld [vmem:[%s9657_s2 + $0x70] sm:$0xff] }
 0x530   :  { %v5314_v10 = vadd.f32 %v5298_v40, %v5218_v11  ;;  %v9751_v40 = vld [vmem:[#allocation29_spill] sm:$0xff] }
 0x531   :  { %v5227_v51 = vmul.f32 %v7355_v35, %v5211_v60 }
 0x532   :  { %5330 = vst.msk [vmem:[#allocation3 + $0x28] sm:$0xff] %vm3498_vm1, %v5314_v10  ;;  %v5212_v10 = vsub.f32 1.0, %v9751_v40 }
 0x535   :  { %v5258_v23 = vpop.permute.xlu1 %5257 }
 0x536   :  { %v5299_v34 = vmul.f32 %v9742_v49, %v5258_v23  ;;  %v7356_v23 = vld [vmem:[%s9657_s2 + $0x78] sm:$0xff] }
 0x537   :  { %v5228_v47 = vmul.f32 %v7356_v23, %v5212_v10 }
 0x538   :  { %v5315_v63 = vadd.f32 %v5299_v34, %v5219_v30 }
 0x539   :  { %v5260_v33 = vpop.permute.xlu0 %5259 }
 0x53a   :  { %5331 = vst.msk [vmem:[#allocation3 + $0x30] sm:$0xff] %vm3498_vm1, %v5315_v63  ;;  %v5300_v4 = vmul.f32 %v9743_v53, %v5260_v33 }
 0x53c   :  { %v5316_v61 = vadd.f32 %v5300_v4, %v5220_v48 }
 0x53e   :  { %5332 = vst.msk [vmem:[#allocation3 + $0x38] sm:$0xff] %vm3498_vm1, %v5316_v61 }
 0x541   :  { %v5262_v16 = vpop.permute.xlu1 %5261 }
 0x542   :  { %v5301_v59 = vmul.f32 %v9744_v2, %v5262_v16 }
 0x544   :  { %v5317_v29 = vadd.f32 %v5301_v59, %v5221_v44 }
 0x545   :  { %v5264_v18 = vpop.permute.xlu0 %5263 }
 0x546   :  { %5333 = vst.msk [vmem:[#allocation3 + $0x40] sm:$0xff] %vm3498_vm1, %v5317_v29  ;;  %v5302_v56 = vmul.f32 %v9745_v43, %v5264_v18 }
 0x548   :  { %v5318_v17 = vadd.f32 %v5302_v56, %v5222_v27 }
 0x54a   :  { %5334 = vst.msk [vmem:[#allocation3 + $0x48] sm:$0xff] %vm3498_vm1, %v5318_v17 }
 0x54d   :  { %v5266_v12 = vpop.permute.xlu1 %5265 }
 0x54e   :  { %v5303_v14 = vmul.f32 %v9746_v25, %v5266_v12 }
 0x550   :  { %v5319_v32 = vadd.f32 %v5303_v14, %v5223_v45 }
 0x551   :  { %v5268_v6 = vpop.permute.xlu0 %5267 }
 0x552   :  { %5335 = vst.msk [vmem:[#allocation3 + $0x50] sm:$0xff] %vm3498_vm1, %v5319_v32  ;;  %v5304_v19 = vmul.f32 %v9747_v3, %v5268_v6 }
 0x554   :  { %v5320_v58 = vadd.f32 %v5304_v19, %v5224_v62 }
 0x556   :  { %5336 = vst.msk [vmem:[#allocation3 + $0x58] sm:$0xff] %vm3498_vm1, %v5320_v58 }
 0x559   :  { %v5270_v21 = vpop.permute.xlu1 %5269 }
 0x55a   :  { %v5305_v54 = vmul.f32 %v9748_v7, %v5270_v21 }
 0x55c   :  { %v5321_v1 = vadd.f32 %v5305_v54, %v5225_v26 }
 0x55d   :  { %v5272_v38 = vpop.permute.xlu0 %5271 }
 0x55e   :  { %5337 = vst.msk [vmem:[#allocation3 + $0x60] sm:$0xff] %vm3498_vm1, %v5321_v1  ;;  %v5306_v41 = vmul.f32 %v9749_v20, %v5272_v38 }
 0x560   :  { %v5322_v46 = vadd.f32 %v5306_v41, %v5226_v55 }
 0x562   :  { %5338 = vst.msk [vmem:[#allocation3 + $0x68] sm:$0xff] %vm3498_vm1, %v5322_v46 }
 0x565   :  { %v5274_v8 = vpop.permute.xlu1 %5273 }
 0x566   :  { %v5307_v11 = vmul.f32 %v9750_v9, %v5274_v8 }
 0x568   :  { %v5323_v49 = vadd.f32 %v5307_v11, %v5227_v51 }
 0x569   :  { %v5276_v5 = vpop.permute.xlu0 %5275 }
 0x56a   :  { %5339 = vst.msk [vmem:[#allocation3 + $0x70] sm:$0xff] %vm3498_vm1, %v5323_v49  ;;  %v5308_v30 = vmul.f32 %v9751_v40, %v5276_v5 }
 0x56c   :  { %v5324_v34 = vadd.f32 %v5308_v30, %v5228_v47 }
 0x56e   :  { %5340 = vst.msk [vmem:[#allocation3 + $0x78] sm:$0xff] %vm3498_vm1, %v5324_v34 }
 0x56f   :  { %7368 = shalt.err (!%p7365_p4)
}
 0x570   :  { %s7385_s4 = smov 128   ;;  %s7386_s23 = smov 8  }
 0x571   :  { %5352 = dma.vmem_to_hbm [thread:$0]  %s5347_s6, 2048, %s9663_s8, [#allocation4], %s7385_s4, %s7385_s4, %s7386_s23  }
 0x572   :  { %7377 = dma.done.wait [#allocation4], 2048  }
 0x573   :  { %7378 = vsyncadd [#allocation4], 4294965248 }
 0x574   :  { %5356 = vsyncpa [#allocation4], 1 }

</bundles_post_ra>
